<compile_context>
chip_gen: v6e
topology: v6e:2x2x1
jax: 0.10.0
libtpu: 0.0.40
codegen_flags: <defaults>
</compile_context>

<pallas_src>
import functools

import jax
import jax.numpy as jnp
from jax.experimental import pallas as pl
from jax.experimental.pallas import tpu as pltpu

EPS = 1e-5
COMPUTE_DTYPE = jnp.bfloat16   # MXU input / inter-layer activation dtype


# ----------------------------------------------------------------------------
# Hardware-aware sizing helpers (v5e/v6e: 128 MiB VMEM, v7x: 64 MiB)
# ----------------------------------------------------------------------------
@functools.lru_cache(maxsize=None)
def _vmem_capacity_bytes():
    try:
        return int(pltpu.get_tpu_info().vmem_capacity_bytes)
    except Exception:
        return 64 * 1024 * 1024          # conservative (v7x-sized) fallback


@functools.lru_cache(maxsize=None)
def _vmem_limit_bytes():
    # explicit scoped-VMEM limit: half the physical capacity, capped at 96 MiB
    return int(min(_vmem_capacity_bytes() // 2, 96 * 1024 * 1024))


@functools.lru_cache(maxsize=None)
def _row_tile_target(k_cols):
    # keep the double-buffered bf16 x-block under ~1/8 of physical VMEM
    t = (_vmem_capacity_bytes() // 8) // max(2 * 2 * k_cols, 1)
    return int(max(256, min(2048, (t // 128) * 128)))


def _round_up(x, m):
    return ((x + m - 1) // m) * m


def _choose_row_tiling(m, k_cols):
    """Return (rows_per_block, num_blocks); rows_per_block is a multiple of 128."""
    target = _row_tile_target(k_cols)
    g = -(-m // target)                       # number of grid steps
    tm = _round_up(-(-m // g), 128)           # rows per step (sublane/lane friendly)
    return tm, g


# ----------------------------------------------------------------------------
# Pallas kernels
# ----------------------------------------------------------------------------
def _mm_bias_act_kernel(x_ref, w_ref, b_ref, o_ref, *, apply_relu):
    # bf16 x bf16 -> f32 accumulate on the MXU; f32 epilogue (bias + ReLU); cast on store.
    acc = jnp.dot(x_ref[...], w_ref[...], preferred_element_type=jnp.float32)
    out = acc + b_ref[...]
    if apply_relu:
        out = jnp.maximum(out, 0.0)
    o_ref[...] = out.astype(o_ref.dtype)


def _fc_head_kernel(x_ref, w1_ref, b1_ref, w2_ref, b2_ref, o_ref):
    # fused fc1 + (folded BN) bias + ReLU + fc2 + bias; hidden stays in VMEM/vregs.
    h = jnp.dot(x_ref[...], w1_ref[...], preferred_element_type=jnp.float32)
    h = jnp.maximum(h + b1_ref[...], 0.0)
    out = jnp.dot(h.astype(w2_ref.dtype), w2_ref[...],
                  preferred_element_type=jnp.float32) + b2_ref[...]
    o_ref[...] = out.astype(o_ref.dtype)


# ----------------------------------------------------------------------------
# pallas_call wrappers (M-tiled "parallel" grid, weights resident across steps)
# ----------------------------------------------------------------------------
def _pallas_mm_bias_act(x, w, b, apply_relu, out_dtype):
    m, k = x.shape
    n = w.shape[1]
    tm, g = _choose_row_tiling(m, k)
    mp = tm * g
    if mp != m:
        x = jnp.pad(x, ((0, mp - m), (0, 0)))    # zero rows; sliced off below
    out_itemsize = jnp.dtype(out_dtype).itemsize
    cost = pl.CostEstimate(
        flops=2 * m * k * n,
        transcendentals=0,
        bytes_accessed=int(x.size) * x.dtype.itemsize
        + int(w.size) * w.dtype.itemsize
        + int(b.size) * b.dtype.itemsize
        + mp * n * out_itemsize,
    )
    out = pl.pallas_call(
        functools.partial(_mm_bias_act_kernel, apply_relu=apply_relu),
        out_shape=jax.ShapeDtypeStruct((mp, n), out_dtype),
        grid=(g,),
        in_specs=[
            pl.BlockSpec((tm, k), lambda i: (i, 0)),   # row-tiled activations
            pl.BlockSpec((k, n), lambda i: (0, 0)),    # weights stay resident
            pl.BlockSpec((1, n), lambda i: (0, 0)),    # BN-folded bias
        ],
        out_specs=pl.BlockSpec((tm, n), lambda i: (i, 0)),
        compiler_params=pltpu.CompilerParams(
            dimension_semantics=("parallel",),
            vmem_limit_bytes=_vmem_limit_bytes(),
        ),
        cost_estimate=cost,
    )(x, w, b)
    return out[:m]


def _pallas_fc_head(x, w1, b1, w2, b2):
    m, k = x.shape
    nh = w1.shape[1]
    no = w2.shape[1]
    tm, g = _choose_row_tiling(m, k)
    mp = tm * g
    if mp != m:
        x = jnp.pad(x, ((0, mp - m), (0, 0)))
    cost = pl.CostEstimate(
        flops=2 * m * k * nh + 2 * m * nh * no,
        transcendentals=0,
        bytes_accessed=int(x.size) * x.dtype.itemsize
        + int(w1.size) * w1.dtype.itemsize + int(w2.size) * w2.dtype.itemsize
        + int(b1.size) * b1.dtype.itemsize + int(b2.size) * b2.dtype.itemsize
        + mp * no * 4,
    )
    out = pl.pallas_call(
        _fc_head_kernel,
        out_shape=jax.ShapeDtypeStruct((mp, no), jnp.float32),
        grid=(g,),
        in_specs=[
            pl.BlockSpec((tm, k), lambda i: (i, 0)),
            pl.BlockSpec((k, nh), lambda i: (0, 0)),
            pl.BlockSpec((1, nh), lambda i: (0, 0)),
            pl.BlockSpec((nh, no), lambda i: (0, 0)),
            pl.BlockSpec((1, no), lambda i: (0, 0)),
        ],
        out_specs=pl.BlockSpec((tm, no), lambda i: (i, 0)),
        compiler_params=pltpu.CompilerParams(
            dimension_semantics=("parallel",),
            vmem_limit_bytes=_vmem_limit_bytes(),
        ),
        cost_estimate=cost,
    )(x, w1, b1, w2, b2)
    return out[:m]


# ----------------------------------------------------------------------------
# Trace-time glue: im2col, BN folding, weight permutation
# ----------------------------------------------------------------------------
def _im2col(x_nhwc, kh, kw, stride, pad):
    x = jnp.pad(x_nhwc, ((0, 0), (pad, pad), (pad, pad), (0, 0)))
    n, h, w, c = x.shape
    oh = (h - kh) // stride + 1
    ow = (w - kw) // stride + 1
    cols = [x[:, i:i + stride * (oh - 1) + 1:stride,
              j:j + stride * (ow - 1) + 1:stride, :]
            for i in range(kh) for j in range(kw)]
    patches = jnp.concatenate(cols, axis=-1)              # (n, oh, ow, kh*kw*c)
    return patches.reshape(n * oh * ow, kh * kw * c), (oh, ow)


def _fold_bn(bias, bn, eps=EPS):
    gamma, beta, mean, var = bn
    s = gamma / jnp.sqrt(var + eps)
    eff_bias = ((bias - mean) * s + beta).astype(jnp.float32)
    return s, eff_bias[None, :]


def _prepare(p):
    """Fold BN into weights/biases, reorder fc1 rows to NHWC order, cast weights to bf16."""
    def conv_w(w_oihw, b, bn):
        cout, cin, kh, kw = w_oihw.shape
        w_mat = jnp.transpose(w_oihw, (2, 3, 1, 0)).reshape(kh * kw * cin, cout)
        s, eb = _fold_bn(b, bn)
        return (w_mat * s[None, :]).astype(COMPUTE_DTYPE), eb

    w1, b1 = conv_w(p["w1"], p["b1"], p["bn1"])
    w2, b2 = conv_w(p["w2"], p["b2"], p["bn2"])
    w3, b3 = conv_w(p["w3"], p["b3"], p["bn3"])

    # fc1 rows: torch flatten order is c*49 + h*7 + w; our NHWC flatten is h*224 + w*32 + c.
    c = jnp.arange(32)
    h = jnp.arange(7)
    w = jnp.arange(7)
    torch_row = (c[None, None, :] * 49 + h[:, None, None] * 7 + w[None, :, None]).reshape(-1)
    fc1_w = p["fc1_w"][torch_row, :]
    s, fc1_b = _fold_bn(p["fc1_b"], p["bn_fc"])
    fc1_w = (fc1_w * s[None, :]).astype(COMPUTE_DTYPE)

    return dict(w1=w1, b1=b1, w2=w2, b2=b2, w3=w3, b3=b3,
                fc1_w=fc1_w, fc1_b=fc1_b,
                fc2_w=p["fc2_w"].astype(COMPUTE_DTYPE),
                fc2_b=p["fc2_b"][None, :].astype(jnp.float32))


def _forward(x_nchw, params, mm_fn, fc_fn):
    prep = _prepare(params)
    # NCHW -> NHWC (cin=1, so this is a free reshape), bf16 activations.
    x = jnp.transpose(x_nchw, (0, 2, 3, 1)).astype(COMPUTE_DTYPE)
    n = x.shape[0]
    for w_key, b_key, cout, (kh, kw, stride, pad) in (
        ("w1", "b1", 16, (3, 3, 1, 1)),
        ("w2", "b2", 32, (4, 4, 2, 1)),
        ("w3", "b3", 32, (4, 4, 2, 1)),
    ):
        patches, (oh, ow) = _im2col(x, kh, kw, stride, pad)
        y = mm_fn(patches, prep[w_key], prep[b_key], True, COMPUTE_DTYPE)
        x = y.reshape(n, oh, ow, cout)
    feat = x.reshape(n, -1)                         # NHWC flatten (fc1 rows pre-permuted)
    return fc_fn(feat, prep["fc1_w"], prep["fc1_b"], prep["fc2_w"], prep["fc2_b"])


# ----------------------------------------------------------------------------
# Public entry points + references
# ----------------------------------------------------------------------------
@jax.jit
def mnist_forward(x_nchw, params):
    return _forward(x_nchw, params, _pallas_mm_bias_act, _pallas_fc_head)


def _mm_bias_act_jnp(x, w, b, apply_relu, out_dtype):
    out = jnp.dot(x, w, preferred_element_type=jnp.float32) + b
    if apply_relu:
        out = jnp.maximum(out, 0.0)
    return out.astype(out_dtype)


def _fc_head_jnp(x, w1, b1, w2, b2):
    h = jnp.maximum(jnp.dot(x, w1, preferred_element_type=jnp.float32) + b1, 0.0)
    return jnp.dot(h.astype(w2.dtype), w2, preferred_element_type=jnp.float32) + b2


@jax.jit
def mnist_forward_ref_bf16(x_nchw, params):
    """Pure-JAX path with the exact same bf16/f32 mixed-precision math as the kernels."""
    return _forward(x_nchw, params, _mm_bias_act_jnp, _fc_head_jnp)


@jax.jit
def mnist_forward_ref_f32(x_nchw, p):
    """Independent full-f32 reference of the PyTorch module (eval-mode BN)."""
    def conv(x, w, b, stride, pad):
        y = jax.lax.conv_general_dilated(
            x, w, window_strides=(stride, stride),
            padding=[(pad, pad), (pad, pad)],
            dimension_numbers=("NCHW", "OIHW", "NCHW"),
            precision=jax.lax.Precision.HIGHEST)
        return y + b[None, :, None, None]

    def bn(x, bn_params, axis):
        gamma, beta, mean, var = bn_params
        shp = [1] * x.ndim
        shp[axis] = -1
        return ((x - mean.reshape(shp)) / jnp.sqrt(var.reshape(shp) + EPS)
                * gamma.reshape(shp) + beta.reshape(shp))

    x = jnp.maximum(bn(conv(x_nchw, p["w1"], p["b1"], 1, 1), p["bn1"], 1), 0.0)
    x = jnp.maximum(bn(conv(x, p["w2"], p["b2"], 2, 1), p["bn2"], 1), 0.0)
    x = jnp.maximum(bn(conv(x, p["w3"], p["b3"], 2, 1), p["bn3"], 1), 0.0)
    x = x.reshape(x.shape[0], -1)                    # torch (NCHW) flatten order
    x = jnp.dot(x, p["fc1_w"], precision=jax.lax.Precision.HIGHEST) + p["fc1_b"]
    x = jnp.maximum(bn(x, p["bn_fc"], 1), 0.0)
    return jnp.dot(x, p["fc2_w"], precision=jax.lax.Precision.HIGHEST) + p["fc2_b"]


# ----------------------------------------------------------------------------
# Deterministic parameter init (shapes from MNIST_Network.__init__)
# ----------------------------------------------------------------------------
def init_params(key):
    ks = jax.random.split(key, 14)

    def bn(k, c):
        k1, k2, k3, k4 = jax.random.split(k, 4)
        return (
            (1.0 + 0.1 * jax.random.normal(k1, (c,))).astype(jnp.float32),
            (0.1 * jax.random.normal(k2, (c,))).astype(jnp.float32),
            (0.1 * jax.random.normal(k3, (c,))).astype(jnp.float32),
            (1.0 + 0.1 * jnp.abs(jax.random.normal(k4, (c,)))).astype(jnp.float32),
        )

    nrm = lambda k, shp, s: (s * jax.random.normal(k, shp)).astype(jnp.float32)
    return dict(
        w1=nrm(ks[0], (16, 1, 3, 3), 0.1),   b1=nrm(ks[1], (16,), 0.1),  bn1=bn(ks[2], 16),
        w2=nrm(ks[3], (32, 16, 4, 4), 0.1),  b2=nrm(ks[4], (32,), 0.1),  bn2=bn(ks[5], 32),
        w3=nrm(ks[6], (32, 32, 4, 4), 0.1),  b3=nrm(ks[7], (32,), 0.1),  bn3=bn(ks[8], 32),
        fc1_w=nrm(ks[9], (7 * 7 * 32, 128), 0.05), fc1_b=nrm(ks[10], (128,), 0.1),
        bn_fc=bn(ks[11], 128),
        fc2_w=nrm(ks[12], (128, 10), 0.1),   fc2_b=nrm(ks[13], (10,), 0.1),
    )


if __name__ == "__main__":
    key = jax.random.PRNGKey(0)
    kx, kp = jax.random.split(key)
    # MNIST-shaped input (28x28 required by the 7*7*32 flatten); small batch of 3
    # (also exercises the padded / multi-block row-tiling path).
    x = jax.random.normal(kx, (3, 1, 28, 28), dtype=jnp.float32)
    params = init_params(kp)

    out = jax.block_until_ready(mnist_forward(x, params))
    ref_bf16 = jax.block_until_ready(mnist_forward_ref_bf16(x, params))
    ref_f32 = jax.block_until_ready(mnist_forward_ref_f32(x, params))

    assert out.shape == (3, 10), out.shape
    assert bool(jnp.all(jnp.isfinite(out)))
    # Tight check: same mixed-precision math, pure-JAX -> validates the Pallas kernels.
    assert bool(jnp.allclose(out, ref_bf16, rtol=2e-3, atol=2e-3))
    # Loose check: full-f32 torch-equivalent reference -> validates semantics (bf16 drift budget).
    assert bool(jnp.allclose(out, ref_f32, rtol=2e-2, atol=2e-2))
    print("KERNEL_OK")
</pallas_src>

<mosaic_0001>
module attributes {stable_mosaic.version = 11 : i64} {
  func.func @_mm_bias_act_kernel(%arg0: i32, %arg1: memref<1280x9xbf16, #tpu.memory_space<vmem>>, %arg2: memref<9x16xbf16, #tpu.memory_space<vmem>>, %arg3: memref<1x16xf32, #tpu.memory_space<vmem>>, %arg4: memref<1280x16xbf16, #tpu.memory_space<vmem>>) attributes {dimension_semantics = [#tpu.dimension_semantics<parallel>], iteration_bounds = array<i64: 2>, scalar_prefetch = 0 : i64, scratch_operands = 0 : i64, tpu.core_type = #tpu.core_type<tc>, window_params = [{transform_indices = @transform_0, window_bounds = array<i64: 1280, 9>}, {pipeline_mode = #tpu.pipeline_mode<synchronous>, transform_indices = @transform_1, window_bounds = array<i64: 9, 16>}, {pipeline_mode = #tpu.pipeline_mode<synchronous>, transform_indices = @transform_2, window_bounds = array<i64: 1, 16>}, {transform_indices = @transform_3, window_bounds = array<i64: 1280, 16>}]} {
    %c0 = arith.constant 0 : index
    %c0_0 = arith.constant 0 : index
    %0 = vector.load %arg1[%c0, %c0_0] : memref<1280x9xbf16, #tpu.memory_space<vmem>>, vector<1280x9xbf16>
    %c0_1 = arith.constant 0 : index
    %c0_2 = arith.constant 0 : index
    %1 = vector.load %arg2[%c0_1, %c0_2] : memref<9x16xbf16, #tpu.memory_space<vmem>>, vector<9x16xbf16>
    %cst = arith.constant dense<0.000000e+00> : vector<1280x16xf32>
    %2 = tpu.matmul %0, %1, %cst {dimension_numbers = #tpu.dot_dimension_numbers<[1], [0], [0], [1], [0, 0, 1, 1], [], []>} : vector<1280x9xbf16>, vector<9x16xbf16>, vector<1280x16xf32> -> vector<1280x16xf32>
    %c0_3 = arith.constant 0 : index
    %c0_4 = arith.constant 0 : index
    %3 = vector.load %arg3[%c0_3, %c0_4] : memref<1x16xf32, #tpu.memory_space<vmem>>, vector<1x16xf32>
    %4 = vector.broadcast %3 : vector<1x16xf32> to vector<1280x16xf32>
    %5 = arith.addf %2, %4 : vector<1280x16xf32>
    %cst_5 = arith.constant 0.000000e+00 : f32
    %6 = vector.broadcast %cst_5 : f32 to vector<1280x16xf32>
    %7 = arith.maximumf %5, %6 : vector<1280x16xf32>
    %8 = arith.truncf %7 : vector<1280x16xf32> to vector<1280x16xbf16>
    %c0_6 = arith.constant 0 : index
    %c0_7 = arith.constant 0 : index
    %9 = vector.load %arg4[%c0_6, %c0_7] : memref<1280x16xbf16, #tpu.memory_space<vmem>>, vector<1280x16xbf16>
    tpu.vector_store %arg4[%c0_6, %c0_7], %8 {strides = array<i32>} : memref<1280x16xbf16, #tpu.memory_space<vmem>>, vector<1280x16xbf16>,
    return
  }
  func.func @transform_0(%arg0: i32) -> (i32, i32) {
    %c0_i32 = arith.constant 0 : i32
    %c0_i32_0 = arith.constant 0 : i32
    return %arg0, %c0_i32 : i32, i32
  }
  func.func @transform_1(%arg0: i32) -> (i32, i32) {
    %c0_i32 = arith.constant 0 : i32
    %c0_i32_0 = arith.constant 0 : i32
    %c0_i32_1 = arith.constant 0 : i32
    return %c0_i32, %c0_i32_0 : i32, i32
  }
  func.func @transform_2(%arg0: i32) -> (i32, i32) {
    %c0_i32 = arith.constant 0 : i32
    %c0_i32_0 = arith.constant 0 : i32
    %c0_i32_1 = arith.constant 0 : i32
    return %c0_i32, %c0_i32_0 : i32, i32
  }
  func.func @transform_3(%arg0: i32) -> (i32, i32) {
    %c0_i32 = arith.constant 0 : i32
    %c0_i32_0 = arith.constant 0 : i32
    return %arg0, %c0_i32 : i32, i32
  }
}

module attributes {stable_mosaic.version = 11 : i64} {
  func.func @_mm_bias_act_kernel(%arg0: i32, %arg1: memref<640x256xbf16, #tpu.memory_space<vmem>>, %arg2: memref<256x32xbf16, #tpu.memory_space<vmem>>, %arg3: memref<1x32xf32, #tpu.memory_space<vmem>>, %arg4: memref<640x32xbf16, #tpu.memory_space<vmem>>) attributes {dimension_semantics = [#tpu.dimension_semantics<parallel>], iteration_bounds = array<i64: 1>, scalar_prefetch = 0 : i64, scratch_operands = 0 : i64, tpu.core_type = #tpu.core_type<tc>, window_params = [{transform_indices = @transform_0, window_bounds = array<i64: 640, 256>}, {pipeline_mode = #tpu.pipeline_mode<synchronous>, transform_indices = @transform_1, window_bounds = array<i64: 256, 32>}, {pipeline_mode = #tpu.pipeline_mode<synchronous>, transform_indices = @transform_2, window_bounds = array<i64: 1, 32>}, {transform_indices = @transform_3, window_bounds = array<i64: 640, 32>}]} {
    %c0 = arith.constant 0 : index
    %c0_0 = arith.constant 0 : index
    %0 = vector.load %arg1[%c0, %c0_0] : memref<640x256xbf16, #tpu.memory_space<vmem>>, vector<640x256xbf16>
    %c0_1 = arith.constant 0 : index
    %c0_2 = arith.constant 0 : index
    %1 = vector.load %arg2[%c0_1, %c0_2] : memref<256x32xbf16, #tpu.memory_space<vmem>>, vector<256x32xbf16>
    %cst = arith.constant dense<0.000000e+00> : vector<640x32xf32>
    %2 = tpu.matmul %0, %1, %cst {dimension_numbers = #tpu.dot_dimension_numbers<[1], [0], [0], [1], [0, 0, 1, 1], [], []>} : vector<640x256xbf16>, vector<256x32xbf16>, vector<640x32xf32> -> vector<640x32xf32>
    %c0_3 = arith.constant 0 : index
    %c0_4 = arith.constant 0 : index
    %3 = vector.load %arg3[%c0_3, %c0_4] : memref<1x32xf32, #tpu.memory_space<vmem>>, vector<1x32xf32>
    %4 = vector.broadcast %3 : vector<1x32xf32> to vector<640x32xf32>
    %5 = arith.addf %2, %4 : vector<640x32xf32>
    %cst_5 = arith.constant 0.000000e+00 : f32
    %6 = vector.broadcast %cst_5 : f32 to vector<640x32xf32>
    %7 = arith.maximumf %5, %6 : vector<640x32xf32>
    %8 = arith.truncf %7 : vector<640x32xf32> to vector<640x32xbf16>
    %c0_6 = arith.constant 0 : index
    %c0_7 = arith.constant 0 : index
    %9 = vector.load %arg4[%c0_6, %c0_7] : memref<640x32xbf16, #tpu.memory_space<vmem>>, vector<640x32xbf16>
    tpu.vector_store %arg4[%c0_6, %c0_7], %8 {strides = array<i32>} : memref<640x32xbf16, #tpu.memory_space<vmem>>, vector<640x32xbf16>,
    return
  }
  func.func @transform_0(%arg0: i32) -> (i32, i32) {
    %c0_i32 = arith.constant 0 : i32
    %c0_i32_0 = arith.constant 0 : i32
    return %arg0, %c0_i32 : i32, i32
  }
  func.func @transform_1(%arg0: i32) -> (i32, i32) {
    %c0_i32 = arith.constant 0 : i32
    %c0_i32_0 = arith.constant 0 : i32
    %c0_i32_1 = arith.constant 0 : i32
    return %c0_i32, %c0_i32_0 : i32, i32
  }
  func.func @transform_2(%arg0: i32) -> (i32, i32) {
    %c0_i32 = arith.constant 0 : i32
    %c0_i32_0 = arith.constant 0 : i32
    %c0_i32_1 = arith.constant 0 : i32
    return %c0_i32, %c0_i32_0 : i32, i32
  }
  func.func @transform_3(%arg0: i32) -> (i32, i32) {
    %c0_i32 = arith.constant 0 : i32
    %c0_i32_0 = arith.constant 0 : i32
    return %arg0, %c0_i32 : i32, i32
  }
}

module attributes {stable_mosaic.version = 11 : i64} {
  func.func @_mm_bias_act_kernel(%arg0: i32, %arg1: memref<256x512xbf16, #tpu.memory_space<vmem>>, %arg2: memref<512x32xbf16, #tpu.memory_space<vmem>>, %arg3: memref<1x32xf32, #tpu.memory_space<vmem>>, %arg4: memref<256x32xbf16, #tpu.memory_space<vmem>>) attributes {dimension_semantics = [#tpu.dimension_semantics<parallel>], iteration_bounds = array<i64: 1>, scalar_prefetch = 0 : i64, scratch_operands = 0 : i64, tpu.core_type = #tpu.core_type<tc>, window_params = [{transform_indices = @transform_0, window_bounds = array<i64: 256, 512>}, {pipeline_mode = #tpu.pipeline_mode<synchronous>, transform_indices = @transform_1, window_bounds = array<i64: 512, 32>}, {pipeline_mode = #tpu.pipeline_mode<synchronous>, transform_indices = @transform_2, window_bounds = array<i64: 1, 32>}, {transform_indices = @transform_3, window_bounds = array<i64: 256, 32>}]} {
    %c0 = arith.constant 0 : index
    %c0_0 = arith.constant 0 : index
    %0 = vector.load %arg1[%c0, %c0_0] : memref<256x512xbf16, #tpu.memory_space<vmem>>, vector<256x512xbf16>
    %c0_1 = arith.constant 0 : index
    %c0_2 = arith.constant 0 : index
    %1 = vector.load %arg2[%c0_1, %c0_2] : memref<512x32xbf16, #tpu.memory_space<vmem>>, vector<512x32xbf16>
    %cst = arith.constant dense<0.000000e+00> : vector<256x32xf32>
    %2 = tpu.matmul %0, %1, %cst {dimension_numbers = #tpu.dot_dimension_numbers<[1], [0], [0], [1], [0, 0, 1, 1], [], []>} : vector<256x512xbf16>, vector<512x32xbf16>, vector<256x32xf32> -> vector<256x32xf32>
    %c0_3 = arith.constant 0 : index
    %c0_4 = arith.constant 0 : index
    %3 = vector.load %arg3[%c0_3, %c0_4] : memref<1x32xf32, #tpu.memory_space<vmem>>, vector<1x32xf32>
    %4 = vector.broadcast %3 : vector<1x32xf32> to vector<256x32xf32>
    %5 = arith.addf %2, %4 : vector<256x32xf32>
    %cst_5 = arith.constant 0.000000e+00 : f32
    %6 = vector.broadcast %cst_5 : f32 to vector<256x32xf32>
    %7 = arith.maximumf %5, %6 : vector<256x32xf32>
    %8 = arith.truncf %7 : vector<256x32xf32> to vector<256x32xbf16>
    %c0_6 = arith.constant 0 : index
    %c0_7 = arith.constant 0 : index
    %9 = vector.load %arg4[%c0_6, %c0_7] : memref<256x32xbf16, #tpu.memory_space<vmem>>, vector<256x32xbf16>
    tpu.vector_store %arg4[%c0_6, %c0_7], %8 {strides = array<i32>} : memref<256x32xbf16, #tpu.memory_space<vmem>>, vector<256x32xbf16>,
    return
  }
  func.func @transform_0(%arg0: i32) -> (i32, i32) {
    %c0_i32 = arith.constant 0 : i32
    %c0_i32_0 = arith.constant 0 : i32
    return %arg0, %c0_i32 : i32, i32
  }
  func.func @transform_1(%arg0: i32) -> (i32, i32) {
    %c0_i32 = arith.constant 0 : i32
    %c0_i32_0 = arith.constant 0 : i32
    %c0_i32_1 = arith.constant 0 : i32
    return %c0_i32, %c0_i32_0 : i32, i32
  }
  func.func @transform_2(%arg0: i32) -> (i32, i32) {
    %c0_i32 = arith.constant 0 : i32
    %c0_i32_0 = arith.constant 0 : i32
    %c0_i32_1 = arith.constant 0 : i32
    return %c0_i32, %c0_i32_0 : i32, i32
  }
  func.func @transform_3(%arg0: i32) -> (i32, i32) {
    %c0_i32 = arith.constant 0 : i32
    %c0_i32_0 = arith.constant 0 : i32
    return %arg0, %c0_i32 : i32, i32
  }
}

module attributes {stable_mosaic.version = 11 : i64} {
  func.func @_fc_head_kernel(%arg0: i32, %arg1: memref<128x1568xbf16, #tpu.memory_space<vmem>>, %arg2: memref<1568x128xbf16, #tpu.memory_space<vmem>>, %arg3: memref<1x128xf32, #tpu.memory_space<vmem>>, %arg4: memref<128x10xbf16, #tpu.memory_space<vmem>>, %arg5: memref<1x10xf32, #tpu.memory_space<vmem>>, %arg6: memref<128x10xf32, #tpu.memory_space<vmem>>) attributes {dimension_semantics = [#tpu.dimension_semantics<parallel>], iteration_bounds = array<i64: 1>, scalar_prefetch = 0 : i64, scratch_operands = 0 : i64, tpu.core_type = #tpu.core_type<tc>, window_params = [{transform_indices = @transform_0, window_bounds = array<i64: 128, 1568>}, {pipeline_mode = #tpu.pipeline_mode<synchronous>, transform_indices = @transform_1, window_bounds = array<i64: 1568, 128>}, {pipeline_mode = #tpu.pipeline_mode<synchronous>, transform_indices = @transform_2, window_bounds = array<i64: 1, 128>}, {pipeline_mode = #tpu.pipeline_mode<synchronous>, transform_indices = @transform_3, window_bounds = array<i64: 128, 10>}, {pipeline_mode = #tpu.pipeline_mode<synchronous>, transform_indices = @transform_4, window_bounds = array<i64: 1, 10>}, {transform_indices = @transform_5, window_bounds = array<i64: 128, 10>}]} {
    %c0 = arith.constant 0 : index
    %c0_0 = arith.constant 0 : index
    %0 = vector.load %arg1[%c0, %c0_0] : memref<128x1568xbf16, #tpu.memory_space<vmem>>, vector<128x1568xbf16>
    %c0_1 = arith.constant 0 : index
    %c0_2 = arith.constant 0 : index
    %1 = vector.load %arg2[%c0_1, %c0_2] : memref<1568x128xbf16, #tpu.memory_space<vmem>>, vector<1568x128xbf16>
    %cst = arith.constant dense<0.000000e+00> : vector<128x128xf32>
    %2 = tpu.matmul %0, %1, %cst {dimension_numbers = #tpu.dot_dimension_numbers<[1], [0], [0], [1], [0, 0, 1, 1], [], []>} : vector<128x1568xbf16>, vector<1568x128xbf16>, vector<128x128xf32> -> vector<128x128xf32>
    %c0_3 = arith.constant 0 : index
    %c0_4 = arith.constant 0 : index
    %3 = vector.load %arg3[%c0_3, %c0_4] : memref<1x128xf32, #tpu.memory_space<vmem>>, vector<1x128xf32>
    %4 = vector.broadcast %3 : vector<1x128xf32> to vector<128x128xf32>
    %5 = arith.addf %2, %4 : vector<128x128xf32>
    %cst_5 = arith.constant 0.000000e+00 : f32
    %6 = vector.broadcast %cst_5 : f32 to vector<128x128xf32>
    %7 = arith.maximumf %5, %6 : vector<128x128xf32>
    %8 = arith.truncf %7 : vector<128x128xf32> to vector<128x128xbf16>
    %c0_6 = arith.constant 0 : index
    %c0_7 = arith.constant 0 : index
    %9 = vector.load %arg4[%c0_6, %c0_7] : memref<128x10xbf16, #tpu.memory_space<vmem>>, vector<128x10xbf16>
    %cst_8 = arith.constant dense<0.000000e+00> : vector<128x10xf32>
    %10 = tpu.matmul %8, %9, %cst_8 {dimension_numbers = #tpu.dot_dimension_numbers<[1], [0], [0], [1], [0, 0, 1, 1], [], []>} : vector<128x128xbf16>, vector<128x10xbf16>, vector<128x10xf32> -> vector<128x10xf32>
    %c0_9 = arith.constant 0 : index
    %c0_10 = arith.constant 0 : index
    %11 = vector.load %arg5[%c0_9, %c0_10] : memref<1x10xf32, #tpu.memory_space<vmem>>, vector<1x10xf32>
    %12 = vector.broadcast %11 : vector<1x10xf32> to vector<128x10xf32>
    %13 = arith.addf %10, %12 : vector<128x10xf32>
    %c0_11 = arith.constant 0 : index
    %c0_12 = arith.constant 0 : index
    %14 = vector.load %arg6[%c0_11, %c0_12] : memref<128x10xf32, #tpu.memory_space<vmem>>, vector<128x10xf32>
    tpu.vector_store %arg6[%c0_11, %c0_12], %13 {strides = array<i32>} : memref<128x10xf32, #tpu.memory_space<vmem>>, vector<128x10xf32>,
    return
  }
  func.func @transform_0(%arg0: i32) -> (i32, i32) {
    %c0_i32 = arith.constant 0 : i32
    %c0_i32_0 = arith.constant 0 : i32
    return %arg0, %c0_i32 : i32, i32
  }
  func.func @transform_1(%arg0: i32) -> (i32, i32) {
    %c0_i32 = arith.constant 0 : i32
    %c0_i32_0 = arith.constant 0 : i32
    %c0_i32_1 = arith.constant 0 : i32
    return %c0_i32, %c0_i32_0 : i32, i32
  }
  func.func @transform_2(%arg0: i32) -> (i32, i32) {
    %c0_i32 = arith.constant 0 : i32
    %c0_i32_0 = arith.constant 0 : i32
    %c0_i32_1 = arith.constant 0 : i32
    return %c0_i32, %c0_i32_0 : i32, i32
  }
  func.func @transform_3(%arg0: i32) -> (i32, i32) {
    %c0_i32 = arith.constant 0 : i32
    %c0_i32_0 = arith.constant 0 : i32
    %c0_i32_1 = arith.constant 0 : i32
    return %c0_i32, %c0_i32_0 : i32, i32
  }
  func.func @transform_4(%arg0: i32) -> (i32, i32) {
    %c0_i32 = arith.constant 0 : i32
    %c0_i32_0 = arith.constant 0 : i32
    %c0_i32_1 = arith.constant 0 : i32
    return %c0_i32, %c0_i32_0 : i32, i32
  }
  func.func @transform_5(%arg0: i32) -> (i32, i32) {
    %c0_i32 = arith.constant 0 : i32
    %c0_i32_0 = arith.constant 0 : i32
    return %arg0, %c0_i32 : i32, i32
  }
}

</mosaic_0001>

<bundles_post_ra>
// kernel: mnist_forward.4
= control target key start
LH: loop header
LB: loop body
LE: loop exit
PB: predicated region body
PF: predicated region fallthrough
CT: control target
= control target key end

     0   :  { %s3543_s12 = smov 0   ;;  %s4224_s0 = inlined_call_operand.vmem [shape: bf16[2560,9], index: 0, kind: input, shape index: {}]   ;;  %s4225_s1 = inlined_call_operand.vmem [shape: bf16[9,16], index: 1, kind: input, shape index: {}]   ;;  %s4226_s2 = inlined_call_operand.vmem [shape: f32[1,16], index: 2, kind: input, shape index: {}]   ;;  %s4227_s3 = inlined_call_operand.vmem [shape: bf16[2560,16], index: 3, kind: output, shape index: {}]  }
   0x1 LB: > { %s2687_s13 = sadd.s32 4294967295, %s3520_s12   ;;  %p2691_p0 = scmp.ge.s32.totalorder %s3520_s12, 1  ;;  %s3520_s12 = sphi %s3543_s12, %s13_s12  }
   0x2   : > { %p138_p1 = scmp.lt.s32.totalorder %s3520_s12, 3 }
   0x4   : > { %p139_p2 = pnand %p2691_p0, %p138_p1 }
   0x5   : > { %s162_s16 = smul.u32 (!%p139_p2), 160, %s2687_s13 }
   0x6   : > { %142 = sbr.rel (%p139_p2) target bundleno = 379 (0x17b), region = 32 }
   0x7   : > { %p163_p3 = scmp.lt.s32.totalorder (!%p139_p2), %s162_s16, 319 }
   0xb   : > { %v3432_v0 = vld [vmem:[%s4225_s1] sm:$0x1f]   ;;  %vm990_vm0 = vcmask 1043456   ;;  %vm991_vm1 = vcmask 1044480   ;;  %v3522_v1 = vmov 65535   ;;  %s4229_s16 = smov (!%p163_p3, %s162_s16), 319 }
   0xc   : > { %v992_v2 = vsel %vm990_vm0, 4294967295, %v3522_v1  ;;  %s2692_s17 = sshll.u32 %s4229_s16, 2  ;;  %vm749_vm2 = vcmask 72704   ;;  %vm2470_vm3 = vcmask 125952  }
   0xd   : > { %v993_v3 = vsel %vm991_vm1, %v992_v2, 0  ;;  %s3562_s20 = scalar_lea.vmem %s4224_s0, %s2692_s17  ;;  %s3737_s25 = scalar_lea.vmem %s4227_s3, %s2692_s17 }
   0xe   : > { %v995_v4 = vand.u32 %v3432_v0, %v993_v3  ;;  %v3433_v5 = vld [vmem:[%s3562_s20] sm:$0xff]   ;;  %v3435_v7 = vld [vmem:[%s3562_s20 + $0x8] sm:$0xff]   ;;  %v3437_v9 = vld [vmem:[%s3562_s20 + $0x10] sm:$0xff]  }
   0xf   : > { %v3434_v6 = vld [vmem:[%s3562_s20 + $0x140] sm:$0xff]   ;;  %3261 = vmatprep.mubr.msk.bf16.mxu0 %vm749_vm2, %v3433_v5  ;;  %v3436_v8 = vld [vmem:[%s3562_s20 + $0x148] sm:$0xff]   ;;  %v3438_v10 = vld [vmem:[%s3562_s20 + $0x150] sm:$0xff]  }
  0x10   : > { %3259 = vmatprep.subr.bf16.mxu0 %v995_v4  ;;  %3421 = vmatprep.subr.bf16.mxu1 %v995_v4  ;;  %v3439_v11 = vld [vmem:[%s3562_s20 + $0x18] sm:$0xff]   ;;  %v3441_v13 = vld [vmem:[%s3562_s20 + $0x20] sm:$0xff]   ;;  %v3443_v15 = vld [vmem:[%s3562_s20 + $0x28] sm:$0xff]  }
  0x11   : > { %3260 = vmatpush3.bf16.msra.mxu0 %v995_v4  ;;  %3422 = vmatpush3.bf16.msra.mxu1 %v995_v4  ;;  %v3440_v12 = vld [vmem:[%s3562_s20 + $0x158] sm:$0xff]   ;;  %v3442_v14 = vld [vmem:[%s3562_s20 + $0x160] sm:$0xff]   ;;  %v3444_v16 = vld [vmem:[%s3562_s20 + $0x168] sm:$0xff]  }
  0x12   : > { %3341 = vmatprep.mubr.msk.bf16.mxu1 %vm749_vm2, %v3434_v6  ;;  %v3445_v17 = vld [vmem:[%s3562_s20 + $0x30] sm:$0xff]   ;;  %v3447_v19 = vld [vmem:[%s3562_s20 + $0x38] sm:$0xff]   ;;  %v3449_v21 = vld [vmem:[%s3562_s20 + $0x40] sm:$0xff]  }
  0x13   : > { %v3446_v18 = vld [vmem:[%s3562_s20 + $0x170] sm:$0xff]   ;;  %v3448_v20 = vld [vmem:[%s3562_s20 + $0x178] sm:$0xff]   ;;  %v3450_v22 = vld [vmem:[%s3562_s20 + $0x180] sm:$0xff]  }
  0x14   : > { %3262 = vmatmul.mubr.msk.bf16.vlgmr.msra.gmra.mxu0 %vm749_vm2, %v3435_v7  ;;  %3342 = vmatmul.mubr.msk.bf16.vlgmr.msra.gmra.mxu1 %vm749_vm2, %v3436_v8  ;;  %v3451_v23 = vld [vmem:[%s3562_s20 + $0x48] sm:$0xff]   ;;  %v3453_v25 = vld [vmem:[%s3562_s20 + $0x50] sm:$0xff]   ;;  %v3455_v27 = vld [vmem:[%s3562_s20 + $0x58] sm:$0xff]  }
  0x15   : > { %3265 = vmatprep.mubr.msk.bf16.mxu0 %vm749_vm2, %v3437_v9  ;;  %3345 = vmatprep.mubr.msk.bf16.mxu1 %vm749_vm2, %v3438_v10  ;;  %v3452_v24 = vld [vmem:[%s3562_s20 + $0x188] sm:$0xff]   ;;  %v3454_v26 = vld [vmem:[%s3562_s20 + $0x190] sm:$0xff]   ;;  %v3456_v28 = vld [vmem:[%s3562_s20 + $0x198] sm:$0xff]  }
  0x16   : > { %v3457_v29 = vld [vmem:[%s3562_s20 + $0x60] sm:$0xff]   ;;  %v3459_v31 = vld [vmem:[%s3562_s20 + $0x68] sm:$0xff]   ;;  %v3461_v33 = vld [vmem:[%s3562_s20 + $0x70] sm:$0xff]  }
  0x17   : > { %v3458_v30 = vld [vmem:[%s3562_s20 + $0x1a0] sm:$0xff]   ;;  %v3460_v32 = vld [vmem:[%s3562_s20 + $0x1a8] sm:$0xff]   ;;  %v3462_v34 = vld [vmem:[%s3562_s20 + $0x1b0] sm:$0xff]  }
  0x18   : > { %v3463_v35 = vld [vmem:[%s3562_s20 + $0x78] sm:$0xff]   ;;  %v3465_v37 = vld [vmem:[%s3562_s20 + $0x80] sm:$0xff]   ;;  %v3467_v39 = vld [vmem:[%s3562_s20 + $0x88] sm:$0xff]  }
  0x19   : > { %v3464_v36 = vld [vmem:[%s3562_s20 + $0x1b8] sm:$0xff]   ;;  %v3466_v38 = vld [vmem:[%s3562_s20 + $0x1c0] sm:$0xff]   ;;  %v3468_v40 = vld [vmem:[%s3562_s20 + $0x1c8] sm:$0xff]  }
  0x1a   : > { %v3469_v41 = vld [vmem:[%s3562_s20 + $0x90] sm:$0xff]   ;;  %v3471_v43 = vld [vmem:[%s3562_s20 + $0x98] sm:$0xff]   ;;  %v3473_v45 = vld [vmem:[%s3562_s20 + $0xa0] sm:$0xff]  }
  0x1b   : > { %v3470_v42 = vld [vmem:[%s3562_s20 + $0x1d0] sm:$0xff]   ;;  %v3472_v44 = vld [vmem:[%s3562_s20 + $0x1d8] sm:$0xff]   ;;  %v3474_v46 = vld [vmem:[%s3562_s20 + $0x1e0] sm:$0xff]  }
  0x1c   : > { %3266 = vmatmul.mubr.msk.bf16.gmra.mxu0 %vm749_vm2, %v3439_v11  ;;  %3346 = vmatmul.mubr.msk.bf16.gmra.mxu1 %vm749_vm2, %v3440_v12  ;;  %v3475_v47 = vld [vmem:[%s3562_s20 + $0xa8] sm:$0xff]   ;;  %v3477_v49 = vld [vmem:[%s3562_s20 + $0xb0] sm:$0xff]   ;;  %v3479_v51 = vld [vmem:[%s3562_s20 + $0xb8] sm:$0xff]  }
  0x1d   : > { %3269 = vmatprep.mubr.msk.bf16.mxu0 %vm749_vm2, %v3441_v13  ;;  %3349 = vmatprep.mubr.msk.bf16.mxu1 %vm749_vm2, %v3442_v14  ;;  %v3476_v48 = vld [vmem:[%s3562_s20 + $0x1e8] sm:$0xff]   ;;  %v3478_v50 = vld [vmem:[%s3562_s20 + $0x1f0] sm:$0xff]   ;;  %v3480_v52 = vld [vmem:[%s3562_s20 + $0x1f8] sm:$0xff]  }
  0x1e   : > { %v3481_v53 = vld [vmem:[%s3562_s20 + $0xc0] sm:$0xff]   ;;  %v3483_v55 = vld [vmem:[%s3562_s20 + $0xc8] sm:$0xff]   ;;  %v3485_v57 = vld [vmem:[%s3562_s20 + $0xd0] sm:$0xff]  }
  0x1f   : > { %v3482_v54 = vld [vmem:[%s3562_s20 + $0x200] sm:$0xff]   ;;  %v3484_v56 = vld [vmem:[%s3562_s20 + $0x208] sm:$0xff]   ;;  %v3486_v58 = vld [vmem:[%s3562_s20 + $0x210] sm:$0xff]  }
  0x20   : > { %v3487_v59 = vld [vmem:[%s3562_s20 + $0xd8] sm:$0xff]   ;;  %v3489_v61 = vld [vmem:[%s3562_s20 + $0xe0] sm:$0xff]   ;;  %v3491_v63 = vld [vmem:[%s3562_s20 + $0xe8] sm:$0xff]  }
  0x21   : > { %v3488_v60 = vld [vmem:[%s3562_s20 + $0x218] sm:$0xff]   ;;  %v3490_v62 = vld [vmem:[%s3562_s20 + $0x220] sm:$0xff]   ;;  %v3492_v0 = vld [vmem:[%s3562_s20 + $0x228] sm:$0xff]  }
  0x22   : > { %v3493_v1 = vld [vmem:[%s3562_s20 + $0xf0] sm:$0xff]   ;;  %v3495_v3 = vld [vmem:[%s3562_s20 + $0xf8] sm:$0xff]   ;;  %v3497_v5 = vld [vmem:[%s3562_s20 + $0x100] sm:$0xff]  }
  0x23   : > { %v3494_v2 = vld [vmem:[%s3562_s20 + $0x230] sm:$0xff]   ;;  %v3496_v4 = vld [vmem:[%s3562_s20 + $0x238] sm:$0xff]   ;;  %v3498_v6 = vld [vmem:[%s3562_s20 + $0x240] sm:$0xff]  }
  0x24   : > { %3270 = vmatmul.mubr.msk.bf16.gmra.mxu0 %vm749_vm2, %v3443_v15  ;;  %3350 = vmatmul.mubr.msk.bf16.gmra.mxu1 %vm749_vm2, %v3444_v16  ;;  %v3499_v7 = vld [vmem:[%s3562_s20 + $0x108] sm:$0xff]   ;;  %v3501_v9 = vld [vmem:[%s3562_s20 + $0x110] sm:$0xff]   ;;  %v3503_v11 = vld [vmem:[%s3562_s20 + $0x118] sm:$0xff]  }
  0x25   : > { %3273 = vmatprep.mubr.msk.bf16.mxu0 %vm749_vm2, %v3445_v17  ;;  %3353 = vmatprep.mubr.msk.bf16.mxu1 %vm749_vm2, %v3446_v18  ;;  %v3500_v8 = vld [vmem:[%s3562_s20 + $0x248] sm:$0xff]   ;;  %v3502_v10 = vld [vmem:[%s3562_s20 + $0x250] sm:$0xff]   ;;  %v3504_v12 = vld [vmem:[%s3562_s20 + $0x258] sm:$0xff]  }
  0x26   : > { %v3505_v13 = vld [vmem:[%s3562_s20 + $0x120] sm:$0xff]   ;;  %v3507_v15 = vld [vmem:[%s3562_s20 + $0x128] sm:$0xff]   ;;  %v3509_v17 = vld [vmem:[%s3562_s20 + $0x130] sm:$0xff]  }
  0x27   : > { %v3506_v14 = vld [vmem:[%s3562_s20 + $0x260] sm:$0xff]   ;;  %v3508_v16 = vld [vmem:[%s3562_s20 + $0x268] sm:$0xff]   ;;  %v3510_v18 = vld [vmem:[%s3562_s20 + $0x270] sm:$0xff]  }
  0x2c   : > { %3274 = vmatmul.mubr.msk.bf16.gmra.mxu0 %vm749_vm2, %v3447_v19  ;;  %3354 = vmatmul.mubr.msk.bf16.gmra.mxu1 %vm749_vm2, %v3448_v20  ;;  %v3511_v19 = vld [vmem:[%s3562_s20 + $0x138] sm:$0xff]  }
  0x2d   : > { %3277 = vmatprep.mubr.msk.bf16.mxu0 %vm749_vm2, %v3449_v21  ;;  %3357 = vmatprep.mubr.msk.bf16.mxu1 %vm749_vm2, %v3450_v22  ;;  %v3512_v20 = vld [vmem:[%s3562_s20 + $0x278] sm:$0xff]   ;;  %v3727_v21 = vld [vmem:[%s4226_s2] ss:$0 sm:$0xff] }
  0x34   : > { %3278 = vmatmul.mubr.msk.bf16.gmra.mxu0 %vm749_vm2, %v3451_v23  ;;  %3358 = vmatmul.mubr.msk.bf16.gmra.mxu1 %vm749_vm2, %v3452_v24 }
  0x35   : > { %3281 = vmatprep.mubr.msk.bf16.mxu0 %vm749_vm2, %v3453_v25  ;;  %3361 = vmatprep.mubr.msk.bf16.mxu1 %vm749_vm2, %v3454_v26 }
  0x3c   : > { %3282 = vmatmul.mubr.msk.bf16.gmra.mxu0 %vm749_vm2, %v3455_v27  ;;  %3362 = vmatmul.mubr.msk.bf16.gmra.mxu1 %vm749_vm2, %v3456_v28 }
  0x3d   : > { %3285 = vmatprep.mubr.msk.bf16.mxu0 %vm749_vm2, %v3457_v29  ;;  %3365 = vmatprep.mubr.msk.bf16.mxu1 %vm749_vm2, %v3458_v30 }
  0x44   : > { %3286 = vmatmul.mubr.msk.bf16.gmra.mxu0 %vm749_vm2, %v3459_v31  ;;  %3366 = vmatmul.mubr.msk.bf16.gmra.mxu1 %vm749_vm2, %v3460_v32 }
  0x45   : > { %3289 = vmatprep.mubr.msk.bf16.mxu0 %vm749_vm2, %v3461_v33  ;;  %3369 = vmatprep.mubr.msk.bf16.mxu1 %vm749_vm2, %v3462_v34 }
  0x4c   : > { %3290 = vmatmul.mubr.msk.bf16.gmra.mxu0 %vm749_vm2, %v3463_v35  ;;  %3370 = vmatmul.mubr.msk.bf16.gmra.mxu1 %vm749_vm2, %v3464_v36 }
  0x4d   : > { %3293 = vmatprep.mubr.msk.bf16.mxu0 %vm749_vm2, %v3465_v37  ;;  %3373 = vmatprep.mubr.msk.bf16.mxu1 %vm749_vm2, %v3466_v38 }
  0x54   : > { %3294 = vmatmul.mubr.msk.bf16.gmra.mxu0 %vm749_vm2, %v3467_v39  ;;  %3374 = vmatmul.mubr.msk.bf16.gmra.mxu1 %vm749_vm2, %v3468_v40 }
  0x55   : > { %3297 = vmatprep.mubr.msk.bf16.mxu0 %vm749_vm2, %v3469_v41  ;;  %3377 = vmatprep.mubr.msk.bf16.mxu1 %vm749_vm2, %v3470_v42 }
  0x5c   : > { %3298 = vmatmul.mubr.msk.bf16.gmra.mxu0 %vm749_vm2, %v3471_v43  ;;  %3378 = vmatmul.mubr.msk.bf16.gmra.mxu1 %vm749_vm2, %v3472_v44 }
  0x5d   : > { %3301 = vmatprep.mubr.msk.bf16.mxu0 %vm749_vm2, %v3473_v45  ;;  %3381 = vmatprep.mubr.msk.bf16.mxu1 %vm749_vm2, %v3474_v46 }
  0x64   : > { %3302 = vmatmul.mubr.msk.bf16.gmra.mxu0 %vm749_vm2, %v3475_v47  ;;  %3382 = vmatmul.mubr.msk.bf16.gmra.mxu1 %vm749_vm2, %v3476_v48 }
  0x65   : > { %3305 = vmatprep.mubr.msk.bf16.mxu0 %vm749_vm2, %v3477_v49  ;;  %3385 = vmatprep.mubr.msk.bf16.mxu1 %vm749_vm2, %v3478_v50 }
  0x6c   : > { %3306 = vmatmul.mubr.msk.bf16.gmra.mxu0 %vm749_vm2, %v3479_v51  ;;  %3386 = vmatmul.mubr.msk.bf16.gmra.mxu1 %vm749_vm2, %v3480_v52 }
  0x6d   : > { %3309 = vmatprep.mubr.msk.bf16.mxu0 %vm749_vm2, %v3481_v53  ;;  %3389 = vmatprep.mubr.msk.bf16.mxu1 %vm749_vm2, %v3482_v54 }
  0x74   : > { %3310 = vmatmul.mubr.msk.bf16.gmra.mxu0 %vm749_vm2, %v3483_v55  ;;  %3390 = vmatmul.mubr.msk.bf16.gmra.mxu1 %vm749_vm2, %v3484_v56 }
  0x75   : > { %3313 = vmatprep.mubr.msk.bf16.mxu0 %vm749_vm2, %v3485_v57  ;;  %3393 = vmatprep.mubr.msk.bf16.mxu1 %vm749_vm2, %v3486_v58 }
  0x7c   : > { %3314 = vmatmul.mubr.msk.bf16.gmra.mxu0 %vm749_vm2, %v3487_v59  ;;  %3394 = vmatmul.mubr.msk.bf16.gmra.mxu1 %vm749_vm2, %v3488_v60 }
  0x7d   : > { %3317 = vmatprep.mubr.msk.bf16.mxu0 %vm749_vm2, %v3489_v61  ;;  %3397 = vmatprep.mubr.msk.bf16.mxu1 %vm749_vm2, %v3490_v62 }
  0x84   : > { %3318 = vmatmul.mubr.msk.bf16.gmra.mxu0 %vm749_vm2, %v3491_v63  ;;  %3398 = vmatmul.mubr.msk.bf16.gmra.mxu1 %vm749_vm2, %v3492_v0 }
  0x85   : > { %3321 = vmatprep.mubr.msk.bf16.mxu0 %vm749_vm2, %v3493_v1  ;;  %3401 = vmatprep.mubr.msk.bf16.mxu1 %vm749_vm2, %v3494_v2 }
  0x8c   : > { %3322 = vmatmul.mubr.msk.bf16.gmra.mxu0 %vm749_vm2, %v3495_v3  ;;  %3402 = vmatmul.mubr.msk.bf16.gmra.mxu1 %vm749_vm2, %v3496_v4 }
  0x8d   : > { %3325 = vmatprep.mubr.msk.bf16.mxu0 %vm749_vm2, %v3497_v5  ;;  %3405 = vmatprep.mubr.msk.bf16.mxu1 %vm749_vm2, %v3498_v6 }
  0x94   : > { %3326 = vmatmul.mubr.msk.bf16.gmra.mxu0 %vm749_vm2, %v3499_v7  ;;  %3406 = vmatmul.mubr.msk.bf16.gmra.mxu1 %vm749_vm2, %v3500_v8 }
  0x95   : > { %3329 = vmatprep.mubr.msk.bf16.mxu0 %vm749_vm2, %v3501_v9  ;;  %3409 = vmatprep.mubr.msk.bf16.mxu1 %vm749_vm2, %v3502_v10 }
  0x9c   : > { %3330 = vmatmul.mubr.msk.bf16.gmra.mxu0 %vm749_vm2, %v3503_v11  ;;  %3410 = vmatmul.mubr.msk.bf16.gmra.mxu1 %vm749_vm2, %v3504_v12 }
  0x9d   : > { %3333 = vmatprep.mubr.msk.bf16.mxu0 %vm749_vm2, %v3505_v13  ;;  %3413 = vmatprep.mubr.msk.bf16.mxu1 %vm749_vm2, %v3506_v14 }
  0xa4   : > { %3334 = vmatmul.mubr.msk.bf16.gmra.mxu0 %vm749_vm2, %v3507_v15  ;;  %3414 = vmatmul.mubr.msk.bf16.gmra.mxu1 %vm749_vm2, %v3508_v16 }
  0xa5   : > { %3337 = vmatprep.mubr.msk.bf16.mxu0 %vm749_vm2, %v3509_v17  ;;  %3417 = vmatprep.mubr.msk.bf16.mxu1 %vm749_vm2, %v3510_v18 }
  0xac   : > { %3338 = vmatmul.mubr.msk.bf16.gmra.mxu0 %vm749_vm2, %v3511_v19  ;;  %3418 = vmatmul.mubr.msk.bf16.gmra.mxu1 %vm749_vm2, %v3512_v20 }
  0xd4   : > { %v3263_v22 = vpop.f32.mrf.mxu0  ;;  %v3343_v24 = vpop.f32.mrf.mxu1 }
  0xd5   : > { %v1040_v23 = vadd.f32 %v3263_v22, %v3727_v21  ;;  %v1360_v25 = vadd.f32 %v3343_v24, %v3727_v21 }
  0xd6   : > { %v1031_v26 = vpop.f32.mrf.mxu0  ;;  %v1351_v29 = vpop.f32.mrf.mxu1 }
  0xd7   : > { %v1672_v27 = vmax.f32 %v1040_v23, 0.0  ;;  %v1032_v28 = vadd.f32 %v3727_v21, %v1031_v26  ;;  %v1752_v30 = vmax.f32 %v1360_v25, 0.0  ;;  %v1352_v31 = vadd.f32 %v3727_v21, %v1351_v29 }
  0xd8   : > { %v3264_v32 = vpop.f32.mrf.mxu0  ;;  %v3344_v36 = vpop.f32.mrf.mxu1 }
  0xd9   : > { %v3020_v33 = vpack.c.bf16 %v1672_v27, %v1672_v27  ;;  %v1670_v34 = vmax.f32 %v1032_v28, 0.0  ;;  %v1043_v35 = vadd.f32 %v3264_v32, %v3727_v21  ;;  %v3100_v37 = vpack.c.bf16 %v1752_v30, %v1752_v30 }
  0xda   : > { %v1750_v38 = vmax.f32 %v1352_v31, 0.0  ;;  %v1363_v39 = vadd.f32 %v3344_v36, %v3727_v21  ;;  %v1034_v40 = vpop.f32.mrf.mxu0  ;;  %v1354_v44 = vpop.f32.mrf.mxu1 }
  0xdb   : > { %2473 = vst.msk [vmem:[%s3737_s25 + $0x8] sm:$0xf] %vm2470_vm3, %v3020_v33  ;;  %v3018_v41 = vpack.c.bf16 %v1670_v34, %v1670_v34  ;;  %v1673_v42 = vmax.f32 %v1043_v35, 0.0  ;;  %v1035_v43 = vadd.f32 %v3727_v21, %v1034_v40  ;;  %2553 = vst.msk [vmem:[%s3737_s25 + $0x148] sm:$0xf] %vm2470_vm3, %v3100_v37  ;;  %v1355_v47 = vadd.f32 %v3727_v21, %v1354_v44 }
  0xdc   : > { %v3098_v45 = vpack.c.bf16 %v1750_v38, %v1750_v38  ;;  %v1753_v46 = vmax.f32 %v1363_v39, 0.0  ;;  %v3267_v48 = vpop.f32.mrf.mxu0  ;;  %v3347_v52 = vpop.f32.mrf.mxu1 }
  0xdd   : > { %2471 = vst.msk [vmem:[%s3737_s25] sm:$0xf] %vm2470_vm3, %v3018_v41  ;;  %v3021_v49 = vpack.c.bf16 %v1673_v42, %v1673_v42  ;;  %v1671_v50 = vmax.f32 %v1035_v43, 0.0  ;;  %v1056_v51 = vadd.f32 %v3267_v48, %v3727_v21  ;;  %v1751_v54 = vmax.f32 %v1355_v47, 0.0 }
  0xde   : > { %2551 = vst.msk [vmem:[%s3737_s25 + $0x140] sm:$0xf] %vm2470_vm3, %v3098_v45  ;;  %v3101_v53 = vpack.c.bf16 %v1753_v46, %v1753_v46  ;;  %v1376_v55 = vadd.f32 %v3347_v52, %v3727_v21  ;;  %v1047_v56 = vpop.f32.mrf.mxu0  ;;  %v1367_v60 = vpop.f32.mrf.mxu1 }
  0xdf   : > { %2474 = vst.msk [vmem:[%s3737_s25 + $0xc] sm:$0xf] %vm2470_vm3, %v3021_v49  ;;  %v3019_v57 = vpack.c.bf16 %v1671_v50, %v1671_v50  ;;  %v1676_v58 = vmax.f32 %v1056_v51, 0.0  ;;  %v1048_v59 = vadd.f32 %v3727_v21, %v1047_v56  ;;  %v3099_v61 = vpack.c.bf16 %v1751_v54, %v1751_v54 }
  0xe0   : > { %2554 = vst.msk [vmem:[%s3737_s25 + $0x14c] sm:$0xf] %vm2470_vm3, %v3101_v53  ;;  %v1756_v62 = vmax.f32 %v1376_v55, 0.0  ;;  %v1368_v63 = vadd.f32 %v3727_v21, %v1367_v60  ;;  %v3268_v0 = vpop.f32.mrf.mxu0  ;;  %v3348_v4 = vpop.f32.mrf.mxu1 }
  0xe1   : > { %2472 = vst.msk [vmem:[%s3737_s25 + $0x4] sm:$0xf] %vm2470_vm3, %v3019_v57  ;;  %v3024_v1 = vpack.c.bf16 %v1676_v58, %v1676_v58  ;;  %v1674_v2 = vmax.f32 %v1048_v59, 0.0  ;;  %v1059_v3 = vadd.f32 %v3268_v0, %v3727_v21  ;;  %2552 = vst.msk [vmem:[%s3737_s25 + $0x144] sm:$0xf] %vm2470_vm3, %v3099_v61  ;;  %v1379_v7 = vadd.f32 %v3348_v4, %v3727_v21 }
  0xe2   : > { %v3104_v5 = vpack.c.bf16 %v1756_v62, %v1756_v62  ;;  %v1754_v6 = vmax.f32 %v1368_v63, 0.0  ;;  %v1050_v8 = vpop.f32.mrf.mxu0  ;;  %v1370_v12 = vpop.f32.mrf.mxu1 }
  0xe3   : > { %2477 = vst.msk [vmem:[%s3737_s25 + $0x18] sm:$0xf] %vm2470_vm3, %v3024_v1  ;;  %v3022_v9 = vpack.c.bf16 %v1674_v2, %v1674_v2  ;;  %v1677_v10 = vmax.f32 %v1059_v3, 0.0  ;;  %v1051_v11 = vadd.f32 %v3727_v21, %v1050_v8  ;;  %v1757_v14 = vmax.f32 %v1379_v7, 0.0 }
  0xe4   : > { %2557 = vst.msk [vmem:[%s3737_s25 + $0x158] sm:$0xf] %vm2470_vm3, %v3104_v5  ;;  %v3102_v13 = vpack.c.bf16 %v1754_v6, %v1754_v6  ;;  %v1371_v15 = vadd.f32 %v3727_v21, %v1370_v12  ;;  %v3271_v16 = vpop.f32.mrf.mxu0  ;;  %v3351_v20 = vpop.f32.mrf.mxu1 }
  0xe5   : > { %2475 = vst.msk [vmem:[%s3737_s25 + $0x10] sm:$0xf] %vm2470_vm3, %v3022_v9  ;;  %v3025_v17 = vpack.c.bf16 %v1677_v10, %v1677_v10  ;;  %v1675_v18 = vmax.f32 %v1051_v11, 0.0  ;;  %v1072_v19 = vadd.f32 %v3271_v16, %v3727_v21  ;;  %v3105_v22 = vpack.c.bf16 %v1757_v14, %v1757_v14 }
  0xe6   : > { %2555 = vst.msk [vmem:[%s3737_s25 + $0x150] sm:$0xf] %vm2470_vm3, %v3102_v13  ;;  %v1755_v23 = vmax.f32 %v1371_v15, 0.0  ;;  %v1392_v24 = vadd.f32 %v3351_v20, %v3727_v21  ;;  %v1063_v25 = vpop.f32.mrf.mxu0  ;;  %v1383_v29 = vpop.f32.mrf.mxu1 }
  0xe7   : > { %2478 = vst.msk [vmem:[%s3737_s25 + $0x1c] sm:$0xf] %vm2470_vm3, %v3025_v17  ;;  %v3023_v26 = vpack.c.bf16 %v1675_v18, %v1675_v18  ;;  %v1680_v27 = vmax.f32 %v1072_v19, 0.0  ;;  %v1064_v28 = vadd.f32 %v3727_v21, %v1063_v25  ;;  %2558 = vst.msk [vmem:[%s3737_s25 + $0x15c] sm:$0xf] %vm2470_vm3, %v3105_v22  ;;  %v1384_v32 = vadd.f32 %v3727_v21, %v1383_v29 }
  0xe8   : > { %v3103_v30 = vpack.c.bf16 %v1755_v23, %v1755_v23  ;;  %v1760_v31 = vmax.f32 %v1392_v24, 0.0  ;;  %v3272_v33 = vpop.f32.mrf.mxu0  ;;  %v3352_v37 = vpop.f32.mrf.mxu1 }
  0xe9   : > { %2476 = vst.msk [vmem:[%s3737_s25 + $0x14] sm:$0xf] %vm2470_vm3, %v3023_v26  ;;  %v3028_v34 = vpack.c.bf16 %v1680_v27, %v1680_v27  ;;  %v1678_v35 = vmax.f32 %v1064_v28, 0.0  ;;  %v1075_v36 = vadd.f32 %v3272_v33, %v3727_v21  ;;  %v1758_v39 = vmax.f32 %v1384_v32, 0.0 }
  0xea   : > { %2556 = vst.msk [vmem:[%s3737_s25 + $0x154] sm:$0xf] %vm2470_vm3, %v3103_v30  ;;  %v3108_v38 = vpack.c.bf16 %v1760_v31, %v1760_v31  ;;  %v1395_v40 = vadd.f32 %v3352_v37, %v3727_v21  ;;  %v1066_v41 = vpop.f32.mrf.mxu0  ;;  %v1386_v45 = vpop.f32.mrf.mxu1 }
  0xeb   : > { %2481 = vst.msk [vmem:[%s3737_s25 + $0x28] sm:$0xf] %vm2470_vm3, %v3028_v34  ;;  %v3026_v42 = vpack.c.bf16 %v1678_v35, %v1678_v35  ;;  %v1681_v43 = vmax.f32 %v1075_v36, 0.0  ;;  %v1067_v44 = vadd.f32 %v3727_v21, %v1066_v41  ;;  %v3106_v46 = vpack.c.bf16 %v1758_v39, %v1758_v39 }
  0xec   : > { %2561 = vst.msk [vmem:[%s3737_s25 + $0x168] sm:$0xf] %vm2470_vm3, %v3108_v38  ;;  %v1761_v47 = vmax.f32 %v1395_v40, 0.0  ;;  %v1387_v48 = vadd.f32 %v3727_v21, %v1386_v45  ;;  %v3275_v49 = vpop.f32.mrf.mxu0  ;;  %v3355_v53 = vpop.f32.mrf.mxu1 }
  0xed   : > { %2479 = vst.msk [vmem:[%s3737_s25 + $0x20] sm:$0xf] %vm2470_vm3, %v3026_v42  ;;  %v3029_v50 = vpack.c.bf16 %v1681_v43, %v1681_v43  ;;  %v1679_v51 = vmax.f32 %v1067_v44, 0.0  ;;  %v1088_v52 = vadd.f32 %v3275_v49, %v3727_v21  ;;  %2559 = vst.msk [vmem:[%s3737_s25 + $0x160] sm:$0xf] %vm2470_vm3, %v3106_v46  ;;  %v1408_v56 = vadd.f32 %v3355_v53, %v3727_v21 }
  0xee   : > { %v3109_v54 = vpack.c.bf16 %v1761_v47, %v1761_v47  ;;  %v1759_v55 = vmax.f32 %v1387_v48, 0.0  ;;  %v1079_v57 = vpop.f32.mrf.mxu0  ;;  %v1399_v61 = vpop.f32.mrf.mxu1 }
  0xef   : > { %2482 = vst.msk [vmem:[%s3737_s25 + $0x2c] sm:$0xf] %vm2470_vm3, %v3029_v50  ;;  %v3027_v58 = vpack.c.bf16 %v1679_v51, %v1679_v51  ;;  %v1684_v59 = vmax.f32 %v1088_v52, 0.0  ;;  %v1080_v60 = vadd.f32 %v3727_v21, %v1079_v57  ;;  %v1764_v63 = vmax.f32 %v1408_v56, 0.0 }
  0xf0   : > { %2562 = vst.msk [vmem:[%s3737_s25 + $0x16c] sm:$0xf] %vm2470_vm3, %v3109_v54  ;;  %v3107_v62 = vpack.c.bf16 %v1759_v55, %v1759_v55  ;;  %v1400_v0 = vadd.f32 %v3727_v21, %v1399_v61  ;;  %v3276_v1 = vpop.f32.mrf.mxu0  ;;  %v3356_v5 = vpop.f32.mrf.mxu1 }
  0xf1   : > { %2480 = vst.msk [vmem:[%s3737_s25 + $0x24] sm:$0xf] %vm2470_vm3, %v3027_v58  ;;  %v3032_v2 = vpack.c.bf16 %v1684_v59, %v1684_v59  ;;  %v1682_v3 = vmax.f32 %v1080_v60, 0.0  ;;  %v1091_v4 = vadd.f32 %v3276_v1, %v3727_v21  ;;  %v3112_v6 = vpack.c.bf16 %v1764_v63, %v1764_v63 }
  0xf2   : > { %2560 = vst.msk [vmem:[%s3737_s25 + $0x164] sm:$0xf] %vm2470_vm3, %v3107_v62  ;;  %v1762_v7 = vmax.f32 %v1400_v0, 0.0  ;;  %v1411_v8 = vadd.f32 %v3356_v5, %v3727_v21  ;;  %v1082_v9 = vpop.f32.mrf.mxu0  ;;  %v1402_v13 = vpop.f32.mrf.mxu1 }
  0xf3   : > { %2485 = vst.msk [vmem:[%s3737_s25 + $0x38] sm:$0xf] %vm2470_vm3, %v3032_v2  ;;  %v3030_v10 = vpack.c.bf16 %v1682_v3, %v1682_v3  ;;  %v1685_v11 = vmax.f32 %v1091_v4, 0.0  ;;  %v1083_v12 = vadd.f32 %v3727_v21, %v1082_v9  ;;  %2565 = vst.msk [vmem:[%s3737_s25 + $0x178] sm:$0xf] %vm2470_vm3, %v3112_v6  ;;  %v1403_v16 = vadd.f32 %v3727_v21, %v1402_v13 }
  0xf4   : > { %v3110_v14 = vpack.c.bf16 %v1762_v7, %v1762_v7  ;;  %v1765_v15 = vmax.f32 %v1411_v8, 0.0  ;;  %v3279_v17 = vpop.f32.mrf.mxu0  ;;  %v3359_v22 = vpop.f32.mrf.mxu1 }
  0xf5   : > { %2483 = vst.msk [vmem:[%s3737_s25 + $0x30] sm:$0xf] %vm2470_vm3, %v3030_v10  ;;  %v3033_v18 = vpack.c.bf16 %v1685_v11, %v1685_v11  ;;  %v1683_v19 = vmax.f32 %v1083_v12, 0.0  ;;  %v1104_v20 = vadd.f32 %v3279_v17, %v3727_v21  ;;  %v1763_v24 = vmax.f32 %v1403_v16, 0.0 }
  0xf6   : > { %2563 = vst.msk [vmem:[%s3737_s25 + $0x170] sm:$0xf] %vm2470_vm3, %v3110_v14  ;;  %v3113_v23 = vpack.c.bf16 %v1765_v15, %v1765_v15  ;;  %v1424_v25 = vadd.f32 %v3359_v22, %v3727_v21  ;;  %v1095_v26 = vpop.f32.mrf.mxu0  ;;  %v1415_v30 = vpop.f32.mrf.mxu1 }
  0xf7   : > { %2486 = vst.msk [vmem:[%s3737_s25 + $0x3c] sm:$0xf] %vm2470_vm3, %v3033_v18  ;;  %v3031_v27 = vpack.c.bf16 %v1683_v19, %v1683_v19  ;;  %v1688_v28 = vmax.f32 %v1104_v20, 0.0  ;;  %v1096_v29 = vadd.f32 %v3727_v21, %v1095_v26  ;;  %v3111_v31 = vpack.c.bf16 %v1763_v24, %v1763_v24 }
  0xf8   : > { %2566 = vst.msk [vmem:[%s3737_s25 + $0x17c] sm:$0xf] %vm2470_vm3, %v3113_v23  ;;  %v1768_v32 = vmax.f32 %v1424_v25, 0.0  ;;  %v1416_v33 = vadd.f32 %v3727_v21, %v1415_v30  ;;  %v3280_v34 = vpop.f32.mrf.mxu0  ;;  %v3360_v38 = vpop.f32.mrf.mxu1 }
  0xf9   : > { %2484 = vst.msk [vmem:[%s3737_s25 + $0x34] sm:$0xf] %vm2470_vm3, %v3031_v27  ;;  %v3036_v35 = vpack.c.bf16 %v1688_v28, %v1688_v28  ;;  %v1686_v36 = vmax.f32 %v1096_v29, 0.0  ;;  %v1107_v37 = vadd.f32 %v3280_v34, %v3727_v21  ;;  %2564 = vst.msk [vmem:[%s3737_s25 + $0x174] sm:$0xf] %vm2470_vm3, %v3111_v31  ;;  %v1427_v41 = vadd.f32 %v3360_v38, %v3727_v21 }
  0xfa   : > { %v3116_v39 = vpack.c.bf16 %v1768_v32, %v1768_v32  ;;  %v1766_v40 = vmax.f32 %v1416_v33, 0.0  ;;  %v1098_v42 = vpop.f32.mrf.mxu0  ;;  %v1418_v46 = vpop.f32.mrf.mxu1 }
  0xfb   : > { %2489 = vst.msk [vmem:[%s3737_s25 + $0x48] sm:$0xf] %vm2470_vm3, %v3036_v35  ;;  %v3034_v43 = vpack.c.bf16 %v1686_v36, %v1686_v36  ;;  %v1689_v44 = vmax.f32 %v1107_v37, 0.0  ;;  %v1099_v45 = vadd.f32 %v3727_v21, %v1098_v42  ;;  %v1769_v48 = vmax.f32 %v1427_v41, 0.0 }
  0xfc   : > { %2569 = vst.msk [vmem:[%s3737_s25 + $0x188] sm:$0xf] %vm2470_vm3, %v3116_v39  ;;  %v3114_v47 = vpack.c.bf16 %v1766_v40, %v1766_v40  ;;  %v1419_v49 = vadd.f32 %v3727_v21, %v1418_v46  ;;  %v3283_v50 = vpop.f32.mrf.mxu0  ;;  %v3363_v54 = vpop.f32.mrf.mxu1 }
  0xfd   : > { %2487 = vst.msk [vmem:[%s3737_s25 + $0x40] sm:$0xf] %vm2470_vm3, %v3034_v43  ;;  %v3037_v51 = vpack.c.bf16 %v1689_v44, %v1689_v44  ;;  %v1687_v52 = vmax.f32 %v1099_v45, 0.0  ;;  %v1120_v53 = vadd.f32 %v3283_v50, %v3727_v21  ;;  %v3117_v55 = vpack.c.bf16 %v1769_v48, %v1769_v48 }
  0xfe   : > { %2567 = vst.msk [vmem:[%s3737_s25 + $0x180] sm:$0xf] %vm2470_vm3, %v3114_v47  ;;  %v1767_v56 = vmax.f32 %v1419_v49, 0.0  ;;  %v1440_v57 = vadd.f32 %v3363_v54, %v3727_v21  ;;  %v1111_v58 = vpop.f32.mrf.mxu0  ;;  %v1431_v62 = vpop.f32.mrf.mxu1 }
  0xff   : > { %2490 = vst.msk [vmem:[%s3737_s25 + $0x4c] sm:$0xf] %vm2470_vm3, %v3037_v51  ;;  %v3035_v59 = vpack.c.bf16 %v1687_v52, %v1687_v52  ;;  %v1692_v60 = vmax.f32 %v1120_v53, 0.0  ;;  %v1112_v61 = vadd.f32 %v3727_v21, %v1111_v58  ;;  %2570 = vst.msk [vmem:[%s3737_s25 + $0x18c] sm:$0xf] %vm2470_vm3, %v3117_v55  ;;  %v1432_v1 = vadd.f32 %v3727_v21, %v1431_v62 }
 0x100   : > { %v3115_v63 = vpack.c.bf16 %v1767_v56, %v1767_v56  ;;  %v1772_v0 = vmax.f32 %v1440_v57, 0.0  ;;  %v3284_v2 = vpop.f32.mrf.mxu0  ;;  %v3364_v6 = vpop.f32.mrf.mxu1 }
 0x101   : > { %2488 = vst.msk [vmem:[%s3737_s25 + $0x44] sm:$0xf] %vm2470_vm3, %v3035_v59  ;;  %v3040_v3 = vpack.c.bf16 %v1692_v60, %v1692_v60  ;;  %v1690_v4 = vmax.f32 %v1112_v61, 0.0  ;;  %v1123_v5 = vadd.f32 %v3284_v2, %v3727_v21  ;;  %v1770_v8 = vmax.f32 %v1432_v1, 0.0 }
 0x102   : > { %2568 = vst.msk [vmem:[%s3737_s25 + $0x184] sm:$0xf] %vm2470_vm3, %v3115_v63  ;;  %v3120_v7 = vpack.c.bf16 %v1772_v0, %v1772_v0  ;;  %v1443_v9 = vadd.f32 %v3364_v6, %v3727_v21  ;;  %v1114_v10 = vpop.f32.mrf.mxu0  ;;  %v1434_v14 = vpop.f32.mrf.mxu1 }
 0x103   : > { %2493 = vst.msk [vmem:[%s3737_s25 + $0x58] sm:$0xf] %vm2470_vm3, %v3040_v3  ;;  %v3038_v11 = vpack.c.bf16 %v1690_v4, %v1690_v4  ;;  %v1693_v12 = vmax.f32 %v1123_v5, 0.0  ;;  %v1115_v13 = vadd.f32 %v3727_v21, %v1114_v10  ;;  %v3118_v15 = vpack.c.bf16 %v1770_v8, %v1770_v8 }
 0x104   : > { %2573 = vst.msk [vmem:[%s3737_s25 + $0x198] sm:$0xf] %vm2470_vm3, %v3120_v7  ;;  %v1773_v16 = vmax.f32 %v1443_v9, 0.0  ;;  %v1435_v17 = vadd.f32 %v3727_v21, %v1434_v14  ;;  %v3287_v18 = vpop.f32.mrf.mxu0  ;;  %v3367_v23 = vpop.f32.mrf.mxu1 }
 0x105   : > { %2491 = vst.msk [vmem:[%s3737_s25 + $0x50] sm:$0xf] %vm2470_vm3, %v3038_v11  ;;  %v3041_v19 = vpack.c.bf16 %v1693_v12, %v1693_v12  ;;  %v1691_v20 = vmax.f32 %v1115_v13, 0.0  ;;  %v1136_v22 = vadd.f32 %v3287_v18, %v3727_v21  ;;  %2571 = vst.msk [vmem:[%s3737_s25 + $0x190] sm:$0xf] %vm2470_vm3, %v3118_v15  ;;  %v1456_v26 = vadd.f32 %v3367_v23, %v3727_v21 }
 0x106   : > { %v3121_v24 = vpack.c.bf16 %v1773_v16, %v1773_v16  ;;  %v1771_v25 = vmax.f32 %v1435_v17, 0.0  ;;  %v1127_v27 = vpop.f32.mrf.mxu0  ;;  %v1447_v31 = vpop.f32.mrf.mxu1 }
 0x107   : > { %2494 = vst.msk [vmem:[%s3737_s25 + $0x5c] sm:$0xf] %vm2470_vm3, %v3041_v19  ;;  %v3039_v28 = vpack.c.bf16 %v1691_v20, %v1691_v20  ;;  %v1696_v29 = vmax.f32 %v1136_v22, 0.0  ;;  %v1128_v30 = vadd.f32 %v3727_v21, %v1127_v27  ;;  %v1776_v33 = vmax.f32 %v1456_v26, 0.0 }
 0x108   : > { %2574 = vst.msk [vmem:[%s3737_s25 + $0x19c] sm:$0xf] %vm2470_vm3, %v3121_v24  ;;  %v3119_v32 = vpack.c.bf16 %v1771_v25, %v1771_v25  ;;  %v1448_v34 = vadd.f32 %v3727_v21, %v1447_v31  ;;  %v3288_v35 = vpop.f32.mrf.mxu0  ;;  %v3368_v39 = vpop.f32.mrf.mxu1 }
 0x109   : > { %2492 = vst.msk [vmem:[%s3737_s25 + $0x54] sm:$0xf] %vm2470_vm3, %v3039_v28  ;;  %v3044_v36 = vpack.c.bf16 %v1696_v29, %v1696_v29  ;;  %v1694_v37 = vmax.f32 %v1128_v30, 0.0  ;;  %v1139_v38 = vadd.f32 %v3288_v35, %v3727_v21  ;;  %v3124_v40 = vpack.c.bf16 %v1776_v33, %v1776_v33 }
 0x10a   : > { %2572 = vst.msk [vmem:[%s3737_s25 + $0x194] sm:$0xf] %vm2470_vm3, %v3119_v32  ;;  %v1774_v41 = vmax.f32 %v1448_v34, 0.0  ;;  %v1459_v42 = vadd.f32 %v3368_v39, %v3727_v21  ;;  %v1130_v43 = vpop.f32.mrf.mxu0  ;;  %v1450_v47 = vpop.f32.mrf.mxu1 }
 0x10b   : > { %2497 = vst.msk [vmem:[%s3737_s25 + $0x68] sm:$0xf] %vm2470_vm3, %v3044_v36  ;;  %v3042_v44 = vpack.c.bf16 %v1694_v37, %v1694_v37  ;;  %v1697_v45 = vmax.f32 %v1139_v38, 0.0  ;;  %v1131_v46 = vadd.f32 %v3727_v21, %v1130_v43  ;;  %2577 = vst.msk [vmem:[%s3737_s25 + $0x1a8] sm:$0xf] %vm2470_vm3, %v3124_v40  ;;  %v1451_v50 = vadd.f32 %v3727_v21, %v1450_v47 }
 0x10c   : > { %v3122_v48 = vpack.c.bf16 %v1774_v41, %v1774_v41  ;;  %v1777_v49 = vmax.f32 %v1459_v42, 0.0  ;;  %v3291_v51 = vpop.f32.mrf.mxu0  ;;  %v3371_v55 = vpop.f32.mrf.mxu1 }
 0x10d   : > { %2495 = vst.msk [vmem:[%s3737_s25 + $0x60] sm:$0xf] %vm2470_vm3, %v3042_v44  ;;  %v3045_v52 = vpack.c.bf16 %v1697_v45, %v1697_v45  ;;  %v1695_v53 = vmax.f32 %v1131_v46, 0.0  ;;  %v1152_v54 = vadd.f32 %v3291_v51, %v3727_v21  ;;  %v1775_v57 = vmax.f32 %v1451_v50, 0.0 }
 0x10e   : > { %2575 = vst.msk [vmem:[%s3737_s25 + $0x1a0] sm:$0xf] %vm2470_vm3, %v3122_v48  ;;  %v3125_v56 = vpack.c.bf16 %v1777_v49, %v1777_v49  ;;  %v1472_v58 = vadd.f32 %v3371_v55, %v3727_v21  ;;  %v1143_v59 = vpop.f32.mrf.mxu0  ;;  %v1463_v63 = vpop.f32.mrf.mxu1 }
 0x10f   : > { %2498 = vst.msk [vmem:[%s3737_s25 + $0x6c] sm:$0xf] %vm2470_vm3, %v3045_v52  ;;  %v3043_v60 = vpack.c.bf16 %v1695_v53, %v1695_v53  ;;  %v1700_v61 = vmax.f32 %v1152_v54, 0.0  ;;  %v1144_v62 = vadd.f32 %v3727_v21, %v1143_v59  ;;  %v3123_v0 = vpack.c.bf16 %v1775_v57, %v1775_v57 }
 0x110   : > { %2578 = vst.msk [vmem:[%s3737_s25 + $0x1ac] sm:$0xf] %vm2470_vm3, %v3125_v56  ;;  %v1780_v1 = vmax.f32 %v1472_v58, 0.0  ;;  %v1464_v2 = vadd.f32 %v3727_v21, %v1463_v63  ;;  %v3292_v3 = vpop.f32.mrf.mxu0  ;;  %v3372_v7 = vpop.f32.mrf.mxu1 }
 0x111   : > { %2496 = vst.msk [vmem:[%s3737_s25 + $0x64] sm:$0xf] %vm2470_vm3, %v3043_v60  ;;  %v3048_v4 = vpack.c.bf16 %v1700_v61, %v1700_v61  ;;  %v1698_v5 = vmax.f32 %v1144_v62, 0.0  ;;  %v1155_v6 = vadd.f32 %v3292_v3, %v3727_v21  ;;  %2576 = vst.msk [vmem:[%s3737_s25 + $0x1a4] sm:$0xf] %vm2470_vm3, %v3123_v0  ;;  %v1475_v10 = vadd.f32 %v3372_v7, %v3727_v21 }
 0x112   : > { %v3128_v8 = vpack.c.bf16 %v1780_v1, %v1780_v1  ;;  %v1778_v9 = vmax.f32 %v1464_v2, 0.0  ;;  %v1146_v11 = vpop.f32.mrf.mxu0  ;;  %v1466_v15 = vpop.f32.mrf.mxu1 }
 0x113   : > { %2501 = vst.msk [vmem:[%s3737_s25 + $0x78] sm:$0xf] %vm2470_vm3, %v3048_v4  ;;  %v3046_v12 = vpack.c.bf16 %v1698_v5, %v1698_v5  ;;  %v1701_v13 = vmax.f32 %v1155_v6, 0.0  ;;  %v1147_v14 = vadd.f32 %v3727_v21, %v1146_v11  ;;  %v1781_v17 = vmax.f32 %v1475_v10, 0.0 }
 0x114   : > { %2581 = vst.msk [vmem:[%s3737_s25 + $0x1b8] sm:$0xf] %vm2470_vm3, %v3128_v8  ;;  %v3126_v16 = vpack.c.bf16 %v1778_v9, %v1778_v9  ;;  %v1467_v18 = vadd.f32 %v3727_v21, %v1466_v15  ;;  %v3295_v19 = vpop.f32.mrf.mxu0  ;;  %v3375_v24 = vpop.f32.mrf.mxu1 }
 0x115   : > { %2499 = vst.msk [vmem:[%s3737_s25 + $0x70] sm:$0xf] %vm2470_vm3, %v3046_v12  ;;  %v3049_v20 = vpack.c.bf16 %v1701_v13, %v1701_v13  ;;  %v1699_v22 = vmax.f32 %v1147_v14, 0.0  ;;  %v1168_v23 = vadd.f32 %v3295_v19, %v3727_v21  ;;  %v3129_v25 = vpack.c.bf16 %v1781_v17, %v1781_v17 }
 0x116   : > { %2579 = vst.msk [vmem:[%s3737_s25 + $0x1b0] sm:$0xf] %vm2470_vm3, %v3126_v16  ;;  %v1779_v26 = vmax.f32 %v1467_v18, 0.0  ;;  %v1488_v27 = vadd.f32 %v3375_v24, %v3727_v21  ;;  %v1159_v28 = vpop.f32.mrf.mxu0  ;;  %v1479_v32 = vpop.f32.mrf.mxu1 }
 0x117   : > { %2502 = vst.msk [vmem:[%s3737_s25 + $0x7c] sm:$0xf] %vm2470_vm3, %v3049_v20  ;;  %v3047_v29 = vpack.c.bf16 %v1699_v22, %v1699_v22  ;;  %v1704_v30 = vmax.f32 %v1168_v23, 0.0  ;;  %v1160_v31 = vadd.f32 %v3727_v21, %v1159_v28  ;;  %2582 = vst.msk [vmem:[%s3737_s25 + $0x1bc] sm:$0xf] %vm2470_vm3, %v3129_v25  ;;  %v1480_v35 = vadd.f32 %v3727_v21, %v1479_v32 }
 0x118   : > { %v3127_v33 = vpack.c.bf16 %v1779_v26, %v1779_v26  ;;  %v1784_v34 = vmax.f32 %v1488_v27, 0.0  ;;  %v3296_v36 = vpop.f32.mrf.mxu0  ;;  %v3376_v40 = vpop.f32.mrf.mxu1 }
 0x119   : > { %2500 = vst.msk [vmem:[%s3737_s25 + $0x74] sm:$0xf] %vm2470_vm3, %v3047_v29  ;;  %v3052_v37 = vpack.c.bf16 %v1704_v30, %v1704_v30  ;;  %v1702_v38 = vmax.f32 %v1160_v31, 0.0  ;;  %v1171_v39 = vadd.f32 %v3296_v36, %v3727_v21  ;;  %v1782_v42 = vmax.f32 %v1480_v35, 0.0 }
 0x11a   : > { %2580 = vst.msk [vmem:[%s3737_s25 + $0x1b4] sm:$0xf] %vm2470_vm3, %v3127_v33  ;;  %v3132_v41 = vpack.c.bf16 %v1784_v34, %v1784_v34  ;;  %v1491_v43 = vadd.f32 %v3376_v40, %v3727_v21  ;;  %v1162_v44 = vpop.f32.mrf.mxu0  ;;  %v1482_v48 = vpop.f32.mrf.mxu1 }
 0x11b   : > { %2505 = vst.msk [vmem:[%s3737_s25 + $0x88] sm:$0xf] %vm2470_vm3, %v3052_v37  ;;  %v3050_v45 = vpack.c.bf16 %v1702_v38, %v1702_v38  ;;  %v1705_v46 = vmax.f32 %v1171_v39, 0.0  ;;  %v1163_v47 = vadd.f32 %v3727_v21, %v1162_v44  ;;  %v3130_v49 = vpack.c.bf16 %v1782_v42, %v1782_v42 }
 0x11c   : > { %2585 = vst.msk [vmem:[%s3737_s25 + $0x1c8] sm:$0xf] %vm2470_vm3, %v3132_v41  ;;  %v1785_v50 = vmax.f32 %v1491_v43, 0.0  ;;  %v1483_v51 = vadd.f32 %v3727_v21, %v1482_v48  ;;  %v3299_v52 = vpop.f32.mrf.mxu0  ;;  %v3379_v56 = vpop.f32.mrf.mxu1 }
 0x11d   : > { %2503 = vst.msk [vmem:[%s3737_s25 + $0x80] sm:$0xf] %vm2470_vm3, %v3050_v45  ;;  %v3053_v53 = vpack.c.bf16 %v1705_v46, %v1705_v46  ;;  %v1703_v54 = vmax.f32 %v1163_v47, 0.0  ;;  %v1184_v55 = vadd.f32 %v3299_v52, %v3727_v21  ;;  %2583 = vst.msk [vmem:[%s3737_s25 + $0x1c0] sm:$0xf] %vm2470_vm3, %v3130_v49  ;;  %v1504_v59 = vadd.f32 %v3379_v56, %v3727_v21 }
 0x11e   : > { %v3133_v57 = vpack.c.bf16 %v1785_v50, %v1785_v50  ;;  %v1783_v58 = vmax.f32 %v1483_v51, 0.0  ;;  %v1175_v60 = vpop.f32.mrf.mxu0  ;;  %v1495_v0 = vpop.f32.mrf.mxu1 }
 0x11f   : > { %2506 = vst.msk [vmem:[%s3737_s25 + $0x8c] sm:$0xf] %vm2470_vm3, %v3053_v53  ;;  %v3051_v61 = vpack.c.bf16 %v1703_v54, %v1703_v54  ;;  %v1708_v62 = vmax.f32 %v1184_v55, 0.0  ;;  %v1176_v63 = vadd.f32 %v3727_v21, %v1175_v60  ;;  %v1788_v2 = vmax.f32 %v1504_v59, 0.0 }
 0x120   : > { %2586 = vst.msk [vmem:[%s3737_s25 + $0x1cc] sm:$0xf] %vm2470_vm3, %v3133_v57  ;;  %v3131_v1 = vpack.c.bf16 %v1783_v58, %v1783_v58  ;;  %v1496_v3 = vadd.f32 %v3727_v21, %v1495_v0  ;;  %v3300_v4 = vpop.f32.mrf.mxu0  ;;  %v3380_v8 = vpop.f32.mrf.mxu1 }
 0x121   : > { %2504 = vst.msk [vmem:[%s3737_s25 + $0x84] sm:$0xf] %vm2470_vm3, %v3051_v61  ;;  %v3056_v5 = vpack.c.bf16 %v1708_v62, %v1708_v62  ;;  %v1706_v6 = vmax.f32 %v1176_v63, 0.0  ;;  %v1187_v7 = vadd.f32 %v3300_v4, %v3727_v21  ;;  %v3136_v9 = vpack.c.bf16 %v1788_v2, %v1788_v2 }
 0x122   : > { %2584 = vst.msk [vmem:[%s3737_s25 + $0x1c4] sm:$0xf] %vm2470_vm3, %v3131_v1  ;;  %v1786_v10 = vmax.f32 %v1496_v3, 0.0  ;;  %v1507_v11 = vadd.f32 %v3380_v8, %v3727_v21  ;;  %v1178_v12 = vpop.f32.mrf.mxu0  ;;  %v1498_v16 = vpop.f32.mrf.mxu1 }
 0x123   : > { %2509 = vst.msk [vmem:[%s3737_s25 + $0x98] sm:$0xf] %vm2470_vm3, %v3056_v5  ;;  %v3054_v13 = vpack.c.bf16 %v1706_v6, %v1706_v6  ;;  %v1709_v14 = vmax.f32 %v1187_v7, 0.0  ;;  %v1179_v15 = vadd.f32 %v3727_v21, %v1178_v12  ;;  %2589 = vst.msk [vmem:[%s3737_s25 + $0x1d8] sm:$0xf] %vm2470_vm3, %v3136_v9  ;;  %v1499_v19 = vadd.f32 %v3727_v21, %v1498_v16 }
 0x124   : > { %v3134_v17 = vpack.c.bf16 %v1786_v10, %v1786_v10  ;;  %v1789_v18 = vmax.f32 %v1507_v11, 0.0  ;;  %v3303_v20 = vpop.f32.mrf.mxu0  ;;  %v3383_v25 = vpop.f32.mrf.mxu1 }
 0x125   : > { %2507 = vst.msk [vmem:[%s3737_s25 + $0x90] sm:$0xf] %vm2470_vm3, %v3054_v13  ;;  %v3057_v22 = vpack.c.bf16 %v1709_v14, %v1709_v14  ;;  %v1707_v23 = vmax.f32 %v1179_v15, 0.0  ;;  %v1200_v24 = vadd.f32 %v3303_v20, %v3727_v21  ;;  %v1787_v27 = vmax.f32 %v1499_v19, 0.0 }
 0x126   : > { %2587 = vst.msk [vmem:[%s3737_s25 + $0x1d0] sm:$0xf] %vm2470_vm3, %v3134_v17  ;;  %v3137_v26 = vpack.c.bf16 %v1789_v18, %v1789_v18  ;;  %v1520_v28 = vadd.f32 %v3383_v25, %v3727_v21  ;;  %v1191_v29 = vpop.f32.mrf.mxu0  ;;  %v1511_v33 = vpop.f32.mrf.mxu1 }
 0x127   : > { %2510 = vst.msk [vmem:[%s3737_s25 + $0x9c] sm:$0xf] %vm2470_vm3, %v3057_v22  ;;  %v3055_v30 = vpack.c.bf16 %v1707_v23, %v1707_v23  ;;  %v1712_v31 = vmax.f32 %v1200_v24, 0.0  ;;  %v1192_v32 = vadd.f32 %v3727_v21, %v1191_v29  ;;  %v3135_v34 = vpack.c.bf16 %v1787_v27, %v1787_v27 }
 0x128   : > { %2590 = vst.msk [vmem:[%s3737_s25 + $0x1dc] sm:$0xf] %vm2470_vm3, %v3137_v26  ;;  %v1792_v35 = vmax.f32 %v1520_v28, 0.0  ;;  %v1512_v36 = vadd.f32 %v3727_v21, %v1511_v33  ;;  %v3304_v37 = vpop.f32.mrf.mxu0  ;;  %v3384_v41 = vpop.f32.mrf.mxu1 }
 0x129   : > { %2508 = vst.msk [vmem:[%s3737_s25 + $0x94] sm:$0xf] %vm2470_vm3, %v3055_v30  ;;  %v3060_v38 = vpack.c.bf16 %v1712_v31, %v1712_v31  ;;  %v1710_v39 = vmax.f32 %v1192_v32, 0.0  ;;  %v1203_v40 = vadd.f32 %v3304_v37, %v3727_v21  ;;  %2588 = vst.msk [vmem:[%s3737_s25 + $0x1d4] sm:$0xf] %vm2470_vm3, %v3135_v34  ;;  %v1523_v44 = vadd.f32 %v3384_v41, %v3727_v21 }
 0x12a   : > { %v3140_v42 = vpack.c.bf16 %v1792_v35, %v1792_v35  ;;  %v1790_v43 = vmax.f32 %v1512_v36, 0.0  ;;  %v1194_v45 = vpop.f32.mrf.mxu0  ;;  %v1514_v49 = vpop.f32.mrf.mxu1 }
 0x12b   : > { %2513 = vst.msk [vmem:[%s3737_s25 + $0xa8] sm:$0xf] %vm2470_vm3, %v3060_v38  ;;  %v3058_v46 = vpack.c.bf16 %v1710_v39, %v1710_v39  ;;  %v1713_v47 = vmax.f32 %v1203_v40, 0.0  ;;  %v1195_v48 = vadd.f32 %v3727_v21, %v1194_v45  ;;  %v1793_v51 = vmax.f32 %v1523_v44, 0.0 }
 0x12c   : > { %2593 = vst.msk [vmem:[%s3737_s25 + $0x1e8] sm:$0xf] %vm2470_vm3, %v3140_v42  ;;  %v3138_v50 = vpack.c.bf16 %v1790_v43, %v1790_v43  ;;  %v1515_v52 = vadd.f32 %v3727_v21, %v1514_v49  ;;  %v3307_v53 = vpop.f32.mrf.mxu0  ;;  %v3387_v57 = vpop.f32.mrf.mxu1 }
 0x12d   : > { %2511 = vst.msk [vmem:[%s3737_s25 + $0xa0] sm:$0xf] %vm2470_vm3, %v3058_v46  ;;  %v3061_v54 = vpack.c.bf16 %v1713_v47, %v1713_v47  ;;  %v1711_v55 = vmax.f32 %v1195_v48, 0.0  ;;  %v1216_v56 = vadd.f32 %v3307_v53, %v3727_v21  ;;  %v3141_v58 = vpack.c.bf16 %v1793_v51, %v1793_v51 }
 0x12e   : > { %2591 = vst.msk [vmem:[%s3737_s25 + $0x1e0] sm:$0xf] %vm2470_vm3, %v3138_v50  ;;  %v1791_v59 = vmax.f32 %v1515_v52, 0.0  ;;  %v1536_v60 = vadd.f32 %v3387_v57, %v3727_v21  ;;  %v1207_v61 = vpop.f32.mrf.mxu0  ;;  %v1527_v1 = vpop.f32.mrf.mxu1  ;;  %v4041_v57 = vld [vmem:[%s4226_s2] ss:$0 sm:$0xff] }
 0x12f   : > { %2514 = vst.msk [vmem:[%s3737_s25 + $0xac] sm:$0xf] %vm2470_vm3, %v3061_v54  ;;  %v3059_v62 = vpack.c.bf16 %v1711_v55, %v1711_v55  ;;  %v1716_v63 = vmax.f32 %v1216_v56, 0.0  ;;  %v1208_v0 = vadd.f32 %v3727_v21, %v1207_v61  ;;  %2594 = vst.msk [vmem:[%s3737_s25 + $0x1ec] sm:$0xf] %vm2470_vm3, %v3141_v58  ;;  %v1528_v4 = vadd.f32 %v3727_v21, %v1527_v1 }
 0x130   : > { %v3139_v2 = vpack.c.bf16 %v1791_v59, %v1791_v59  ;;  %v1796_v3 = vmax.f32 %v1536_v60, 0.0  ;;  %v3308_v5 = vpop.f32.mrf.mxu0  ;;  %v3388_v9 = vpop.f32.mrf.mxu1 }
 0x131   : > { %2512 = vst.msk [vmem:[%s3737_s25 + $0xa4] sm:$0xf] %vm2470_vm3, %v3059_v62  ;;  %v3064_v6 = vpack.c.bf16 %v1716_v63, %v1716_v63  ;;  %v1714_v7 = vmax.f32 %v1208_v0, 0.0  ;;  %v1219_v8 = vadd.f32 %v3308_v5, %v3727_v21  ;;  %v1794_v11 = vmax.f32 %v1528_v4, 0.0 }
 0x132   : > { %2592 = vst.msk [vmem:[%s3737_s25 + $0x1e4] sm:$0xf] %vm2470_vm3, %v3139_v2  ;;  %v3144_v10 = vpack.c.bf16 %v1796_v3, %v1796_v3  ;;  %v1539_v12 = vadd.f32 %v3388_v9, %v3727_v21  ;;  %v1210_v13 = vpop.f32.mrf.mxu0  ;;  %v1530_v17 = vpop.f32.mrf.mxu1 }
 0x133   : > { %2517 = vst.msk [vmem:[%s3737_s25 + $0xb8] sm:$0xf] %vm2470_vm3, %v3064_v6  ;;  %v3062_v14 = vpack.c.bf16 %v1714_v7, %v1714_v7  ;;  %v1717_v15 = vmax.f32 %v1219_v8, 0.0  ;;  %v1211_v16 = vadd.f32 %v3727_v21, %v1210_v13  ;;  %v3142_v18 = vpack.c.bf16 %v1794_v11, %v1794_v11 }
 0x134   : > { %2597 = vst.msk [vmem:[%s3737_s25 + $0x1f8] sm:$0xf] %vm2470_vm3, %v3144_v10  ;;  %v1797_v19 = vmax.f32 %v1539_v12, 0.0  ;;  %v1531_v20 = vadd.f32 %v3727_v21, %v1530_v17  ;;  %v3311_v22 = vpop.f32.mrf.mxu0  ;;  %v3391_v26 = vpop.f32.mrf.mxu1 }
 0x135   : > { %2515 = vst.msk [vmem:[%s3737_s25 + $0xb0] sm:$0xf] %vm2470_vm3, %v3062_v14  ;;  %v3065_v23 = vpack.c.bf16 %v1717_v15, %v1717_v15  ;;  %v1715_v24 = vmax.f32 %v1211_v16, 0.0  ;;  %v1232_v25 = vadd.f32 %v3311_v22, %v3727_v21  ;;  %2595 = vst.msk [vmem:[%s3737_s25 + $0x1f0] sm:$0xf] %vm2470_vm3, %v3142_v18  ;;  %v1552_v29 = vadd.f32 %v3391_v26, %v3727_v21 }
 0x136   : > { %v3145_v27 = vpack.c.bf16 %v1797_v19, %v1797_v19  ;;  %v1795_v28 = vmax.f32 %v1531_v20, 0.0  ;;  %v1223_v30 = vpop.f32.mrf.mxu0  ;;  %v1543_v34 = vpop.f32.mrf.mxu1 }
 0x137   : > { %2518 = vst.msk [vmem:[%s3737_s25 + $0xbc] sm:$0xf] %vm2470_vm3, %v3065_v23  ;;  %v3063_v31 = vpack.c.bf16 %v1715_v24, %v1715_v24  ;;  %v1720_v32 = vmax.f32 %v1232_v25, 0.0  ;;  %v1224_v33 = vadd.f32 %v3727_v21, %v1223_v30  ;;  %v1800_v36 = vmax.f32 %v1552_v29, 0.0 }
 0x138   : > { %2598 = vst.msk [vmem:[%s3737_s25 + $0x1fc] sm:$0xf] %vm2470_vm3, %v3145_v27  ;;  %v3143_v35 = vpack.c.bf16 %v1795_v28, %v1795_v28  ;;  %v1544_v37 = vadd.f32 %v3727_v21, %v1543_v34  ;;  %v3312_v38 = vpop.f32.mrf.mxu0  ;;  %v3392_v42 = vpop.f32.mrf.mxu1 }
 0x139   : > { %2516 = vst.msk [vmem:[%s3737_s25 + $0xb4] sm:$0xf] %vm2470_vm3, %v3063_v31  ;;  %v3068_v39 = vpack.c.bf16 %v1720_v32, %v1720_v32  ;;  %v1718_v40 = vmax.f32 %v1224_v33, 0.0  ;;  %v1235_v41 = vadd.f32 %v3312_v38, %v3727_v21  ;;  %v3148_v43 = vpack.c.bf16 %v1800_v36, %v1800_v36 }
 0x13a   : > { %2596 = vst.msk [vmem:[%s3737_s25 + $0x1f4] sm:$0xf] %vm2470_vm3, %v3143_v35  ;;  %v1798_v44 = vmax.f32 %v1544_v37, 0.0  ;;  %v1555_v45 = vadd.f32 %v3392_v42, %v3727_v21  ;;  %v1226_v46 = vpop.f32.mrf.mxu0  ;;  %v1546_v50 = vpop.f32.mrf.mxu1 }
 0x13b   : > { %2521 = vst.msk [vmem:[%s3737_s25 + $0xc8] sm:$0xf] %vm2470_vm3, %v3068_v39  ;;  %v3066_v47 = vpack.c.bf16 %v1718_v40, %v1718_v40  ;;  %v1721_v48 = vmax.f32 %v1235_v41, 0.0  ;;  %v1227_v49 = vadd.f32 %v3727_v21, %v1226_v46  ;;  %2601 = vst.msk [vmem:[%s3737_s25 + $0x208] sm:$0xf] %vm2470_vm3, %v3148_v43  ;;  %v1547_v53 = vadd.f32 %v3727_v21, %v1546_v50 }
 0x13c   : > { %v3146_v51 = vpack.c.bf16 %v1798_v44, %v1798_v44  ;;  %v1801_v52 = vmax.f32 %v1555_v45, 0.0  ;;  %v3315_v54 = vpop.f32.mrf.mxu0  ;;  %v3395_v59 = vpop.f32.mrf.mxu1 }
 0x13d   : > { %2519 = vst.msk [vmem:[%s3737_s25 + $0xc0] sm:$0xf] %vm2470_vm3, %v3066_v47  ;;  %v3069_v55 = vpack.c.bf16 %v1721_v48, %v1721_v48  ;;  %v1719_v56 = vmax.f32 %v1227_v49, 0.0  ;;  %v1248_v58 = vadd.f32 %v4041_v57, %v3315_v54  ;;  %v1799_v61 = vmax.f32 %v1547_v53, 0.0 }
 0x13e   : > { %2599 = vst.msk [vmem:[%s3737_s25 + $0x200] sm:$0xf] %vm2470_vm3, %v3146_v51  ;;  %v3149_v60 = vpack.c.bf16 %v1801_v52, %v1801_v52  ;;  %v1568_v21 = vadd.f32 %v4041_v57, %v3395_v59  ;;  %v1239_v62 = vpop.f32.mrf.mxu0  ;;  %v1559_v2 = vpop.f32.mrf.mxu1 }
 0x13f   : > { %2522 = vst.msk [vmem:[%s3737_s25 + $0xcc] sm:$0xf] %vm2470_vm3, %v3069_v55  ;;  %v3067_v63 = vpack.c.bf16 %v1719_v56, %v1719_v56  ;;  %v1724_v0 = vmax.f32 %v1248_v58, 0.0  ;;  %v1240_v1 = vadd.f32 %v4041_v57, %v1239_v62  ;;  %v3147_v3 = vpack.c.bf16 %v1799_v61, %v1799_v61 }
 0x140   : > { %2602 = vst.msk [vmem:[%s3737_s25 + $0x20c] sm:$0xf] %vm2470_vm3, %v3149_v60  ;;  %v1804_v4 = vmax.f32 %v1568_v21, 0.0  ;;  %v1560_v5 = vadd.f32 %v4041_v57, %v1559_v2  ;;  %v3316_v6 = vpop.f32.mrf.mxu0  ;;  %v3396_v10 = vpop.f32.mrf.mxu1 }
 0x141   : > { %2520 = vst.msk [vmem:[%s3737_s25 + $0xc4] sm:$0xf] %vm2470_vm3, %v3067_v63  ;;  %v3072_v7 = vpack.c.bf16 %v1724_v0, %v1724_v0  ;;  %v1722_v8 = vmax.f32 %v1240_v1, 0.0  ;;  %v1251_v9 = vadd.f32 %v4041_v57, %v3316_v6  ;;  %2600 = vst.msk [vmem:[%s3737_s25 + $0x204] sm:$0xf] %vm2470_vm3, %v3147_v3  ;;  %v1571_v13 = vadd.f32 %v4041_v57, %v3396_v10 }
 0x142   : > { %v3152_v11 = vpack.c.bf16 %v1804_v4, %v1804_v4  ;;  %v1802_v12 = vmax.f32 %v1560_v5, 0.0  ;;  %v1242_v14 = vpop.f32.mrf.mxu0  ;;  %v1562_v18 = vpop.f32.mrf.mxu1 }
 0x143   : > { %2525 = vst.msk [vmem:[%s3737_s25 + $0xd8] sm:$0xf] %vm2470_vm3, %v3072_v7  ;;  %v3070_v15 = vpack.c.bf16 %v1722_v8, %v1722_v8  ;;  %v1725_v16 = vmax.f32 %v1251_v9, 0.0  ;;  %v1243_v17 = vadd.f32 %v4041_v57, %v1242_v14  ;;  %v1805_v20 = vmax.f32 %v1571_v13, 0.0 }
 0x144   : > { %2605 = vst.msk [vmem:[%s3737_s25 + $0x218] sm:$0xf] %vm2470_vm3, %v3152_v11  ;;  %v3150_v19 = vpack.c.bf16 %v1802_v12, %v1802_v12  ;;  %v1563_v22 = vadd.f32 %v4041_v57, %v1562_v18  ;;  %v3319_v23 = vpop.f32.mrf.mxu0  ;;  %v3399_v27 = vpop.f32.mrf.mxu1 }
 0x145   : > { %2523 = vst.msk [vmem:[%s3737_s25 + $0xd0] sm:$0xf] %vm2470_vm3, %v3070_v15  ;;  %v3073_v24 = vpack.c.bf16 %v1725_v16, %v1725_v16  ;;  %v1723_v25 = vmax.f32 %v1243_v17, 0.0  ;;  %v1264_v26 = vadd.f32 %v4041_v57, %v3319_v23  ;;  %v3153_v28 = vpack.c.bf16 %v1805_v20, %v1805_v20 }
 0x146   : > { %2603 = vst.msk [vmem:[%s3737_s25 + $0x210] sm:$0xf] %vm2470_vm3, %v3150_v19  ;;  %v1803_v29 = vmax.f32 %v1563_v22, 0.0  ;;  %v1584_v30 = vadd.f32 %v4041_v57, %v3399_v27  ;;  %v1255_v31 = vpop.f32.mrf.mxu0  ;;  %v1575_v35 = vpop.f32.mrf.mxu1 }
 0x147   : > { %2526 = vst.msk [vmem:[%s3737_s25 + $0xdc] sm:$0xf] %vm2470_vm3, %v3073_v24  ;;  %v3071_v32 = vpack.c.bf16 %v1723_v25, %v1723_v25  ;;  %v1728_v33 = vmax.f32 %v1264_v26, 0.0  ;;  %v1256_v34 = vadd.f32 %v4041_v57, %v1255_v31  ;;  %2606 = vst.msk [vmem:[%s3737_s25 + $0x21c] sm:$0xf] %vm2470_vm3, %v3153_v28  ;;  %v1576_v38 = vadd.f32 %v4041_v57, %v1575_v35 }
 0x148   : > { %v3151_v36 = vpack.c.bf16 %v1803_v29, %v1803_v29  ;;  %v1808_v37 = vmax.f32 %v1584_v30, 0.0  ;;  %v3320_v39 = vpop.f32.mrf.mxu0  ;;  %v3400_v43 = vpop.f32.mrf.mxu1 }
 0x149   : > { %2524 = vst.msk [vmem:[%s3737_s25 + $0xd4] sm:$0xf] %vm2470_vm3, %v3071_v32  ;;  %v3076_v40 = vpack.c.bf16 %v1728_v33, %v1728_v33  ;;  %v1726_v41 = vmax.f32 %v1256_v34, 0.0  ;;  %v1267_v42 = vadd.f32 %v4041_v57, %v3320_v39  ;;  %v1806_v45 = vmax.f32 %v1576_v38, 0.0 }
 0x14a   : > { %2604 = vst.msk [vmem:[%s3737_s25 + $0x214] sm:$0xf] %vm2470_vm3, %v3151_v36  ;;  %v3156_v44 = vpack.c.bf16 %v1808_v37, %v1808_v37  ;;  %v1587_v46 = vadd.f32 %v4041_v57, %v3400_v43  ;;  %v1258_v47 = vpop.f32.mrf.mxu0  ;;  %v1578_v51 = vpop.f32.mrf.mxu1 }
 0x14b   : > { %2529 = vst.msk [vmem:[%s3737_s25 + $0xe8] sm:$0xf] %vm2470_vm3, %v3076_v40  ;;  %v3074_v48 = vpack.c.bf16 %v1726_v41, %v1726_v41  ;;  %v1729_v49 = vmax.f32 %v1267_v42, 0.0  ;;  %v1259_v50 = vadd.f32 %v4041_v57, %v1258_v47  ;;  %v3154_v52 = vpack.c.bf16 %v1806_v45, %v1806_v45 }
 0x14c   : > { %2609 = vst.msk [vmem:[%s3737_s25 + $0x228] sm:$0xf] %vm2470_vm3, %v3156_v44  ;;  %v1809_v53 = vmax.f32 %v1587_v46, 0.0  ;;  %v1579_v54 = vadd.f32 %v4041_v57, %v1578_v51  ;;  %v3323_v55 = vpop.f32.mrf.mxu0  ;;  %v3403_v60 = vpop.f32.mrf.mxu1 }
 0x14d   : > { %2527 = vst.msk [vmem:[%s3737_s25 + $0xe0] sm:$0xf] %vm2470_vm3, %v3074_v48  ;;  %v3077_v56 = vpack.c.bf16 %v1729_v49, %v1729_v49  ;;  %v1727_v58 = vmax.f32 %v1259_v50, 0.0  ;;  %v1280_v59 = vadd.f32 %v4041_v57, %v3323_v55  ;;  %2607 = vst.msk [vmem:[%s3737_s25 + $0x220] sm:$0xf] %vm2470_vm3, %v3154_v52  ;;  %v1600_v62 = vadd.f32 %v4041_v57, %v3403_v60 }
 0x14e   : > { %v3157_v61 = vpack.c.bf16 %v1809_v53, %v1809_v53  ;;  %v1807_v21 = vmax.f32 %v1579_v54, 0.0  ;;  %v1271_v63 = vpop.f32.mrf.mxu0  ;;  %v1591_v3 = vpop.f32.mrf.mxu1 }
 0x14f   : > { %2530 = vst.msk [vmem:[%s3737_s25 + $0xec] sm:$0xf] %vm2470_vm3, %v3077_v56  ;;  %v3075_v0 = vpack.c.bf16 %v1727_v58, %v1727_v58  ;;  %v1732_v1 = vmax.f32 %v1280_v59, 0.0  ;;  %v1272_v2 = vadd.f32 %v4041_v57, %v1271_v63  ;;  %v1812_v5 = vmax.f32 %v1600_v62, 0.0 }
 0x150   : > { %2610 = vst.msk [vmem:[%s3737_s25 + $0x22c] sm:$0xf] %vm2470_vm3, %v3157_v61  ;;  %v3155_v4 = vpack.c.bf16 %v1807_v21, %v1807_v21  ;;  %v1592_v6 = vadd.f32 %v4041_v57, %v1591_v3  ;;  %v3324_v7 = vpop.f32.mrf.mxu0  ;;  %v3404_v11 = vpop.f32.mrf.mxu1 }
 0x151   : > { %2528 = vst.msk [vmem:[%s3737_s25 + $0xe4] sm:$0xf] %vm2470_vm3, %v3075_v0  ;;  %v3080_v8 = vpack.c.bf16 %v1732_v1, %v1732_v1  ;;  %v1730_v9 = vmax.f32 %v1272_v2, 0.0  ;;  %v1283_v10 = vadd.f32 %v4041_v57, %v3324_v7  ;;  %v3160_v12 = vpack.c.bf16 %v1812_v5, %v1812_v5 }
 0x152   : > { %2608 = vst.msk [vmem:[%s3737_s25 + $0x224] sm:$0xf] %vm2470_vm3, %v3155_v4  ;;  %v1810_v13 = vmax.f32 %v1592_v6, 0.0  ;;  %v1603_v14 = vadd.f32 %v4041_v57, %v3404_v11  ;;  %v1274_v15 = vpop.f32.mrf.mxu0  ;;  %v1594_v19 = vpop.f32.mrf.mxu1 }
 0x153   : > { %2533 = vst.msk [vmem:[%s3737_s25 + $0xf8] sm:$0xf] %vm2470_vm3, %v3080_v8  ;;  %v3078_v16 = vpack.c.bf16 %v1730_v9, %v1730_v9  ;;  %v1733_v17 = vmax.f32 %v1283_v10, 0.0  ;;  %v1275_v18 = vadd.f32 %v4041_v57, %v1274_v15  ;;  %2613 = vst.msk [vmem:[%s3737_s25 + $0x238] sm:$0xf] %vm2470_vm3, %v3160_v12  ;;  %v1595_v23 = vadd.f32 %v4041_v57, %v1594_v19 }
 0x154   : > { %v3158_v20 = vpack.c.bf16 %v1810_v13, %v1810_v13  ;;  %v1813_v22 = vmax.f32 %v1603_v14, 0.0  ;;  %v3327_v24 = vpop.f32.mrf.mxu0  ;;  %v3407_v28 = vpop.f32.mrf.mxu1 }
 0x155   : > { %2531 = vst.msk [vmem:[%s3737_s25 + $0xf0] sm:$0xf] %vm2470_vm3, %v3078_v16  ;;  %v3081_v25 = vpack.c.bf16 %v1733_v17, %v1733_v17  ;;  %v1731_v26 = vmax.f32 %v1275_v18, 0.0  ;;  %v1296_v27 = vadd.f32 %v4041_v57, %v3327_v24  ;;  %v1811_v30 = vmax.f32 %v1595_v23, 0.0 }
 0x156   : > { %2611 = vst.msk [vmem:[%s3737_s25 + $0x230] sm:$0xf] %vm2470_vm3, %v3158_v20  ;;  %v3161_v29 = vpack.c.bf16 %v1813_v22, %v1813_v22  ;;  %v1616_v31 = vadd.f32 %v4041_v57, %v3407_v28  ;;  %v1287_v32 = vpop.f32.mrf.mxu0  ;;  %v1607_v36 = vpop.f32.mrf.mxu1 }
 0x157   : > { %2534 = vst.msk [vmem:[%s3737_s25 + $0xfc] sm:$0xf] %vm2470_vm3, %v3081_v25  ;;  %v3079_v33 = vpack.c.bf16 %v1731_v26, %v1731_v26  ;;  %v1736_v34 = vmax.f32 %v1296_v27, 0.0  ;;  %v1288_v35 = vadd.f32 %v4041_v57, %v1287_v32  ;;  %v3159_v37 = vpack.c.bf16 %v1811_v30, %v1811_v30 }
 0x158   : > { %2614 = vst.msk [vmem:[%s3737_s25 + $0x23c] sm:$0xf] %vm2470_vm3, %v3161_v29  ;;  %v1816_v38 = vmax.f32 %v1616_v31, 0.0  ;;  %v1608_v39 = vadd.f32 %v4041_v57, %v1607_v36  ;;  %v3328_v40 = vpop.f32.mrf.mxu0  ;;  %v3408_v44 = vpop.f32.mrf.mxu1 }
 0x159   : > { %2532 = vst.msk [vmem:[%s3737_s25 + $0xf4] sm:$0xf] %vm2470_vm3, %v3079_v33  ;;  %v3084_v41 = vpack.c.bf16 %v1736_v34, %v1736_v34  ;;  %v1734_v42 = vmax.f32 %v1288_v35, 0.0  ;;  %v1299_v43 = vadd.f32 %v4041_v57, %v3328_v40  ;;  %2612 = vst.msk [vmem:[%s3737_s25 + $0x234] sm:$0xf] %vm2470_vm3, %v3159_v37  ;;  %v1619_v47 = vadd.f32 %v4041_v57, %v3408_v44 }
 0x15a   : > { %v3164_v45 = vpack.c.bf16 %v1816_v38, %v1816_v38  ;;  %v1814_v46 = vmax.f32 %v1608_v39, 0.0  ;;  %v1290_v48 = vpop.f32.mrf.mxu0  ;;  %v1610_v52 = vpop.f32.mrf.mxu1 }
 0x15b   : > { %2537 = vst.msk [vmem:[%s3737_s25 + $0x108] sm:$0xf] %vm2470_vm3, %v3084_v41  ;;  %v3082_v49 = vpack.c.bf16 %v1734_v42, %v1734_v42  ;;  %v1737_v50 = vmax.f32 %v1299_v43, 0.0  ;;  %v1291_v51 = vadd.f32 %v4041_v57, %v1290_v48  ;;  %v1817_v54 = vmax.f32 %v1619_v47, 0.0 }
 0x15c   : > { %2617 = vst.msk [vmem:[%s3737_s25 + $0x248] sm:$0xf] %vm2470_vm3, %v3164_v45  ;;  %v3162_v53 = vpack.c.bf16 %v1814_v46, %v1814_v46  ;;  %v1611_v55 = vadd.f32 %v4041_v57, %v1610_v52  ;;  %v3331_v56 = vpop.f32.mrf.mxu0  ;;  %v3411_v61 = vpop.f32.mrf.mxu1 }
 0x15d   : > { %2535 = vst.msk [vmem:[%s3737_s25 + $0x100] sm:$0xf] %vm2470_vm3, %v3082_v49  ;;  %v3085_v58 = vpack.c.bf16 %v1737_v50, %v1737_v50  ;;  %v1735_v59 = vmax.f32 %v1291_v51, 0.0  ;;  %v1312_v60 = vadd.f32 %v4041_v57, %v3331_v56  ;;  %v3165_v21 = vpack.c.bf16 %v1817_v54, %v1817_v54 }
 0x15e   : > { %2615 = vst.msk [vmem:[%s3737_s25 + $0x240] sm:$0xf] %vm2470_vm3, %v3162_v53  ;;  %v1815_v62 = vmax.f32 %v1611_v55, 0.0  ;;  %v1632_v63 = vadd.f32 %v4041_v57, %v3411_v61  ;;  %v1303_v0 = vpop.f32.mrf.mxu0  ;;  %v1623_v4 = vpop.f32.mrf.mxu1 }
 0x15f   : > { %2538 = vst.msk [vmem:[%s3737_s25 + $0x10c] sm:$0xf] %vm2470_vm3, %v3085_v58  ;;  %v3083_v1 = vpack.c.bf16 %v1735_v59, %v1735_v59  ;;  %v1740_v2 = vmax.f32 %v1312_v60, 0.0  ;;  %v1304_v3 = vadd.f32 %v4041_v57, %v1303_v0  ;;  %2618 = vst.msk [vmem:[%s3737_s25 + $0x24c] sm:$0xf] %vm2470_vm3, %v3165_v21  ;;  %v1624_v7 = vadd.f32 %v4041_v57, %v1623_v4 }
 0x160   : > { %v3163_v5 = vpack.c.bf16 %v1815_v62, %v1815_v62  ;;  %v1820_v6 = vmax.f32 %v1632_v63, 0.0  ;;  %v3332_v8 = vpop.f32.mrf.mxu0  ;;  %v3412_v12 = vpop.f32.mrf.mxu1 }
 0x161   : > { %2536 = vst.msk [vmem:[%s3737_s25 + $0x104] sm:$0xf] %vm2470_vm3, %v3083_v1  ;;  %v3088_v9 = vpack.c.bf16 %v1740_v2, %v1740_v2  ;;  %v1738_v10 = vmax.f32 %v1304_v3, 0.0  ;;  %v1315_v11 = vadd.f32 %v4041_v57, %v3332_v8  ;;  %v1818_v14 = vmax.f32 %v1624_v7, 0.0 }
 0x162   : > { %2616 = vst.msk [vmem:[%s3737_s25 + $0x244] sm:$0xf] %vm2470_vm3, %v3163_v5  ;;  %v3168_v13 = vpack.c.bf16 %v1820_v6, %v1820_v6  ;;  %v1635_v15 = vadd.f32 %v4041_v57, %v3412_v12  ;;  %v1306_v16 = vpop.f32.mrf.mxu0  ;;  %v1626_v20 = vpop.f32.mrf.mxu1 }
 0x163   : > { %2541 = vst.msk [vmem:[%s3737_s25 + $0x118] sm:$0xf] %vm2470_vm3, %v3088_v9  ;;  %v3086_v17 = vpack.c.bf16 %v1738_v10, %v1738_v10  ;;  %v1741_v18 = vmax.f32 %v1315_v11, 0.0  ;;  %v1307_v19 = vadd.f32 %v4041_v57, %v1306_v16  ;;  %v3166_v22 = vpack.c.bf16 %v1818_v14, %v1818_v14 }
 0x164   : > { %2621 = vst.msk [vmem:[%s3737_s25 + $0x258] sm:$0xf] %vm2470_vm3, %v3168_v13  ;;  %v1821_v23 = vmax.f32 %v1635_v15, 0.0  ;;  %v1627_v24 = vadd.f32 %v4041_v57, %v1626_v20  ;;  %v3335_v25 = vpop.f32.mrf.mxu0  ;;  %v3415_v29 = vpop.f32.mrf.mxu1 }
 0x165   : > { %2539 = vst.msk [vmem:[%s3737_s25 + $0x110] sm:$0xf] %vm2470_vm3, %v3086_v17  ;;  %v3089_v26 = vpack.c.bf16 %v1741_v18, %v1741_v18  ;;  %v1739_v27 = vmax.f32 %v1307_v19, 0.0  ;;  %v1328_v28 = vadd.f32 %v4041_v57, %v3335_v25  ;;  %2619 = vst.msk [vmem:[%s3737_s25 + $0x250] sm:$0xf] %vm2470_vm3, %v3166_v22  ;;  %v1648_v32 = vadd.f32 %v4041_v57, %v3415_v29 }
 0x166   : > { %v3169_v30 = vpack.c.bf16 %v1821_v23, %v1821_v23  ;;  %v1819_v31 = vmax.f32 %v1627_v24, 0.0  ;;  %v1319_v33 = vpop.f32.mrf.mxu0  ;;  %v1639_v37 = vpop.f32.mrf.mxu1 }
 0x167   : > { %2542 = vst.msk [vmem:[%s3737_s25 + $0x11c] sm:$0xf] %vm2470_vm3, %v3089_v26  ;;  %v3087_v34 = vpack.c.bf16 %v1739_v27, %v1739_v27  ;;  %v1744_v35 = vmax.f32 %v1328_v28, 0.0  ;;  %v1320_v36 = vadd.f32 %v4041_v57, %v1319_v33  ;;  %v1824_v39 = vmax.f32 %v1648_v32, 0.0 }
 0x168   : > { %2622 = vst.msk [vmem:[%s3737_s25 + $0x25c] sm:$0xf] %vm2470_vm3, %v3169_v30  ;;  %v3167_v38 = vpack.c.bf16 %v1819_v31, %v1819_v31  ;;  %v1640_v40 = vadd.f32 %v4041_v57, %v1639_v37  ;;  %v3336_v41 = vpop.f32.mrf.mxu0  ;;  %v3416_v45 = vpop.f32.mrf.mxu1 }
 0x169   : > { %2540 = vst.msk [vmem:[%s3737_s25 + $0x114] sm:$0xf] %vm2470_vm3, %v3087_v34  ;;  %v3092_v42 = vpack.c.bf16 %v1744_v35, %v1744_v35  ;;  %v1742_v43 = vmax.f32 %v1320_v36, 0.0  ;;  %v1331_v44 = vadd.f32 %v4041_v57, %v3336_v41  ;;  %v3172_v46 = vpack.c.bf16 %v1824_v39, %v1824_v39 }
 0x16a   : > { %2620 = vst.msk [vmem:[%s3737_s25 + $0x254] sm:$0xf] %vm2470_vm3, %v3167_v38  ;;  %v1822_v47 = vmax.f32 %v1640_v40, 0.0  ;;  %v1651_v48 = vadd.f32 %v4041_v57, %v3416_v45  ;;  %v1322_v49 = vpop.f32.mrf.mxu0  ;;  %v1642_v53 = vpop.f32.mrf.mxu1 }
 0x16b   : > { %2545 = vst.msk [vmem:[%s3737_s25 + $0x128] sm:$0xf] %vm2470_vm3, %v3092_v42  ;;  %v3090_v50 = vpack.c.bf16 %v1742_v43, %v1742_v43  ;;  %v1745_v51 = vmax.f32 %v1331_v44, 0.0  ;;  %v1323_v52 = vadd.f32 %v4041_v57, %v1322_v49  ;;  %2625 = vst.msk [vmem:[%s3737_s25 + $0x268] sm:$0xf] %vm2470_vm3, %v3172_v46  ;;  %v1643_v56 = vadd.f32 %v4041_v57, %v1642_v53 }
 0x16c   : > { %v3170_v54 = vpack.c.bf16 %v1822_v47, %v1822_v47  ;;  %v1825_v55 = vmax.f32 %v1651_v48, 0.0  ;;  %v3339_v58 = vpop.f32.mrf.mxu0  ;;  %v3419_v21 = vpop.f32.mrf.mxu1 }
 0x16d   : > { %2543 = vst.msk [vmem:[%s3737_s25 + $0x120] sm:$0xf] %vm2470_vm3, %v3090_v50  ;;  %v3093_v59 = vpack.c.bf16 %v1745_v51, %v1745_v51  ;;  %v1743_v60 = vmax.f32 %v1323_v52, 0.0  ;;  %v1344_v61 = vadd.f32 %v4041_v57, %v3339_v58  ;;  %v1823_v63 = vmax.f32 %v1643_v56, 0.0 }
 0x16e   : > { %2623 = vst.msk [vmem:[%s3737_s25 + $0x260] sm:$0xf] %vm2470_vm3, %v3170_v54  ;;  %v3173_v62 = vpack.c.bf16 %v1825_v55, %v1825_v55  ;;  %v1664_v0 = vadd.f32 %v4041_v57, %v3419_v21  ;;  %v1335_v1 = vpop.f32.mrf.mxu0  ;;  %v1655_v5 = vpop.f32.mrf.mxu1 }
 0x16f   : > { %2546 = vst.msk [vmem:[%s3737_s25 + $0x12c] sm:$0xf] %vm2470_vm3, %v3093_v59  ;;  %v3091_v2 = vpack.c.bf16 %v1743_v60, %v1743_v60  ;;  %v1748_v3 = vmax.f32 %v1344_v61, 0.0  ;;  %v1336_v4 = vadd.f32 %v4041_v57, %v1335_v1  ;;  %v3171_v6 = vpack.c.bf16 %v1823_v63, %v1823_v63 }
 0x170   : > { %2626 = vst.msk [vmem:[%s3737_s25 + $0x26c] sm:$0xf] %vm2470_vm3, %v3173_v62  ;;  %v1828_v7 = vmax.f32 %v1664_v0, 0.0  ;;  %v1656_v8 = vadd.f32 %v4041_v57, %v1655_v5  ;;  %v3340_v9 = vpop.f32.mrf.mxu0  ;;  %v3420_v13 = vpop.f32.mrf.mxu1 }
 0x171   : > { %2544 = vst.msk [vmem:[%s3737_s25 + $0x124] sm:$0xf] %vm2470_vm3, %v3091_v2  ;;  %v3096_v10 = vpack.c.bf16 %v1748_v3, %v1748_v3  ;;  %v1746_v11 = vmax.f32 %v1336_v4, 0.0  ;;  %v1347_v12 = vadd.f32 %v4041_v57, %v3340_v9  ;;  %2624 = vst.msk [vmem:[%s3737_s25 + $0x264] sm:$0xf] %vm2470_vm3, %v3171_v6  ;;  %v1667_v16 = vadd.f32 %v4041_v57, %v3420_v13 }
 0x172   : > { %v3176_v14 = vpack.c.bf16 %v1828_v7, %v1828_v7  ;;  %v1826_v15 = vmax.f32 %v1656_v8, 0.0  ;;  %v1338_v17 = vpop.f32.mrf.mxu0  ;;  %v1658_v22 = vpop.f32.mrf.mxu1 }
 0x173   : > { %2549 = vst.msk [vmem:[%s3737_s25 + $0x138] sm:$0xf] %vm2470_vm3, %v3096_v10  ;;  %v3094_v18 = vpack.c.bf16 %v1746_v11, %v1746_v11  ;;  %v1749_v19 = vmax.f32 %v1347_v12, 0.0  ;;  %v1339_v20 = vadd.f32 %v4041_v57, %v1338_v17  ;;  %v1829_v24 = vmax.f32 %v1667_v16, 0.0 }
 0x174   : > { %2629 = vst.msk [vmem:[%s3737_s25 + $0x278] sm:$0xf] %vm2470_vm3, %v3176_v14  ;;  %v3174_v23 = vpack.c.bf16 %v1826_v15, %v1826_v15  ;;  %v1659_v25 = vadd.f32 %v4041_v57, %v1658_v22 }
 0x175   : > { %2547 = vst.msk [vmem:[%s3737_s25 + $0x130] sm:$0xf] %vm2470_vm3, %v3094_v18  ;;  %v3097_v26 = vpack.c.bf16 %v1749_v19, %v1749_v19  ;;  %v1747_v27 = vmax.f32 %v1339_v20, 0.0  ;;  %v3177_v28 = vpack.c.bf16 %v1829_v24, %v1829_v24 }
 0x176   : > { %2627 = vst.msk [vmem:[%s3737_s25 + $0x270] sm:$0xf] %vm2470_vm3, %v3174_v23  ;;  %v1827_v29 = vmax.f32 %v1659_v25, 0.0 }
 0x177   : > { %2550 = vst.msk [vmem:[%s3737_s25 + $0x13c] sm:$0xf] %vm2470_vm3, %v3097_v26  ;;  %v3095_v30 = vpack.c.bf16 %v1747_v27, %v1747_v27  ;;  %2630 = vst.msk [vmem:[%s3737_s25 + $0x27c] sm:$0xf] %vm2470_vm3, %v3177_v28 }
 0x178   : > { %v3175_v31 = vpack.c.bf16 %v1827_v29, %v1827_v29 }
 0x179   : > { %2548 = vst.msk [vmem:[%s3737_s25 + $0x134] sm:$0xf] %vm2470_vm3, %v3095_v30 }
 0x17a   : > { %2628 = vst.msk [vmem:[%s3737_s25 + $0x274] sm:$0xf] %vm2470_vm3, %v3175_v31 }
 0x17b PF: > { %s13_s12 = sadd.s32 1, %s3520_s12  }
 0x17c   : > { %p10_p4 = scmp.ge.s32.totalorder %s13_s12, 4  }
 0x17e   :  { %12 = sbr.rel (!%p10_p4) target bundleno = 1 (0x1), region = 62 }

// kernel: mnist_forward.5
= control target key start
LH: loop header
LB: loop body
LE: loop exit
PB: predicated region body
PF: predicated region fallthrough
CT: control target
= control target key end

     0   :  { %v1894_v0 = vmov 0   ;;  %vm1383_vm0 = vcmask 257024   ;;  %s2640_s1 = inlined_call_operand.vmem [shape: bf16[256,32], index: 1, kind: input, shape index: {}]   ;;  %s2641_s0 = inlined_call_operand.vmem [shape: bf16[640,256], index: 0, kind: input, shape index: {}]   ;;  %s2642_s2 = inlined_call_operand.vmem [shape: f32[1,32], index: 2, kind: input, shape index: {}]   ;;  %s2643_s3 = inlined_call_operand.vmem [shape: bf16[640,32], index: 3, kind: output, shape index: {}]  }
   0x1   :  { %630 = vmatprep.subr.bf16.mxu0 %v1894_v0  ;;  %1725 = vmatprep.subr.bf16.mxu1 %v1894_v0  ;;  %v1758_v1 = vld [vmem:[%s2640_s1 + $0x38] sm:$0xff]   ;;  %v1759_v2 = vld [vmem:[%s2640_s1 + $0x30] sm:$0xff]   ;;  %v1760_v3 = vld [vmem:[%s2640_s1 + $0x28] sm:$0xff]  }
   0x2   :  { %631 = vmatpush1.bf16.msra.mxu0 %v1758_v1  ;;  %1741 = vmatpush1.bf16.msra.mxu1 %v1758_v1  ;;  %v1761_v4 = vld [vmem:[%s2640_s1 + $0x20] sm:$0xff]   ;;  %v1762_v5 = vld [vmem:[%s2640_s1 + $0x18] sm:$0xff]   ;;  %v1763_v7 = vld [vmem:[%s2640_s1 + $0x10] sm:$0xff]  }
   0x3   :  { %632 = vmatprep.subr.bf16.mxu0 %v1894_v0  ;;  %1726 = vmatprep.subr.bf16.mxu1 %v1894_v0  ;;  %v1776_v6 = vld [vmem:[%s2641_s0 + $0x4] ss:$8 sps:$4 sm:$0xff]   ;;  %v1766_v11 = vld [vmem:[%s2640_s1 + $0x78] sm:$0xff]   ;;  %v1767_v12 = vld [vmem:[%s2640_s1 + $0x70] sm:$0xff]  }
   0x4   :  { %v1779_v8 = vld [vmem:[%s2641_s0 + $0x144] ss:$8 sps:$4 sm:$0xff]   ;;  %662 = vmatprep.mubr.bf16.mxu0 %v1776_v6  ;;  %v1770_v15 = vld [vmem:[%s2640_s1 + $0x58] sm:$0xff]   ;;  %v1771_v16 = vld [vmem:[%s2640_s1 + $0x50] sm:$0xff]  }
   0x5   :  { %822 = vmatprep.mubr.bf16.mxu1 %v1779_v8  ;;  %v1764_v9 = vld [vmem:[%s2640_s1 + $0x8] sm:$0xff]   ;;  %v1765_v10 = vld [vmem:[%s2640_s1] sm:$0xff]   ;;  %v1780_v21 = vld [vmem:[%s2641_s0 + $0x14] ss:$8 sps:$4 sm:$0xff]  }
   0x6   :  { %633 = vmatpush1.bf16.msra.mxu0 %v1759_v2  ;;  %1742 = vmatpush1.bf16.msra.mxu1 %v1759_v2  ;;  %v1768_v13 = vld [vmem:[%s2640_s1 + $0x68] sm:$0xff]   ;;  %v1769_v14 = vld [vmem:[%s2640_s1 + $0x60] sm:$0xff]   ;;  %v1782_v22 = vld [vmem:[%s2641_s0 + $0x154] ss:$8 sps:$4 sm:$0xff]  }
   0x7   :  { %634 = vmatprep.subr.bf16.mxu0 %v1894_v0  ;;  %1727 = vmatprep.subr.bf16.mxu1 %v1894_v0  ;;  %v1772_v17 = vld [vmem:[%s2640_s1 + $0x48] sm:$0xff]   ;;  %v1773_v18 = vld [vmem:[%s2640_s1 + $0x40] sm:$0xff]   ;;  %v1784_v23 = vld [vmem:[%s2641_s0 + $0x10] ss:$8 sps:$4 sm:$0xff]  }
   0x8   :  { %v1774_v19 = vld [vmem:[%s2641_s0] ss:$8 sps:$4 sm:$0xff]   ;;  %v1785_v24 = vld [vmem:[%s2641_s0 + $0x150] ss:$8 sps:$4 sm:$0xff]   ;;  %v1786_v25 = vld [vmem:[%s2641_s0 + $0x24] ss:$8 sps:$4 sm:$0xff]  }
   0x9   :  { %v1777_v20 = vld [vmem:[%s2641_s0 + $0x140] ss:$8 sps:$4 sm:$0xff]   ;;  %v1788_v26 = vld [vmem:[%s2641_s0 + $0x164] ss:$8 sps:$4 sm:$0xff]   ;;  %v1792_v29 = vld [vmem:[%s2641_s0 + $0x34] ss:$8 sps:$4 sm:$0xff]  }
   0xa   :  { %635 = vmatpush1.bf16.msra.mxu0 %v1760_v3  ;;  %1743 = vmatpush1.bf16.msra.mxu1 %v1760_v3  ;;  %v1790_v27 = vld [vmem:[%s2641_s0 + $0x20] ss:$8 sps:$4 sm:$0xff]   ;;  %v1794_v30 = vld [vmem:[%s2641_s0 + $0x174] ss:$8 sps:$4 sm:$0xff]   ;;  %v1796_v31 = vld [vmem:[%s2641_s0 + $0x30] ss:$8 sps:$4 sm:$0xff]  }
   0xb   :  { %636 = vmatprep.subr.bf16.mxu0 %v1894_v0  ;;  %1728 = vmatprep.subr.bf16.mxu1 %v1894_v0  ;;  %v1791_v28 = vld [vmem:[%s2641_s0 + $0x160] ss:$8 sps:$4 sm:$0xff]   ;;  %v1797_v32 = vld [vmem:[%s2641_s0 + $0x170] ss:$8 sps:$4 sm:$0xff]   ;;  %v1798_v33 = vld [vmem:[%s2641_s0 + $0x44] ss:$8 sps:$4 sm:$0xff]  }
   0xc   :  { %v1800_v34 = vld [vmem:[%s2641_s0 + $0x184] ss:$8 sps:$4 sm:$0xff]   ;;  %v1802_v35 = vld [vmem:[%s2641_s0 + $0x40] ss:$8 sps:$4 sm:$0xff]   ;;  %v1804_v37 = vld [vmem:[%s2641_s0 + $0x54] ss:$8 sps:$4 sm:$0xff]  }
   0xd   :  { %v1803_v36 = vld [vmem:[%s2641_s0 + $0x180] ss:$8 sps:$4 sm:$0xff]   ;;  %v1806_v38 = vld [vmem:[%s2641_s0 + $0x194] ss:$8 sps:$4 sm:$0xff]   ;;  %v1808_v39 = vld [vmem:[%s2641_s0 + $0x50] ss:$8 sps:$4 sm:$0xff]  }
   0xe   :  { %637 = vmatpush1.bf16.msra.mxu0 %v1761_v4  ;;  %1744 = vmatpush1.bf16.msra.mxu1 %v1761_v4  ;;  %v1809_v40 = vld [vmem:[%s2641_s0 + $0x190] ss:$8 sps:$4 sm:$0xff]   ;;  %v1810_v41 = vld [vmem:[%s2641_s0 + $0x64] ss:$8 sps:$4 sm:$0xff]   ;;  %v1814_v43 = vld [vmem:[%s2641_s0 + $0x60] ss:$8 sps:$4 sm:$0xff]  }
   0xf   :  { %638 = vmatprep.subr.bf16.mxu0 %v1894_v0  ;;  %1729 = vmatprep.subr.bf16.mxu1 %v1894_v0  ;;  %v1812_v42 = vld [vmem:[%s2641_s0 + $0x1a4] ss:$8 sps:$4 sm:$0xff]   ;;  %v1815_v44 = vld [vmem:[%s2641_s0 + $0x1a0] ss:$8 sps:$4 sm:$0xff]   ;;  %v1816_v45 = vld [vmem:[%s2641_s0 + $0x74] ss:$8 sps:$4 sm:$0xff]  }
  0x10   :  { %v1818_v46 = vld [vmem:[%s2641_s0 + $0x1b4] ss:$8 sps:$4 sm:$0xff]   ;;  %v1820_v47 = vld [vmem:[%s2641_s0 + $0x70] ss:$8 sps:$4 sm:$0xff]   ;;  %v1822_v49 = vld [vmem:[%s2641_s0 + $0x84] ss:$8 sps:$4 sm:$0xff]  }
  0x11   :  { %v1821_v48 = vld [vmem:[%s2641_s0 + $0x1b0] ss:$8 sps:$4 sm:$0xff]   ;;  %v1824_v50 = vld [vmem:[%s2641_s0 + $0x1c4] ss:$8 sps:$4 sm:$0xff]   ;;  %v1826_v51 = vld [vmem:[%s2641_s0 + $0x80] ss:$8 sps:$4 sm:$0xff]  }
  0x12   :  { %639 = vmatpush1.bf16.msra.mxu0 %v1762_v5  ;;  %1745 = vmatpush1.bf16.msra.mxu1 %v1762_v5  ;;  %v1827_v52 = vld [vmem:[%s2641_s0 + $0x1c0] ss:$8 sps:$4 sm:$0xff]   ;;  %v1828_v53 = vld [vmem:[%s2641_s0 + $0x94] ss:$8 sps:$4 sm:$0xff]   ;;  %v1832_v55 = vld [vmem:[%s2641_s0 + $0x90] ss:$8 sps:$4 sm:$0xff]  }
  0x13   :  { %640 = vmatprep.subr.bf16.mxu0 %v1894_v0  ;;  %1730 = vmatprep.subr.bf16.mxu1 %v1894_v0  ;;  %v1830_v54 = vld [vmem:[%s2641_s0 + $0x1d4] ss:$8 sps:$4 sm:$0xff]   ;;  %v1833_v56 = vld [vmem:[%s2641_s0 + $0x1d0] ss:$8 sps:$4 sm:$0xff]   ;;  %v1834_v57 = vld [vmem:[%s2641_s0 + $0xa4] ss:$8 sps:$4 sm:$0xff]  }
  0x14   :  { %v1836_v58 = vld [vmem:[%s2641_s0 + $0x1e4] ss:$8 sps:$4 sm:$0xff]   ;;  %v1838_v59 = vld [vmem:[%s2641_s0 + $0xa0] ss:$8 sps:$4 sm:$0xff]   ;;  %v1840_v61 = vld [vmem:[%s2641_s0 + $0xb4] ss:$8 sps:$4 sm:$0xff]  }
  0x15   :  { %v1839_v60 = vld [vmem:[%s2641_s0 + $0x1e0] ss:$8 sps:$4 sm:$0xff]   ;;  %v1842_v62 = vld [vmem:[%s2641_s0 + $0x1f4] ss:$8 sps:$4 sm:$0xff]   ;;  %v1844_v63 = vld [vmem:[%s2641_s0 + $0xb0] ss:$8 sps:$4 sm:$0xff]  }
  0x16   :  { %641 = vmatpush1.bf16.msra.mxu0 %v1763_v7  ;;  %1746 = vmatpush1.bf16.msra.mxu1 %v1763_v7  ;;  %v1846_v1 = vld [vmem:[%s2641_s0 + $0xc4] ss:$8 sps:$4 sm:$0xff]   ;;  %v1850_v3 = vld [vmem:[%s2641_s0 + $0xc0] ss:$8 sps:$4 sm:$0xff]   ;;  %v1852_v5 = vld [vmem:[%s2641_s0 + $0xd4] ss:$8 sps:$4 sm:$0xff]  }
  0x17   :  { %642 = vmatprep.subr.bf16.mxu0 %v1894_v0  ;;  %1731 = vmatprep.subr.bf16.mxu1 %v1894_v0  ;;  %v1848_v2 = vld [vmem:[%s2641_s0 + $0x204] ss:$8 sps:$4 sm:$0xff]   ;;  %v1851_v4 = vld [vmem:[%s2641_s0 + $0x200] ss:$8 sps:$4 sm:$0xff]   ;;  %v1854_v6 = vld [vmem:[%s2641_s0 + $0x214] ss:$8 sps:$4 sm:$0xff]  }
  0x18   :  { %v1856_v7 = vld [vmem:[%s2641_s0 + $0xd0] ss:$8 sps:$4 sm:$0xff]  }
  0x19   :  { %v1857_v8 = vld [vmem:[%s2641_s0 + $0x210] ss:$8 sps:$4 sm:$0xff]  }
  0x1a   :  { %643 = vmatpush1.bf16.msra.mxu0 %v1764_v9  ;;  %1747 = vmatpush1.bf16.msra.mxu1 %v1764_v9  ;;  %v1858_v9 = vld [vmem:[%s2641_s0 + $0xe4] ss:$8 sps:$4 sm:$0xff]  }
  0x1b   :  { %644 = vmatprep.subr.bf16.mxu0 %v1894_v0  ;;  %1732 = vmatprep.subr.bf16.mxu1 %v1894_v0 }
  0x1e   :  { %645 = vmatpush1.bf16.msra.mxu0 %v1765_v10  ;;  %1748 = vmatpush1.bf16.msra.mxu1 %v1765_v10  ;;  %v1860_v10 = vld [vmem:[%s2641_s0 + $0x224] ss:$8 sps:$4 sm:$0xff]  }
  0x1f   :  { %646 = vmatprep.subr.bf16.mxu0 %v1894_v0  ;;  %1733 = vmatprep.subr.bf16.mxu1 %v1894_v0 }
  0x22   :  { %647 = vmatpush2.bf16.msra.mxu0 %v1766_v11  ;;  %1749 = vmatpush2.bf16.msra.mxu1 %v1766_v11  ;;  %v1862_v11 = vld [vmem:[%s2641_s0 + $0xe0] ss:$8 sps:$4 sm:$0xff]  }
  0x23   :  { %648 = vmatprep.subr.bf16.mxu0 %v1894_v0  ;;  %1734 = vmatprep.subr.bf16.mxu1 %v1894_v0 }
  0x26   :  { %649 = vmatpush2.bf16.msra.mxu0 %v1767_v12  ;;  %1750 = vmatpush2.bf16.msra.mxu1 %v1767_v12  ;;  %v1863_v12 = vld [vmem:[%s2641_s0 + $0x220] ss:$8 sps:$4 sm:$0xff]  }
  0x27   :  { %650 = vmatprep.subr.bf16.mxu0 %v1894_v0  ;;  %1735 = vmatprep.subr.bf16.mxu1 %v1894_v0 }
  0x2a   :  { %651 = vmatpush2.bf16.msra.mxu0 %v1768_v13  ;;  %1751 = vmatpush2.bf16.msra.mxu1 %v1768_v13  ;;  %v1864_v13 = vld [vmem:[%s2641_s0 + $0xf4] ss:$8 sps:$4 sm:$0xff]  }
  0x2b   :  { %652 = vmatprep.subr.bf16.mxu0 %v1894_v0  ;;  %1736 = vmatprep.subr.bf16.mxu1 %v1894_v0 }
  0x2e   :  { %653 = vmatpush2.bf16.msra.mxu0 %v1769_v14  ;;  %1752 = vmatpush2.bf16.msra.mxu1 %v1769_v14  ;;  %v1866_v14 = vld [vmem:[%s2641_s0 + $0x234] ss:$8 sps:$4 sm:$0xff]  }
  0x2f   :  { %654 = vmatprep.subr.bf16.mxu0 %v1894_v0  ;;  %1737 = vmatprep.subr.bf16.mxu1 %v1894_v0 }
  0x32   :  { %655 = vmatpush2.bf16.msra.mxu0 %v1770_v15  ;;  %1753 = vmatpush2.bf16.msra.mxu1 %v1770_v15  ;;  %v1868_v15 = vld [vmem:[%s2641_s0 + $0xf0] ss:$8 sps:$4 sm:$0xff]  }
  0x33   :  { %656 = vmatprep.subr.bf16.mxu0 %v1894_v0  ;;  %1738 = vmatprep.subr.bf16.mxu1 %v1894_v0 }
  0x36   :  { %657 = vmatpush2.bf16.msra.mxu0 %v1771_v16  ;;  %1754 = vmatpush2.bf16.msra.mxu1 %v1771_v16  ;;  %v1869_v16 = vld [vmem:[%s2641_s0 + $0x230] ss:$8 sps:$4 sm:$0xff]  }
  0x37   :  { %658 = vmatprep.subr.bf16.mxu0 %v1894_v0  ;;  %1739 = vmatprep.subr.bf16.mxu1 %v1894_v0 }
  0x3a   :  { %659 = vmatpush2.bf16.msra.mxu0 %v1772_v17  ;;  %1755 = vmatpush2.bf16.msra.mxu1 %v1772_v17  ;;  %v1870_v17 = vld [vmem:[%s2641_s0 + $0x104] ss:$8 sps:$4 sm:$0xff]  }
  0x3b   :  { %660 = vmatprep.subr.bf16.mxu0 %v1894_v0  ;;  %1740 = vmatprep.subr.bf16.mxu1 %v1894_v0  ;;  %v1845_v0 = vld [vmem:[%s2641_s0 + $0x1f0] ss:$8 sps:$4 sm:$0xff]  }
  0x3e   :  { %661 = vmatpush2.bf16.msra.mxu0 %v1773_v18  ;;  %1756 = vmatpush2.bf16.msra.mxu1 %v1773_v18  ;;  %v1872_v18 = vld [vmem:[%s2641_s0 + $0x244] ss:$8 sps:$4 sm:$0xff]  }
  0x41   :  { %663 = vmatmul.mubr.bf16.vlgmr.msra.gmra.mxu0 %v1774_v19  ;;  %823 = vmatmul.mubr.bf16.vlgmr.msra.gmra.mxu1 %v1777_v20  ;;  %v1874_v19 = vld [vmem:[%s2641_s0 + $0x100] ss:$8 sps:$4 sm:$0xff]  }
  0x42   :  { %670 = vmatprep.mubr.bf16.mxu0 %v1780_v21  ;;  %830 = vmatprep.mubr.bf16.mxu1 %v1782_v22  ;;  %v1875_v20 = vld [vmem:[%s2641_s0 + $0x240] ss:$8 sps:$4 sm:$0xff]   ;;  %v1876_v21 = vld [vmem:[%s2641_s0 + $0x114] ss:$8 sps:$4 sm:$0xff]  }
  0x43   :  { %v1878_v22 = vld [vmem:[%s2641_s0 + $0x254] ss:$8 sps:$4 sm:$0xff]  }
  0x49   :  { %671 = vmatmul.mubr.bf16.gmra.mxu0 %v1784_v23  ;;  %831 = vmatmul.mubr.bf16.gmra.mxu1 %v1785_v24  ;;  %v1880_v23 = vld [vmem:[%s2641_s0 + $0x110] ss:$8 sps:$4 sm:$0xff]  }
  0x4a   :  { %678 = vmatprep.mubr.bf16.mxu0 %v1786_v25  ;;  %838 = vmatprep.mubr.bf16.mxu1 %v1788_v26  ;;  %v1881_v24 = vld [vmem:[%s2641_s0 + $0x250] ss:$8 sps:$4 sm:$0xff]   ;;  %v1882_v25 = vld [vmem:[%s2641_s0 + $0x124] ss:$8 sps:$4 sm:$0xff]  }
  0x4b   :  { %v1884_v26 = vld [vmem:[%s2641_s0 + $0x264] ss:$8 sps:$4 sm:$0xff]  }
  0x51   :  { %679 = vmatmul.mubr.bf16.gmra.mxu0 %v1790_v27  ;;  %839 = vmatmul.mubr.bf16.gmra.mxu1 %v1791_v28  ;;  %v1886_v27 = vld [vmem:[%s2641_s0 + $0x120] ss:$8 sps:$4 sm:$0xff]  }
  0x52   :  { %686 = vmatprep.mubr.bf16.mxu0 %v1792_v29  ;;  %846 = vmatprep.mubr.bf16.mxu1 %v1794_v30  ;;  %v1887_v28 = vld [vmem:[%s2641_s0 + $0x260] ss:$8 sps:$4 sm:$0xff]   ;;  %v1888_v29 = vld [vmem:[%s2641_s0 + $0x134] ss:$8 sps:$4 sm:$0xff]  }
  0x53   :  { %v1890_v30 = vld [vmem:[%s2641_s0 + $0x274] ss:$8 sps:$4 sm:$0xff]  }
  0x59   :  { %687 = vmatmul.mubr.bf16.gmra.mxu0 %v1796_v31  ;;  %847 = vmatmul.mubr.bf16.gmra.mxu1 %v1797_v32  ;;  %v1892_v31 = vld [vmem:[%s2641_s0 + $0x130] ss:$8 sps:$4 sm:$0xff]  }
  0x5a   :  { %694 = vmatprep.mubr.bf16.mxu0 %v1798_v33  ;;  %854 = vmatprep.mubr.bf16.mxu1 %v1800_v34  ;;  %v1893_v32 = vld [vmem:[%s2641_s0 + $0x270] ss:$8 sps:$4 sm:$0xff]   ;;  %v2238_v33 = vld [vmem:[%s2642_s2] ss:$0 sm:$0xff] }
  0x61   :  { %695 = vmatmul.mubr.bf16.gmra.mxu0 %v1802_v35  ;;  %855 = vmatmul.mubr.bf16.gmra.mxu1 %v1803_v36 }
  0x62   :  { %702 = vmatprep.mubr.bf16.mxu0 %v1804_v37  ;;  %862 = vmatprep.mubr.bf16.mxu1 %v1806_v38 }
  0x69   :  { %703 = vmatmul.mubr.bf16.gmra.mxu0 %v1808_v39  ;;  %863 = vmatmul.mubr.bf16.gmra.mxu1 %v1809_v40 }
  0x6a   :  { %710 = vmatprep.mubr.bf16.mxu0 %v1810_v41  ;;  %870 = vmatprep.mubr.bf16.mxu1 %v1812_v42 }
  0x71   :  { %711 = vmatmul.mubr.bf16.gmra.mxu0 %v1814_v43  ;;  %871 = vmatmul.mubr.bf16.gmra.mxu1 %v1815_v44 }
  0x72   :  { %718 = vmatprep.mubr.bf16.mxu0 %v1816_v45  ;;  %878 = vmatprep.mubr.bf16.mxu1 %v1818_v46 }
  0x79   :  { %719 = vmatmul.mubr.bf16.gmra.mxu0 %v1820_v47  ;;  %879 = vmatmul.mubr.bf16.gmra.mxu1 %v1821_v48 }
  0x7a   :  { %726 = vmatprep.mubr.bf16.mxu0 %v1822_v49  ;;  %886 = vmatprep.mubr.bf16.mxu1 %v1824_v50 }
  0x81   :  { %727 = vmatmul.mubr.bf16.gmra.mxu0 %v1826_v51  ;;  %887 = vmatmul.mubr.bf16.gmra.mxu1 %v1827_v52 }
  0x82   :  { %734 = vmatprep.mubr.bf16.mxu0 %v1828_v53  ;;  %894 = vmatprep.mubr.bf16.mxu1 %v1830_v54 }
  0x89   :  { %735 = vmatmul.mubr.bf16.gmra.mxu0 %v1832_v55  ;;  %895 = vmatmul.mubr.bf16.gmra.mxu1 %v1833_v56 }
  0x8a   :  { %742 = vmatprep.mubr.bf16.mxu0 %v1834_v57  ;;  %902 = vmatprep.mubr.bf16.mxu1 %v1836_v58 }
  0x91   :  { %743 = vmatmul.mubr.bf16.gmra.mxu0 %v1838_v59  ;;  %903 = vmatmul.mubr.bf16.gmra.mxu1 %v1839_v60 }
  0x92   :  { %750 = vmatprep.mubr.bf16.mxu0 %v1840_v61  ;;  %910 = vmatprep.mubr.bf16.mxu1 %v1842_v62 }
  0x99   :  { %751 = vmatmul.mubr.bf16.gmra.mxu0 %v1844_v63  ;;  %911 = vmatmul.mubr.bf16.gmra.mxu1 %v1845_v0 }
  0x9a   :  { %758 = vmatprep.mubr.bf16.mxu0 %v1846_v1  ;;  %918 = vmatprep.mubr.bf16.mxu1 %v1848_v2 }
  0xa1   :  { %759 = vmatmul.mubr.bf16.gmra.mxu0 %v1850_v3  ;;  %919 = vmatmul.mubr.bf16.gmra.mxu1 %v1851_v4 }
  0xa2   :  { %766 = vmatprep.mubr.bf16.mxu0 %v1852_v5  ;;  %926 = vmatprep.mubr.bf16.mxu1 %v1854_v6 }
  0xa9   :  { %767 = vmatmul.mubr.bf16.gmra.mxu0 %v1856_v7  ;;  %927 = vmatmul.mubr.bf16.gmra.mxu1 %v1857_v8 }
  0xaa   :  { %774 = vmatprep.mubr.bf16.mxu0 %v1858_v9  ;;  %934 = vmatprep.mubr.bf16.mxu1 %v1860_v10 }
  0xb1   :  { %775 = vmatmul.mubr.bf16.gmra.mxu0 %v1862_v11  ;;  %935 = vmatmul.mubr.bf16.gmra.mxu1 %v1863_v12 }
  0xb2   :  { %782 = vmatprep.mubr.bf16.mxu0 %v1864_v13  ;;  %942 = vmatprep.mubr.bf16.mxu1 %v1866_v14 }
  0xb9   :  { %783 = vmatmul.mubr.bf16.gmra.mxu0 %v1868_v15  ;;  %943 = vmatmul.mubr.bf16.gmra.mxu1 %v1869_v16 }
  0xba   :  { %790 = vmatprep.mubr.bf16.mxu0 %v1870_v17  ;;  %950 = vmatprep.mubr.bf16.mxu1 %v1872_v18 }
  0xc1   :  { %791 = vmatmul.mubr.bf16.gmra.mxu0 %v1874_v19  ;;  %951 = vmatmul.mubr.bf16.gmra.mxu1 %v1875_v20 }
  0xc2   :  { %798 = vmatprep.mubr.bf16.mxu0 %v1876_v21  ;;  %958 = vmatprep.mubr.bf16.mxu1 %v1878_v22 }
  0xc9   :  { %799 = vmatmul.mubr.bf16.gmra.mxu0 %v1880_v23  ;;  %959 = vmatmul.mubr.bf16.gmra.mxu1 %v1881_v24 }
  0xca   :  { %806 = vmatprep.mubr.bf16.mxu0 %v1882_v25  ;;  %966 = vmatprep.mubr.bf16.mxu1 %v1884_v26 }
  0xd1   :  { %807 = vmatmul.mubr.bf16.gmra.mxu0 %v1886_v27  ;;  %967 = vmatmul.mubr.bf16.gmra.mxu1 %v1887_v28 }
  0xd2   :  { %814 = vmatprep.mubr.bf16.mxu0 %v1888_v29  ;;  %974 = vmatprep.mubr.bf16.mxu1 %v1890_v30 }
  0xd9   :  { %815 = vmatmul.mubr.bf16.gmra.mxu0 %v1892_v31  ;;  %975 = vmatmul.mubr.bf16.gmra.mxu1 %v1893_v32 }
 0x101   :  { %v664_v34 = vpop.f32.mrf.mxu0  ;;  %v824_v35 = vpop.f32.mrf.mxu1 }
 0x102   :  { %v665_v36 = vadd.f32 %v2238_v33, %v664_v34  ;;  %v825_v37 = vadd.f32 %v2238_v33, %v824_v35 }
 0x103   :  { %v666_v38 = vpop.f32.mrf.mxu0  ;;  %v826_v39 = vpop.f32.mrf.mxu1 }
 0x104   :  { %v983_v40 = vmax.f32 %v665_v36, 0.0  ;;  %v1023_v41 = vmax.f32 %v825_v37, 0.0 }
 0x105   :  { %v667_v42 = vpop.f32.mrf.mxu0  ;;  %v827_v43 = vpop.f32.mrf.mxu1 }
 0x106   :  { %v1645_v44 = vpack.c.bf16 %v983_v40, %v983_v40  ;;  %v1685_v45 = vpack.c.bf16 %v1023_v41, %v1023_v41  ;;  %v668_v46 = vadd.f32 %v2238_v33, %v667_v42  ;;  %v828_v47 = vadd.f32 %v2238_v33, %v827_v43 }
 0x107   :  { %v669_v48 = vpop.f32.mrf.mxu0  ;;  %v829_v49 = vpop.f32.mrf.mxu1 }
 0x108   :  { %1384 = vst.msk [vmem:[%s2643_s3] sm:$0xf] %vm1383_vm0, %v1645_v44  ;;  %1424 = vst.msk [vmem:[%s2643_s3 + $0xa0] sm:$0xf] %vm1383_vm0, %v1685_v45  ;;  %v984_v50 = vmax.f32 %v668_v46, 0.0  ;;  %v1024_v51 = vmax.f32 %v828_v47, 0.0 }
 0x109   :  { %v672_v52 = vpop.f32.mrf.mxu0  ;;  %v832_v53 = vpop.f32.mrf.mxu1 }
 0x10a   :  { %v1646_v54 = vpack.c.bf16 %v984_v50, %v984_v50  ;;  %v1686_v55 = vpack.c.bf16 %v1024_v51, %v1024_v51  ;;  %v673_v56 = vadd.f32 %v2238_v33, %v672_v52  ;;  %v833_v57 = vadd.f32 %v2238_v33, %v832_v53 }
 0x10b   :  { %v674_v58 = vpop.f32.mrf.mxu0  ;;  %v834_v59 = vpop.f32.mrf.mxu1 }
 0x10c   :  { %1385 = vst.msk [vmem:[%s2643_s3 + $0x4] sm:$0xf] %vm1383_vm0, %v1646_v54  ;;  %1425 = vst.msk [vmem:[%s2643_s3 + $0xa4] sm:$0xf] %vm1383_vm0, %v1686_v55  ;;  %v985_v60 = vmax.f32 %v673_v56, 0.0  ;;  %v1025_v61 = vmax.f32 %v833_v57, 0.0 }
 0x10d   :  { %v675_v62 = vpop.f32.mrf.mxu0  ;;  %v835_v63 = vpop.f32.mrf.mxu1 }
 0x10e   :  { %v1647_v0 = vpack.c.bf16 %v985_v60, %v985_v60  ;;  %v1687_v1 = vpack.c.bf16 %v1025_v61, %v1025_v61  ;;  %v676_v2 = vadd.f32 %v2238_v33, %v675_v62  ;;  %v836_v3 = vadd.f32 %v2238_v33, %v835_v63 }
 0x10f   :  { %v677_v4 = vpop.f32.mrf.mxu0  ;;  %v837_v5 = vpop.f32.mrf.mxu1 }
 0x110   :  { %1386 = vst.msk [vmem:[%s2643_s3 + $0x8] sm:$0xf] %vm1383_vm0, %v1647_v0  ;;  %1426 = vst.msk [vmem:[%s2643_s3 + $0xa8] sm:$0xf] %vm1383_vm0, %v1687_v1  ;;  %v986_v6 = vmax.f32 %v676_v2, 0.0  ;;  %v1026_v7 = vmax.f32 %v836_v3, 0.0 }
 0x111   :  { %v680_v8 = vpop.f32.mrf.mxu0  ;;  %v840_v9 = vpop.f32.mrf.mxu1 }
 0x112   :  { %v1648_v10 = vpack.c.bf16 %v986_v6, %v986_v6  ;;  %v1688_v11 = vpack.c.bf16 %v1026_v7, %v1026_v7  ;;  %v681_v12 = vadd.f32 %v2238_v33, %v680_v8  ;;  %v841_v13 = vadd.f32 %v2238_v33, %v840_v9 }
 0x113   :  { %v682_v14 = vpop.f32.mrf.mxu0  ;;  %v842_v15 = vpop.f32.mrf.mxu1 }
 0x114   :  { %1387 = vst.msk [vmem:[%s2643_s3 + $0xc] sm:$0xf] %vm1383_vm0, %v1648_v10  ;;  %1427 = vst.msk [vmem:[%s2643_s3 + $0xac] sm:$0xf] %vm1383_vm0, %v1688_v11  ;;  %v987_v16 = vmax.f32 %v681_v12, 0.0  ;;  %v1027_v17 = vmax.f32 %v841_v13, 0.0 }
 0x115   :  { %v683_v18 = vpop.f32.mrf.mxu0  ;;  %v843_v19 = vpop.f32.mrf.mxu1 }
 0x116   :  { %v1649_v20 = vpack.c.bf16 %v987_v16, %v987_v16  ;;  %v1689_v21 = vpack.c.bf16 %v1027_v17, %v1027_v17  ;;  %v684_v22 = vadd.f32 %v2238_v33, %v683_v18  ;;  %v844_v23 = vadd.f32 %v2238_v33, %v843_v19 }
 0x117   :  { %v685_v24 = vpop.f32.mrf.mxu0  ;;  %v845_v25 = vpop.f32.mrf.mxu1 }
 0x118   :  { %1388 = vst.msk [vmem:[%s2643_s3 + $0x10] sm:$0xf] %vm1383_vm0, %v1649_v20  ;;  %1428 = vst.msk [vmem:[%s2643_s3 + $0xb0] sm:$0xf] %vm1383_vm0, %v1689_v21  ;;  %v988_v26 = vmax.f32 %v684_v22, 0.0  ;;  %v1028_v27 = vmax.f32 %v844_v23, 0.0 }
 0x119   :  { %v688_v28 = vpop.f32.mrf.mxu0  ;;  %v848_v29 = vpop.f32.mrf.mxu1 }
 0x11a   :  { %v1650_v30 = vpack.c.bf16 %v988_v26, %v988_v26  ;;  %v1690_v31 = vpack.c.bf16 %v1028_v27, %v1028_v27  ;;  %v689_v32 = vadd.f32 %v2238_v33, %v688_v28  ;;  %v849_v34 = vadd.f32 %v2238_v33, %v848_v29 }
 0x11b   :  { %v690_v35 = vpop.f32.mrf.mxu0  ;;  %v850_v36 = vpop.f32.mrf.mxu1 }
 0x11c   :  { %1389 = vst.msk [vmem:[%s2643_s3 + $0x14] sm:$0xf] %vm1383_vm0, %v1650_v30  ;;  %1429 = vst.msk [vmem:[%s2643_s3 + $0xb4] sm:$0xf] %vm1383_vm0, %v1690_v31  ;;  %v989_v37 = vmax.f32 %v689_v32, 0.0  ;;  %v1029_v38 = vmax.f32 %v849_v34, 0.0 }
 0x11d   :  { %v691_v39 = vpop.f32.mrf.mxu0  ;;  %v851_v40 = vpop.f32.mrf.mxu1 }
 0x11e   :  { %v1651_v41 = vpack.c.bf16 %v989_v37, %v989_v37  ;;  %v1691_v42 = vpack.c.bf16 %v1029_v38, %v1029_v38  ;;  %v692_v43 = vadd.f32 %v2238_v33, %v691_v39  ;;  %v852_v44 = vadd.f32 %v2238_v33, %v851_v40 }
 0x11f   :  { %v693_v45 = vpop.f32.mrf.mxu0  ;;  %v853_v46 = vpop.f32.mrf.mxu1 }
 0x120   :  { %1390 = vst.msk [vmem:[%s2643_s3 + $0x18] sm:$0xf] %vm1383_vm0, %v1651_v41  ;;  %1430 = vst.msk [vmem:[%s2643_s3 + $0xb8] sm:$0xf] %vm1383_vm0, %v1691_v42  ;;  %v990_v47 = vmax.f32 %v692_v43, 0.0  ;;  %v1030_v48 = vmax.f32 %v852_v44, 0.0 }
 0x121   :  { %v696_v49 = vpop.f32.mrf.mxu0  ;;  %v856_v50 = vpop.f32.mrf.mxu1 }
 0x122   :  { %v1652_v51 = vpack.c.bf16 %v990_v47, %v990_v47  ;;  %v1692_v52 = vpack.c.bf16 %v1030_v48, %v1030_v48  ;;  %v697_v53 = vadd.f32 %v2238_v33, %v696_v49  ;;  %v857_v54 = vadd.f32 %v2238_v33, %v856_v50 }
 0x123   :  { %v698_v55 = vpop.f32.mrf.mxu0  ;;  %v858_v56 = vpop.f32.mrf.mxu1 }
 0x124   :  { %1391 = vst.msk [vmem:[%s2643_s3 + $0x1c] sm:$0xf] %vm1383_vm0, %v1652_v51  ;;  %1431 = vst.msk [vmem:[%s2643_s3 + $0xbc] sm:$0xf] %vm1383_vm0, %v1692_v52  ;;  %v991_v57 = vmax.f32 %v697_v53, 0.0  ;;  %v1031_v58 = vmax.f32 %v857_v54, 0.0 }
 0x125   :  { %v699_v59 = vpop.f32.mrf.mxu0  ;;  %v859_v60 = vpop.f32.mrf.mxu1 }
 0x126   :  { %v1653_v61 = vpack.c.bf16 %v991_v57, %v991_v57  ;;  %v1693_v62 = vpack.c.bf16 %v1031_v58, %v1031_v58  ;;  %v700_v63 = vadd.f32 %v2238_v33, %v699_v59  ;;  %v860_v0 = vadd.f32 %v2238_v33, %v859_v60 }
 0x127   :  { %v701_v1 = vpop.f32.mrf.mxu0  ;;  %v861_v2 = vpop.f32.mrf.mxu1 }
 0x128   :  { %1392 = vst.msk [vmem:[%s2643_s3 + $0x20] sm:$0xf] %vm1383_vm0, %v1653_v61  ;;  %1432 = vst.msk [vmem:[%s2643_s3 + $0xc0] sm:$0xf] %vm1383_vm0, %v1693_v62  ;;  %v992_v3 = vmax.f32 %v700_v63, 0.0  ;;  %v1032_v4 = vmax.f32 %v860_v0, 0.0 }
 0x129   :  { %v704_v5 = vpop.f32.mrf.mxu0  ;;  %v864_v6 = vpop.f32.mrf.mxu1 }
 0x12a   :  { %v1654_v7 = vpack.c.bf16 %v992_v3, %v992_v3  ;;  %v1694_v8 = vpack.c.bf16 %v1032_v4, %v1032_v4  ;;  %v705_v9 = vadd.f32 %v2238_v33, %v704_v5  ;;  %v865_v10 = vadd.f32 %v2238_v33, %v864_v6 }
 0x12b   :  { %v706_v11 = vpop.f32.mrf.mxu0  ;;  %v866_v12 = vpop.f32.mrf.mxu1 }
 0x12c   :  { %1393 = vst.msk [vmem:[%s2643_s3 + $0x24] sm:$0xf] %vm1383_vm0, %v1654_v7  ;;  %1433 = vst.msk [vmem:[%s2643_s3 + $0xc4] sm:$0xf] %vm1383_vm0, %v1694_v8  ;;  %v993_v13 = vmax.f32 %v705_v9, 0.0  ;;  %v1033_v14 = vmax.f32 %v865_v10, 0.0 }
 0x12d   :  { %v707_v15 = vpop.f32.mrf.mxu0  ;;  %v867_v16 = vpop.f32.mrf.mxu1 }
 0x12e   :  { %v1655_v17 = vpack.c.bf16 %v993_v13, %v993_v13  ;;  %v1695_v18 = vpack.c.bf16 %v1033_v14, %v1033_v14  ;;  %v708_v19 = vadd.f32 %v2238_v33, %v707_v15  ;;  %v868_v20 = vadd.f32 %v2238_v33, %v867_v16 }
 0x12f   :  { %v709_v21 = vpop.f32.mrf.mxu0  ;;  %v869_v22 = vpop.f32.mrf.mxu1 }
 0x130   :  { %1394 = vst.msk [vmem:[%s2643_s3 + $0x28] sm:$0xf] %vm1383_vm0, %v1655_v17  ;;  %1434 = vst.msk [vmem:[%s2643_s3 + $0xc8] sm:$0xf] %vm1383_vm0, %v1695_v18  ;;  %v994_v23 = vmax.f32 %v708_v19, 0.0  ;;  %v1034_v24 = vmax.f32 %v868_v20, 0.0 }
 0x131   :  { %v712_v25 = vpop.f32.mrf.mxu0  ;;  %v872_v26 = vpop.f32.mrf.mxu1 }
 0x132   :  { %v1656_v27 = vpack.c.bf16 %v994_v23, %v994_v23  ;;  %v1696_v28 = vpack.c.bf16 %v1034_v24, %v1034_v24  ;;  %v713_v29 = vadd.f32 %v2238_v33, %v712_v25  ;;  %v873_v30 = vadd.f32 %v2238_v33, %v872_v26 }
 0x133   :  { %v714_v31 = vpop.f32.mrf.mxu0  ;;  %v874_v32 = vpop.f32.mrf.mxu1 }
 0x134   :  { %1395 = vst.msk [vmem:[%s2643_s3 + $0x2c] sm:$0xf] %vm1383_vm0, %v1656_v27  ;;  %1435 = vst.msk [vmem:[%s2643_s3 + $0xcc] sm:$0xf] %vm1383_vm0, %v1696_v28  ;;  %v995_v34 = vmax.f32 %v713_v29, 0.0  ;;  %v1035_v35 = vmax.f32 %v873_v30, 0.0 }
 0x135   :  { %v715_v36 = vpop.f32.mrf.mxu0  ;;  %v875_v37 = vpop.f32.mrf.mxu1 }
 0x136   :  { %v1657_v38 = vpack.c.bf16 %v995_v34, %v995_v34  ;;  %v1697_v39 = vpack.c.bf16 %v1035_v35, %v1035_v35  ;;  %v716_v40 = vadd.f32 %v2238_v33, %v715_v36  ;;  %v876_v41 = vadd.f32 %v2238_v33, %v875_v37 }
 0x137   :  { %v717_v42 = vpop.f32.mrf.mxu0  ;;  %v877_v43 = vpop.f32.mrf.mxu1 }
 0x138   :  { %1396 = vst.msk [vmem:[%s2643_s3 + $0x30] sm:$0xf] %vm1383_vm0, %v1657_v38  ;;  %1436 = vst.msk [vmem:[%s2643_s3 + $0xd0] sm:$0xf] %vm1383_vm0, %v1697_v39  ;;  %v996_v44 = vmax.f32 %v716_v40, 0.0  ;;  %v1036_v45 = vmax.f32 %v876_v41, 0.0 }
 0x139   :  { %v720_v46 = vpop.f32.mrf.mxu0  ;;  %v880_v47 = vpop.f32.mrf.mxu1 }
 0x13a   :  { %v1658_v48 = vpack.c.bf16 %v996_v44, %v996_v44  ;;  %v1698_v49 = vpack.c.bf16 %v1036_v45, %v1036_v45  ;;  %v721_v50 = vadd.f32 %v2238_v33, %v720_v46  ;;  %v881_v51 = vadd.f32 %v2238_v33, %v880_v47 }
 0x13b   :  { %v722_v52 = vpop.f32.mrf.mxu0  ;;  %v882_v53 = vpop.f32.mrf.mxu1 }
 0x13c   :  { %1397 = vst.msk [vmem:[%s2643_s3 + $0x34] sm:$0xf] %vm1383_vm0, %v1658_v48  ;;  %1437 = vst.msk [vmem:[%s2643_s3 + $0xd4] sm:$0xf] %vm1383_vm0, %v1698_v49  ;;  %v997_v54 = vmax.f32 %v721_v50, 0.0  ;;  %v1037_v55 = vmax.f32 %v881_v51, 0.0 }
 0x13d   :  { %v723_v56 = vpop.f32.mrf.mxu0  ;;  %v883_v57 = vpop.f32.mrf.mxu1 }
 0x13e   :  { %v1659_v58 = vpack.c.bf16 %v997_v54, %v997_v54  ;;  %v1699_v59 = vpack.c.bf16 %v1037_v55, %v1037_v55  ;;  %v724_v60 = vadd.f32 %v2238_v33, %v723_v56  ;;  %v884_v61 = vadd.f32 %v2238_v33, %v883_v57 }
 0x13f   :  { %v725_v62 = vpop.f32.mrf.mxu0  ;;  %v885_v63 = vpop.f32.mrf.mxu1 }
 0x140   :  { %1398 = vst.msk [vmem:[%s2643_s3 + $0x38] sm:$0xf] %vm1383_vm0, %v1659_v58  ;;  %1438 = vst.msk [vmem:[%s2643_s3 + $0xd8] sm:$0xf] %vm1383_vm0, %v1699_v59  ;;  %v998_v0 = vmax.f32 %v724_v60, 0.0  ;;  %v1038_v1 = vmax.f32 %v884_v61, 0.0 }
 0x141   :  { %v728_v2 = vpop.f32.mrf.mxu0  ;;  %v888_v3 = vpop.f32.mrf.mxu1 }
 0x142   :  { %v1660_v4 = vpack.c.bf16 %v998_v0, %v998_v0  ;;  %v1700_v5 = vpack.c.bf16 %v1038_v1, %v1038_v1  ;;  %v729_v6 = vadd.f32 %v2238_v33, %v728_v2  ;;  %v889_v7 = vadd.f32 %v2238_v33, %v888_v3 }
 0x143   :  { %v730_v8 = vpop.f32.mrf.mxu0  ;;  %v890_v9 = vpop.f32.mrf.mxu1 }
 0x144   :  { %1399 = vst.msk [vmem:[%s2643_s3 + $0x3c] sm:$0xf] %vm1383_vm0, %v1660_v4  ;;  %1439 = vst.msk [vmem:[%s2643_s3 + $0xdc] sm:$0xf] %vm1383_vm0, %v1700_v5  ;;  %v999_v10 = vmax.f32 %v729_v6, 0.0  ;;  %v1039_v11 = vmax.f32 %v889_v7, 0.0 }
 0x145   :  { %v731_v12 = vpop.f32.mrf.mxu0  ;;  %v891_v13 = vpop.f32.mrf.mxu1 }
 0x146   :  { %v1661_v14 = vpack.c.bf16 %v999_v10, %v999_v10  ;;  %v1701_v15 = vpack.c.bf16 %v1039_v11, %v1039_v11  ;;  %v732_v16 = vadd.f32 %v2238_v33, %v731_v12  ;;  %v892_v17 = vadd.f32 %v2238_v33, %v891_v13 }
 0x147   :  { %v733_v18 = vpop.f32.mrf.mxu0  ;;  %v893_v19 = vpop.f32.mrf.mxu1 }
 0x148   :  { %1400 = vst.msk [vmem:[%s2643_s3 + $0x40] sm:$0xf] %vm1383_vm0, %v1661_v14  ;;  %1440 = vst.msk [vmem:[%s2643_s3 + $0xe0] sm:$0xf] %vm1383_vm0, %v1701_v15  ;;  %v1000_v20 = vmax.f32 %v732_v16, 0.0  ;;  %v1040_v21 = vmax.f32 %v892_v17, 0.0 }
 0x149   :  { %v736_v22 = vpop.f32.mrf.mxu0  ;;  %v896_v23 = vpop.f32.mrf.mxu1 }
 0x14a   :  { %v1662_v24 = vpack.c.bf16 %v1000_v20, %v1000_v20  ;;  %v1702_v25 = vpack.c.bf16 %v1040_v21, %v1040_v21  ;;  %v737_v26 = vadd.f32 %v2238_v33, %v736_v22  ;;  %v897_v27 = vadd.f32 %v2238_v33, %v896_v23 }
 0x14b   :  { %v738_v28 = vpop.f32.mrf.mxu0  ;;  %v898_v29 = vpop.f32.mrf.mxu1 }
 0x14c   :  { %1401 = vst.msk [vmem:[%s2643_s3 + $0x44] sm:$0xf] %vm1383_vm0, %v1662_v24  ;;  %1441 = vst.msk [vmem:[%s2643_s3 + $0xe4] sm:$0xf] %vm1383_vm0, %v1702_v25  ;;  %v1001_v30 = vmax.f32 %v737_v26, 0.0  ;;  %v1041_v31 = vmax.f32 %v897_v27, 0.0 }
 0x14d   :  { %v739_v32 = vpop.f32.mrf.mxu0  ;;  %v899_v34 = vpop.f32.mrf.mxu1 }
 0x14e   :  { %v1663_v35 = vpack.c.bf16 %v1001_v30, %v1001_v30  ;;  %v1703_v36 = vpack.c.bf16 %v1041_v31, %v1041_v31  ;;  %v740_v37 = vadd.f32 %v2238_v33, %v739_v32  ;;  %v900_v38 = vadd.f32 %v2238_v33, %v899_v34 }
 0x14f   :  { %v741_v39 = vpop.f32.mrf.mxu0  ;;  %v901_v40 = vpop.f32.mrf.mxu1 }
 0x150   :  { %1402 = vst.msk [vmem:[%s2643_s3 + $0x48] sm:$0xf] %vm1383_vm0, %v1663_v35  ;;  %1442 = vst.msk [vmem:[%s2643_s3 + $0xe8] sm:$0xf] %vm1383_vm0, %v1703_v36  ;;  %v1002_v41 = vmax.f32 %v740_v37, 0.0  ;;  %v1042_v42 = vmax.f32 %v900_v38, 0.0 }
 0x151   :  { %v744_v43 = vpop.f32.mrf.mxu0  ;;  %v904_v44 = vpop.f32.mrf.mxu1 }
 0x152   :  { %v1664_v45 = vpack.c.bf16 %v1002_v41, %v1002_v41  ;;  %v1704_v46 = vpack.c.bf16 %v1042_v42, %v1042_v42  ;;  %v745_v47 = vadd.f32 %v2238_v33, %v744_v43  ;;  %v905_v48 = vadd.f32 %v2238_v33, %v904_v44 }
 0x153   :  { %v746_v49 = vpop.f32.mrf.mxu0  ;;  %v906_v50 = vpop.f32.mrf.mxu1 }
 0x154   :  { %1403 = vst.msk [vmem:[%s2643_s3 + $0x4c] sm:$0xf] %vm1383_vm0, %v1664_v45  ;;  %1443 = vst.msk [vmem:[%s2643_s3 + $0xec] sm:$0xf] %vm1383_vm0, %v1704_v46  ;;  %v1003_v51 = vmax.f32 %v745_v47, 0.0  ;;  %v1043_v52 = vmax.f32 %v905_v48, 0.0 }
 0x155   :  { %v747_v53 = vpop.f32.mrf.mxu0  ;;  %v907_v54 = vpop.f32.mrf.mxu1 }
 0x156   :  { %v1665_v55 = vpack.c.bf16 %v1003_v51, %v1003_v51  ;;  %v1705_v56 = vpack.c.bf16 %v1043_v52, %v1043_v52  ;;  %v748_v57 = vadd.f32 %v2238_v33, %v747_v53  ;;  %v908_v58 = vadd.f32 %v2238_v33, %v907_v54 }
 0x157   :  { %v749_v59 = vpop.f32.mrf.mxu0  ;;  %v909_v60 = vpop.f32.mrf.mxu1 }
 0x158   :  { %1404 = vst.msk [vmem:[%s2643_s3 + $0x50] sm:$0xf] %vm1383_vm0, %v1665_v55  ;;  %1444 = vst.msk [vmem:[%s2643_s3 + $0xf0] sm:$0xf] %vm1383_vm0, %v1705_v56  ;;  %v1004_v61 = vmax.f32 %v748_v57, 0.0  ;;  %v1044_v62 = vmax.f32 %v908_v58, 0.0 }
 0x159   :  { %v752_v63 = vpop.f32.mrf.mxu0  ;;  %v912_v0 = vpop.f32.mrf.mxu1 }
 0x15a   :  { %v1666_v1 = vpack.c.bf16 %v1004_v61, %v1004_v61  ;;  %v1706_v2 = vpack.c.bf16 %v1044_v62, %v1044_v62  ;;  %v753_v3 = vadd.f32 %v2238_v33, %v752_v63  ;;  %v913_v4 = vadd.f32 %v2238_v33, %v912_v0 }
 0x15b   :  { %v754_v5 = vpop.f32.mrf.mxu0  ;;  %v914_v6 = vpop.f32.mrf.mxu1 }
 0x15c   :  { %1405 = vst.msk [vmem:[%s2643_s3 + $0x54] sm:$0xf] %vm1383_vm0, %v1666_v1  ;;  %1445 = vst.msk [vmem:[%s2643_s3 + $0xf4] sm:$0xf] %vm1383_vm0, %v1706_v2  ;;  %v1005_v7 = vmax.f32 %v753_v3, 0.0  ;;  %v1045_v8 = vmax.f32 %v913_v4, 0.0 }
 0x15d   :  { %v755_v9 = vpop.f32.mrf.mxu0  ;;  %v915_v10 = vpop.f32.mrf.mxu1 }
 0x15e   :  { %v1667_v11 = vpack.c.bf16 %v1005_v7, %v1005_v7  ;;  %v1707_v12 = vpack.c.bf16 %v1045_v8, %v1045_v8  ;;  %v756_v13 = vadd.f32 %v2238_v33, %v755_v9  ;;  %v916_v14 = vadd.f32 %v2238_v33, %v915_v10 }
 0x15f   :  { %v757_v15 = vpop.f32.mrf.mxu0  ;;  %v917_v16 = vpop.f32.mrf.mxu1 }
 0x160   :  { %1406 = vst.msk [vmem:[%s2643_s3 + $0x58] sm:$0xf] %vm1383_vm0, %v1667_v11  ;;  %1446 = vst.msk [vmem:[%s2643_s3 + $0xf8] sm:$0xf] %vm1383_vm0, %v1707_v12  ;;  %v1006_v17 = vmax.f32 %v756_v13, 0.0  ;;  %v1046_v18 = vmax.f32 %v916_v14, 0.0 }
 0x161   :  { %v760_v19 = vpop.f32.mrf.mxu0  ;;  %v920_v20 = vpop.f32.mrf.mxu1 }
 0x162   :  { %v1668_v21 = vpack.c.bf16 %v1006_v17, %v1006_v17  ;;  %v1708_v22 = vpack.c.bf16 %v1046_v18, %v1046_v18  ;;  %v761_v23 = vadd.f32 %v2238_v33, %v760_v19  ;;  %v921_v24 = vadd.f32 %v2238_v33, %v920_v20 }
 0x163   :  { %v762_v25 = vpop.f32.mrf.mxu0  ;;  %v922_v26 = vpop.f32.mrf.mxu1 }
 0x164   :  { %1407 = vst.msk [vmem:[%s2643_s3 + $0x5c] sm:$0xf] %vm1383_vm0, %v1668_v21  ;;  %1447 = vst.msk [vmem:[%s2643_s3 + $0xfc] sm:$0xf] %vm1383_vm0, %v1708_v22  ;;  %v1007_v27 = vmax.f32 %v761_v23, 0.0  ;;  %v1047_v28 = vmax.f32 %v921_v24, 0.0 }
 0x165   :  { %v763_v29 = vpop.f32.mrf.mxu0  ;;  %v923_v30 = vpop.f32.mrf.mxu1 }
 0x166   :  { %v1669_v31 = vpack.c.bf16 %v1007_v27, %v1007_v27  ;;  %v1709_v32 = vpack.c.bf16 %v1047_v28, %v1047_v28  ;;  %v764_v34 = vadd.f32 %v2238_v33, %v763_v29  ;;  %v924_v35 = vadd.f32 %v2238_v33, %v923_v30 }
 0x167   :  { %v765_v36 = vpop.f32.mrf.mxu0  ;;  %v925_v37 = vpop.f32.mrf.mxu1 }
 0x168   :  { %1408 = vst.msk [vmem:[%s2643_s3 + $0x60] sm:$0xf] %vm1383_vm0, %v1669_v31  ;;  %1448 = vst.msk [vmem:[%s2643_s3 + $0x100] sm:$0xf] %vm1383_vm0, %v1709_v32  ;;  %v1008_v38 = vmax.f32 %v764_v34, 0.0  ;;  %v1048_v39 = vmax.f32 %v924_v35, 0.0 }
 0x169   :  { %v768_v40 = vpop.f32.mrf.mxu0  ;;  %v928_v41 = vpop.f32.mrf.mxu1 }
 0x16a   :  { %v1670_v42 = vpack.c.bf16 %v1008_v38, %v1008_v38  ;;  %v1710_v43 = vpack.c.bf16 %v1048_v39, %v1048_v39  ;;  %v769_v44 = vadd.f32 %v2238_v33, %v768_v40  ;;  %v929_v45 = vadd.f32 %v2238_v33, %v928_v41 }
 0x16b   :  { %v770_v46 = vpop.f32.mrf.mxu0  ;;  %v930_v47 = vpop.f32.mrf.mxu1 }
 0x16c   :  { %1409 = vst.msk [vmem:[%s2643_s3 + $0x64] sm:$0xf] %vm1383_vm0, %v1670_v42  ;;  %1449 = vst.msk [vmem:[%s2643_s3 + $0x104] sm:$0xf] %vm1383_vm0, %v1710_v43  ;;  %v1009_v48 = vmax.f32 %v769_v44, 0.0  ;;  %v1049_v49 = vmax.f32 %v929_v45, 0.0 }
 0x16d   :  { %v771_v50 = vpop.f32.mrf.mxu0  ;;  %v931_v51 = vpop.f32.mrf.mxu1 }
 0x16e   :  { %v1671_v52 = vpack.c.bf16 %v1009_v48, %v1009_v48  ;;  %v1711_v53 = vpack.c.bf16 %v1049_v49, %v1049_v49  ;;  %v772_v54 = vadd.f32 %v2238_v33, %v771_v50  ;;  %v932_v55 = vadd.f32 %v2238_v33, %v931_v51 }
 0x16f   :  { %v773_v56 = vpop.f32.mrf.mxu0  ;;  %v933_v57 = vpop.f32.mrf.mxu1 }
 0x170   :  { %1410 = vst.msk [vmem:[%s2643_s3 + $0x68] sm:$0xf] %vm1383_vm0, %v1671_v52  ;;  %1450 = vst.msk [vmem:[%s2643_s3 + $0x108] sm:$0xf] %vm1383_vm0, %v1711_v53  ;;  %v1010_v58 = vmax.f32 %v772_v54, 0.0  ;;  %v1050_v59 = vmax.f32 %v932_v55, 0.0 }
 0x171   :  { %v776_v60 = vpop.f32.mrf.mxu0  ;;  %v936_v61 = vpop.f32.mrf.mxu1 }
 0x172   :  { %v1672_v62 = vpack.c.bf16 %v1010_v58, %v1010_v58  ;;  %v1712_v63 = vpack.c.bf16 %v1050_v59, %v1050_v59  ;;  %v777_v0 = vadd.f32 %v2238_v33, %v776_v60  ;;  %v937_v1 = vadd.f32 %v2238_v33, %v936_v61 }
 0x173   :  { %v778_v2 = vpop.f32.mrf.mxu0  ;;  %v938_v3 = vpop.f32.mrf.mxu1 }
 0x174   :  { %1411 = vst.msk [vmem:[%s2643_s3 + $0x6c] sm:$0xf] %vm1383_vm0, %v1672_v62  ;;  %1451 = vst.msk [vmem:[%s2643_s3 + $0x10c] sm:$0xf] %vm1383_vm0, %v1712_v63  ;;  %v1011_v4 = vmax.f32 %v777_v0, 0.0  ;;  %v1051_v5 = vmax.f32 %v937_v1, 0.0 }
 0x175   :  { %v779_v6 = vpop.f32.mrf.mxu0  ;;  %v939_v7 = vpop.f32.mrf.mxu1 }
 0x176   :  { %v1673_v8 = vpack.c.bf16 %v1011_v4, %v1011_v4  ;;  %v1713_v9 = vpack.c.bf16 %v1051_v5, %v1051_v5  ;;  %v780_v10 = vadd.f32 %v2238_v33, %v779_v6  ;;  %v940_v11 = vadd.f32 %v2238_v33, %v939_v7 }
 0x177   :  { %v781_v12 = vpop.f32.mrf.mxu0  ;;  %v941_v13 = vpop.f32.mrf.mxu1 }
 0x178   :  { %1412 = vst.msk [vmem:[%s2643_s3 + $0x70] sm:$0xf] %vm1383_vm0, %v1673_v8  ;;  %1452 = vst.msk [vmem:[%s2643_s3 + $0x110] sm:$0xf] %vm1383_vm0, %v1713_v9  ;;  %v1012_v14 = vmax.f32 %v780_v10, 0.0  ;;  %v1052_v15 = vmax.f32 %v940_v11, 0.0 }
 0x179   :  { %v784_v16 = vpop.f32.mrf.mxu0  ;;  %v944_v17 = vpop.f32.mrf.mxu1 }
 0x17a   :  { %v1674_v18 = vpack.c.bf16 %v1012_v14, %v1012_v14  ;;  %v1714_v19 = vpack.c.bf16 %v1052_v15, %v1052_v15  ;;  %v785_v20 = vadd.f32 %v2238_v33, %v784_v16  ;;  %v945_v21 = vadd.f32 %v2238_v33, %v944_v17 }
 0x17b   :  { %v786_v22 = vpop.f32.mrf.mxu0  ;;  %v946_v23 = vpop.f32.mrf.mxu1 }
 0x17c   :  { %1413 = vst.msk [vmem:[%s2643_s3 + $0x74] sm:$0xf] %vm1383_vm0, %v1674_v18  ;;  %1453 = vst.msk [vmem:[%s2643_s3 + $0x114] sm:$0xf] %vm1383_vm0, %v1714_v19  ;;  %v1013_v24 = vmax.f32 %v785_v20, 0.0  ;;  %v1053_v25 = vmax.f32 %v945_v21, 0.0 }
 0x17d   :  { %v787_v26 = vpop.f32.mrf.mxu0  ;;  %v947_v27 = vpop.f32.mrf.mxu1 }
 0x17e   :  { %v1675_v28 = vpack.c.bf16 %v1013_v24, %v1013_v24  ;;  %v1715_v29 = vpack.c.bf16 %v1053_v25, %v1053_v25  ;;  %v788_v30 = vadd.f32 %v2238_v33, %v787_v26  ;;  %v948_v31 = vadd.f32 %v2238_v33, %v947_v27 }
 0x17f   :  { %v789_v32 = vpop.f32.mrf.mxu0  ;;  %v949_v34 = vpop.f32.mrf.mxu1 }
 0x180   :  { %1414 = vst.msk [vmem:[%s2643_s3 + $0x78] sm:$0xf] %vm1383_vm0, %v1675_v28  ;;  %1454 = vst.msk [vmem:[%s2643_s3 + $0x118] sm:$0xf] %vm1383_vm0, %v1715_v29  ;;  %v1014_v35 = vmax.f32 %v788_v30, 0.0  ;;  %v1054_v36 = vmax.f32 %v948_v31, 0.0 }
 0x181   :  { %v792_v37 = vpop.f32.mrf.mxu0  ;;  %v952_v38 = vpop.f32.mrf.mxu1 }
 0x182   :  { %v1676_v39 = vpack.c.bf16 %v1014_v35, %v1014_v35  ;;  %v1716_v40 = vpack.c.bf16 %v1054_v36, %v1054_v36  ;;  %v793_v41 = vadd.f32 %v2238_v33, %v792_v37  ;;  %v953_v42 = vadd.f32 %v2238_v33, %v952_v38 }
 0x183   :  { %v794_v43 = vpop.f32.mrf.mxu0  ;;  %v954_v44 = vpop.f32.mrf.mxu1 }
 0x184   :  { %1415 = vst.msk [vmem:[%s2643_s3 + $0x7c] sm:$0xf] %vm1383_vm0, %v1676_v39  ;;  %1455 = vst.msk [vmem:[%s2643_s3 + $0x11c] sm:$0xf] %vm1383_vm0, %v1716_v40  ;;  %v1015_v45 = vmax.f32 %v793_v41, 0.0  ;;  %v1055_v46 = vmax.f32 %v953_v42, 0.0 }
 0x185   :  { %v795_v47 = vpop.f32.mrf.mxu0  ;;  %v955_v48 = vpop.f32.mrf.mxu1 }
 0x186   :  { %v1677_v49 = vpack.c.bf16 %v1015_v45, %v1015_v45  ;;  %v1717_v50 = vpack.c.bf16 %v1055_v46, %v1055_v46  ;;  %v796_v51 = vadd.f32 %v2238_v33, %v795_v47  ;;  %v956_v52 = vadd.f32 %v2238_v33, %v955_v48 }
 0x187   :  { %v797_v53 = vpop.f32.mrf.mxu0  ;;  %v957_v54 = vpop.f32.mrf.mxu1 }
 0x188   :  { %1416 = vst.msk [vmem:[%s2643_s3 + $0x80] sm:$0xf] %vm1383_vm0, %v1677_v49  ;;  %1456 = vst.msk [vmem:[%s2643_s3 + $0x120] sm:$0xf] %vm1383_vm0, %v1717_v50  ;;  %v1016_v55 = vmax.f32 %v796_v51, 0.0  ;;  %v1056_v56 = vmax.f32 %v956_v52, 0.0 }
 0x189   :  { %v800_v57 = vpop.f32.mrf.mxu0  ;;  %v960_v58 = vpop.f32.mrf.mxu1 }
 0x18a   :  { %v1678_v59 = vpack.c.bf16 %v1016_v55, %v1016_v55  ;;  %v1718_v60 = vpack.c.bf16 %v1056_v56, %v1056_v56  ;;  %v801_v61 = vadd.f32 %v2238_v33, %v800_v57  ;;  %v961_v62 = vadd.f32 %v2238_v33, %v960_v58 }
 0x18b   :  { %v802_v63 = vpop.f32.mrf.mxu0  ;;  %v962_v0 = vpop.f32.mrf.mxu1 }
 0x18c   :  { %1417 = vst.msk [vmem:[%s2643_s3 + $0x84] sm:$0xf] %vm1383_vm0, %v1678_v59  ;;  %1457 = vst.msk [vmem:[%s2643_s3 + $0x124] sm:$0xf] %vm1383_vm0, %v1718_v60  ;;  %v1017_v1 = vmax.f32 %v801_v61, 0.0  ;;  %v1057_v2 = vmax.f32 %v961_v62, 0.0 }
 0x18d   :  { %v803_v3 = vpop.f32.mrf.mxu0  ;;  %v963_v4 = vpop.f32.mrf.mxu1 }
 0x18e   :  { %v1679_v5 = vpack.c.bf16 %v1017_v1, %v1017_v1  ;;  %v1719_v6 = vpack.c.bf16 %v1057_v2, %v1057_v2  ;;  %v804_v7 = vadd.f32 %v2238_v33, %v803_v3  ;;  %v964_v8 = vadd.f32 %v2238_v33, %v963_v4 }
 0x18f   :  { %v805_v9 = vpop.f32.mrf.mxu0  ;;  %v965_v10 = vpop.f32.mrf.mxu1 }
 0x190   :  { %1418 = vst.msk [vmem:[%s2643_s3 + $0x88] sm:$0xf] %vm1383_vm0, %v1679_v5  ;;  %1458 = vst.msk [vmem:[%s2643_s3 + $0x128] sm:$0xf] %vm1383_vm0, %v1719_v6  ;;  %v1018_v11 = vmax.f32 %v804_v7, 0.0  ;;  %v1058_v12 = vmax.f32 %v964_v8, 0.0 }
 0x191   :  { %v808_v13 = vpop.f32.mrf.mxu0  ;;  %v968_v14 = vpop.f32.mrf.mxu1 }
 0x192   :  { %v1680_v15 = vpack.c.bf16 %v1018_v11, %v1018_v11  ;;  %v1720_v16 = vpack.c.bf16 %v1058_v12, %v1058_v12  ;;  %v809_v17 = vadd.f32 %v2238_v33, %v808_v13  ;;  %v969_v18 = vadd.f32 %v2238_v33, %v968_v14 }
 0x193   :  { %v810_v19 = vpop.f32.mrf.mxu0  ;;  %v970_v20 = vpop.f32.mrf.mxu1 }
 0x194   :  { %1419 = vst.msk [vmem:[%s2643_s3 + $0x8c] sm:$0xf] %vm1383_vm0, %v1680_v15  ;;  %1459 = vst.msk [vmem:[%s2643_s3 + $0x12c] sm:$0xf] %vm1383_vm0, %v1720_v16  ;;  %v1019_v21 = vmax.f32 %v809_v17, 0.0  ;;  %v1059_v22 = vmax.f32 %v969_v18, 0.0 }
 0x195   :  { %v811_v23 = vpop.f32.mrf.mxu0  ;;  %v971_v24 = vpop.f32.mrf.mxu1 }
 0x196   :  { %v1681_v25 = vpack.c.bf16 %v1019_v21, %v1019_v21  ;;  %v1721_v26 = vpack.c.bf16 %v1059_v22, %v1059_v22  ;;  %v812_v27 = vadd.f32 %v2238_v33, %v811_v23  ;;  %v972_v28 = vadd.f32 %v2238_v33, %v971_v24 }
 0x197   :  { %v813_v29 = vpop.f32.mrf.mxu0  ;;  %v973_v30 = vpop.f32.mrf.mxu1 }
 0x198   :  { %1420 = vst.msk [vmem:[%s2643_s3 + $0x90] sm:$0xf] %vm1383_vm0, %v1681_v25  ;;  %1460 = vst.msk [vmem:[%s2643_s3 + $0x130] sm:$0xf] %vm1383_vm0, %v1721_v26  ;;  %v1020_v31 = vmax.f32 %v812_v27, 0.0  ;;  %v1060_v32 = vmax.f32 %v972_v28, 0.0 }
 0x199   :  { %v816_v34 = vpop.f32.mrf.mxu0  ;;  %v976_v35 = vpop.f32.mrf.mxu1 }
 0x19a   :  { %v1682_v36 = vpack.c.bf16 %v1020_v31, %v1020_v31  ;;  %v1722_v37 = vpack.c.bf16 %v1060_v32, %v1060_v32  ;;  %v817_v38 = vadd.f32 %v2238_v33, %v816_v34  ;;  %v977_v39 = vadd.f32 %v2238_v33, %v976_v35 }
 0x19b   :  { %v818_v40 = vpop.f32.mrf.mxu0  ;;  %v978_v41 = vpop.f32.mrf.mxu1 }
 0x19c   :  { %1421 = vst.msk [vmem:[%s2643_s3 + $0x94] sm:$0xf] %vm1383_vm0, %v1682_v36  ;;  %1461 = vst.msk [vmem:[%s2643_s3 + $0x134] sm:$0xf] %vm1383_vm0, %v1722_v37  ;;  %v1021_v42 = vmax.f32 %v817_v38, 0.0  ;;  %v1061_v43 = vmax.f32 %v977_v39, 0.0 }
 0x19d   :  { %v819_v44 = vpop.f32.mrf.mxu0  ;;  %v979_v45 = vpop.f32.mrf.mxu1 }
 0x19e   :  { %v1683_v46 = vpack.c.bf16 %v1021_v42, %v1021_v42  ;;  %v1723_v47 = vpack.c.bf16 %v1061_v43, %v1061_v43  ;;  %v820_v48 = vadd.f32 %v2238_v33, %v819_v44  ;;  %v980_v49 = vadd.f32 %v2238_v33, %v979_v45 }
 0x19f   :  { %v821_v50 = vpop.f32.mrf.mxu0  ;;  %v981_v51 = vpop.f32.mrf.mxu1 }
 0x1a0   :  { %1422 = vst.msk [vmem:[%s2643_s3 + $0x98] sm:$0xf] %vm1383_vm0, %v1683_v46  ;;  %1462 = vst.msk [vmem:[%s2643_s3 + $0x138] sm:$0xf] %vm1383_vm0, %v1723_v47  ;;  %v1022_v52 = vmax.f32 %v820_v48, 0.0  ;;  %v1062_v53 = vmax.f32 %v980_v49, 0.0 }
 0x1a2   :  { %v1684_v54 = vpack.c.bf16 %v1022_v52, %v1022_v52  ;;  %v1724_v55 = vpack.c.bf16 %v1062_v53, %v1062_v53 }
 0x1a4   :  { %1423 = vst.msk [vmem:[%s2643_s3 + $0x9c] sm:$0xf] %vm1383_vm0, %v1684_v54  ;;  %1463 = vst.msk [vmem:[%s2643_s3 + $0x13c] sm:$0xf] %vm1383_vm0, %v1724_v55 }

// kernel: mnist_forward.6
= control target key start
LH: loop header
LB: loop body
LE: loop exit
PB: predicated region body
PF: predicated region fallthrough
CT: control target
= control target key end

     0   :  { %vm1144_vm0 = vcmask 257024   ;;  %s2167_s1 = inlined_call_operand.vmem [shape: bf16[512,32], index: 1, kind: input, shape index: {}]   ;;  %s2168_s0 = inlined_call_operand.vmem [shape: bf16[256,512], index: 0, kind: input, shape index: {}]   ;;  %s2169_s2 = inlined_call_operand.vmem [shape: f32[1,32], index: 2, kind: input, shape index: {}]   ;;  %s2170_s3 = inlined_call_operand.vmem [shape: bf16[256,32], index: 3, kind: output, shape index: {}]  }
   0x1   :  { %v1566_v0 = vld [vmem:[%s2167_s1 + $0x78] sm:$0xff]   ;;  %v1570_v4 = vld [vmem:[%s2167_s1 + $0x70] sm:$0xff]   ;;  %v1574_v8 = vld [vmem:[%s2167_s1 + $0x68] sm:$0xff]  }
   0x2   :  { %v1567_v1 = vld [vmem:[%s2167_s1 + $0xf8] sm:$0xff]   ;;  %1342 = vmatprep.subr.bf16.mxu0 %v1566_v0  ;;  %v1571_v5 = vld [vmem:[%s2167_s1 + $0xf0] sm:$0xff]   ;;  %v1575_v9 = vld [vmem:[%s2167_s1 + $0xe8] sm:$0xff]  }
   0x3   :  { %v1568_v2 = vld [vmem:[%s2167_s1 + $0x38] sm:$0xff]   ;;  %1454 = vmatprep.subr.bf16.mxu1 %v1567_v1  ;;  %v1572_v6 = vld [vmem:[%s2167_s1 + $0x30] sm:$0xff]   ;;  %v1576_v10 = vld [vmem:[%s2167_s1 + $0x28] sm:$0xff]  }
   0x4   :  { %v1569_v3 = vld [vmem:[%s2167_s1 + $0xb8] sm:$0xff]   ;;  %1343 = vmatpush3.bf16.msra.mxu0 %v1568_v2  ;;  %v1573_v7 = vld [vmem:[%s2167_s1 + $0xb0] sm:$0xff]   ;;  %v1577_v11 = vld [vmem:[%s2167_s1 + $0xa8] sm:$0xff]  }
   0x5   :  { %1455 = vmatpush3.bf16.msra.mxu1 %v1569_v3  ;;  %1344 = vmatprep.subr.bf16.mxu0 %v1570_v4  ;;  %v1578_v12 = vld [vmem:[%s2167_s1 + $0x60] sm:$0xff]   ;;  %v1582_v16 = vld [vmem:[%s2167_s1 + $0x58] sm:$0xff]   ;;  %v1586_v20 = vld [vmem:[%s2167_s1 + $0x50] sm:$0xff]  }
   0x6   :  { %1456 = vmatprep.subr.bf16.mxu1 %v1571_v5  ;;  %v1579_v13 = vld [vmem:[%s2167_s1 + $0xe0] sm:$0xff]   ;;  %v1583_v17 = vld [vmem:[%s2167_s1 + $0xd8] sm:$0xff]   ;;  %v1587_v21 = vld [vmem:[%s2167_s1 + $0xd0] sm:$0xff]  }
   0x7   :  { %v1580_v14 = vld [vmem:[%s2167_s1 + $0x20] sm:$0xff]   ;;  %v1584_v18 = vld [vmem:[%s2167_s1 + $0x18] sm:$0xff]   ;;  %v1588_v22 = vld [vmem:[%s2167_s1 + $0x10] sm:$0xff]  }
   0x8   :  { %1345 = vmatpush3.bf16.msra.mxu0 %v1572_v6  ;;  %v1581_v15 = vld [vmem:[%s2167_s1 + $0xa0] sm:$0xff]   ;;  %v1585_v19 = vld [vmem:[%s2167_s1 + $0x98] sm:$0xff]   ;;  %v1589_v23 = vld [vmem:[%s2167_s1 + $0x90] sm:$0xff]  }
   0x9   :  { %1457 = vmatpush3.bf16.msra.mxu1 %v1573_v7  ;;  %1346 = vmatprep.subr.bf16.mxu0 %v1574_v8  ;;  %v1590_v24 = vld [vmem:[%s2167_s1 + $0x48] sm:$0xff]   ;;  %v1594_v28 = vld [vmem:[%s2167_s1 + $0x40] sm:$0xff]  }
   0xa   :  { %1458 = vmatprep.subr.bf16.mxu1 %v1575_v9  ;;  %v1591_v25 = vld [vmem:[%s2167_s1 + $0xc8] sm:$0xff]   ;;  %v1595_v29 = vld [vmem:[%s2167_s1 + $0xc0] sm:$0xff]  }
   0xb   :  { %v1592_v26 = vld [vmem:[%s2167_s1 + $0x8] sm:$0xff]   ;;  %v1596_v30 = vld [vmem:[%s2167_s1] sm:$0xff]  }
   0xc   :  { %1347 = vmatpush3.bf16.msra.mxu0 %v1576_v10  ;;  %v1593_v27 = vld [vmem:[%s2167_s1 + $0x88] sm:$0xff]   ;;  %v1597_v31 = vld [vmem:[%s2167_s1 + $0x80] sm:$0xff]  }
   0xd   :  { %1459 = vmatpush3.bf16.msra.mxu1 %v1577_v11  ;;  %1348 = vmatprep.subr.bf16.mxu0 %v1578_v12  ;;  %v1598_v32 = vld [vmem:[%s2168_s0] ss:$16 sps:$4 sm:$0xff]   ;;  %v1600_v33 = vld [vmem:[%s2168_s0 + $0x4] ss:$16 sps:$4 sm:$0xff]   ;;  %v1601_v34 = vld [vmem:[%s2168_s0 + $0x8] ss:$16 sps:$4 sm:$0xff]  }
   0xe   :  { %1460 = vmatprep.subr.bf16.mxu1 %v1579_v13  ;;  %v1603_v35 = vld [vmem:[%s2168_s0 + $0xc] ss:$16 sps:$4 sm:$0xff]   ;;  %694 = vmatprep.mubr.bf16.mxu0 %v1600_v33  ;;  %v1604_v36 = vld [vmem:[%s2168_s0 + $0x24] ss:$16 sps:$4 sm:$0xff]   ;;  %v1608_v38 = vld [vmem:[%s2168_s0 + $0x20] ss:$16 sps:$4 sm:$0xff]  }
   0xf   :  { %855 = vmatprep.mubr.bf16.mxu1 %v1603_v35  ;;  %v1606_v37 = vld [vmem:[%s2168_s0 + $0x2c] ss:$16 sps:$4 sm:$0xff]   ;;  %v1609_v39 = vld [vmem:[%s2168_s0 + $0x28] ss:$16 sps:$4 sm:$0xff]   ;;  %v1610_v40 = vld [vmem:[%s2168_s0 + $0x44] ss:$16 sps:$4 sm:$0xff]  }
  0x10   :  { %1349 = vmatpush3.bf16.msra.mxu0 %v1580_v14  ;;  %v1612_v41 = vld [vmem:[%s2168_s0 + $0x4c] ss:$16 sps:$4 sm:$0xff]   ;;  %v1614_v42 = vld [vmem:[%s2168_s0 + $0x40] ss:$16 sps:$4 sm:$0xff]   ;;  %v1615_v43 = vld [vmem:[%s2168_s0 + $0x48] ss:$16 sps:$4 sm:$0xff]  }
  0x11   :  { %1461 = vmatpush3.bf16.msra.mxu1 %v1581_v15  ;;  %1350 = vmatprep.subr.bf16.mxu0 %v1582_v16  ;;  %v1616_v44 = vld [vmem:[%s2168_s0 + $0x64] ss:$16 sps:$4 sm:$0xff]   ;;  %v1618_v45 = vld [vmem:[%s2168_s0 + $0x6c] ss:$16 sps:$4 sm:$0xff]   ;;  %v1620_v46 = vld [vmem:[%s2168_s0 + $0x60] ss:$16 sps:$4 sm:$0xff]  }
  0x12   :  { %1462 = vmatprep.subr.bf16.mxu1 %v1583_v17  ;;  %v1621_v47 = vld [vmem:[%s2168_s0 + $0x68] ss:$16 sps:$4 sm:$0xff]   ;;  %v1622_v48 = vld [vmem:[%s2168_s0 + $0x84] ss:$16 sps:$4 sm:$0xff]   ;;  %v1624_v49 = vld [vmem:[%s2168_s0 + $0x8c] ss:$16 sps:$4 sm:$0xff]  }
  0x13   :  { %v1626_v50 = vld [vmem:[%s2168_s0 + $0x80] ss:$16 sps:$4 sm:$0xff]   ;;  %v1627_v51 = vld [vmem:[%s2168_s0 + $0x88] ss:$16 sps:$4 sm:$0xff]   ;;  %v1628_v52 = vld [vmem:[%s2168_s0 + $0xa4] ss:$16 sps:$4 sm:$0xff]  }
  0x14   :  { %1351 = vmatpush3.bf16.msra.mxu0 %v1584_v18  ;;  %v1630_v53 = vld [vmem:[%s2168_s0 + $0xac] ss:$16 sps:$4 sm:$0xff]   ;;  %v1632_v54 = vld [vmem:[%s2168_s0 + $0xa0] ss:$16 sps:$4 sm:$0xff]   ;;  %v1633_v55 = vld [vmem:[%s2168_s0 + $0xa8] ss:$16 sps:$4 sm:$0xff]  }
  0x15   :  { %1463 = vmatpush3.bf16.msra.mxu1 %v1585_v19  ;;  %1352 = vmatprep.subr.bf16.mxu0 %v1586_v20  ;;  %v1634_v56 = vld [vmem:[%s2168_s0 + $0xc4] ss:$16 sps:$4 sm:$0xff]   ;;  %v1636_v57 = vld [vmem:[%s2168_s0 + $0xcc] ss:$16 sps:$4 sm:$0xff]   ;;  %v1638_v58 = vld [vmem:[%s2168_s0 + $0xc0] ss:$16 sps:$4 sm:$0xff]  }
  0x16   :  { %1464 = vmatprep.subr.bf16.mxu1 %v1587_v21  ;;  %v1639_v59 = vld [vmem:[%s2168_s0 + $0xc8] ss:$16 sps:$4 sm:$0xff]   ;;  %v1640_v60 = vld [vmem:[%s2168_s0 + $0xe4] ss:$16 sps:$4 sm:$0xff]   ;;  %v1642_v61 = vld [vmem:[%s2168_s0 + $0xec] ss:$16 sps:$4 sm:$0xff]  }
  0x17   :  { %v1644_v62 = vld [vmem:[%s2168_s0 + $0xe0] ss:$16 sps:$4 sm:$0xff]   ;;  %v1645_v63 = vld [vmem:[%s2168_s0 + $0xe8] ss:$16 sps:$4 sm:$0xff]   ;;  %v1646_v0 = vld [vmem:[%s2168_s0 + $0x104] ss:$16 sps:$4 sm:$0xff]  }
  0x18   :  { %1353 = vmatpush3.bf16.msra.mxu0 %v1588_v22  ;;  %v1648_v1 = vld [vmem:[%s2168_s0 + $0x10c] ss:$16 sps:$4 sm:$0xff]   ;;  %v1650_v2 = vld [vmem:[%s2168_s0 + $0x100] ss:$16 sps:$4 sm:$0xff]   ;;  %v1651_v3 = vld [vmem:[%s2168_s0 + $0x108] ss:$16 sps:$4 sm:$0xff]  }
  0x19   :  { %1465 = vmatpush3.bf16.msra.mxu1 %v1589_v23  ;;  %1354 = vmatprep.subr.bf16.mxu0 %v1590_v24  ;;  %v1652_v4 = vld [vmem:[%s2168_s0 + $0x124] ss:$16 sps:$4 sm:$0xff]   ;;  %v1654_v5 = vld [vmem:[%s2168_s0 + $0x12c] ss:$16 sps:$4 sm:$0xff]   ;;  %v1656_v6 = vld [vmem:[%s2168_s0 + $0x120] ss:$16 sps:$4 sm:$0xff]  }
  0x1a   :  { %1466 = vmatprep.subr.bf16.mxu1 %v1591_v25  ;;  %v1657_v7 = vld [vmem:[%s2168_s0 + $0x128] ss:$16 sps:$4 sm:$0xff]   ;;  %v1658_v8 = vld [vmem:[%s2168_s0 + $0x144] ss:$16 sps:$4 sm:$0xff]   ;;  %v1660_v9 = vld [vmem:[%s2168_s0 + $0x14c] ss:$16 sps:$4 sm:$0xff]  }
  0x1b   :  { %v1662_v10 = vld [vmem:[%s2168_s0 + $0x140] ss:$16 sps:$4 sm:$0xff]   ;;  %v1663_v11 = vld [vmem:[%s2168_s0 + $0x148] ss:$16 sps:$4 sm:$0xff]   ;;  %v1664_v12 = vld [vmem:[%s2168_s0 + $0x164] ss:$16 sps:$4 sm:$0xff]  }
  0x1c   :  { %1355 = vmatpush3.bf16.msra.mxu0 %v1592_v26  ;;  %v1666_v13 = vld [vmem:[%s2168_s0 + $0x16c] ss:$16 sps:$4 sm:$0xff]   ;;  %v1668_v14 = vld [vmem:[%s2168_s0 + $0x160] ss:$16 sps:$4 sm:$0xff]   ;;  %v1669_v15 = vld [vmem:[%s2168_s0 + $0x168] ss:$16 sps:$4 sm:$0xff]  }
  0x1d   :  { %1467 = vmatpush3.bf16.msra.mxu1 %v1593_v27  ;;  %1356 = vmatprep.subr.bf16.mxu0 %v1594_v28  ;;  %v1670_v16 = vld [vmem:[%s2168_s0 + $0x184] ss:$16 sps:$4 sm:$0xff]   ;;  %v1672_v17 = vld [vmem:[%s2168_s0 + $0x18c] ss:$16 sps:$4 sm:$0xff]   ;;  %v1674_v18 = vld [vmem:[%s2168_s0 + $0x180] ss:$16 sps:$4 sm:$0xff]  }
  0x1e   :  { %1468 = vmatprep.subr.bf16.mxu1 %v1595_v29  ;;  %v1675_v19 = vld [vmem:[%s2168_s0 + $0x188] ss:$16 sps:$4 sm:$0xff]   ;;  %v1676_v20 = vld [vmem:[%s2168_s0 + $0x1a4] ss:$16 sps:$4 sm:$0xff]   ;;  %v1678_v21 = vld [vmem:[%s2168_s0 + $0x1ac] ss:$16 sps:$4 sm:$0xff]  }
  0x1f   :  { %v1680_v22 = vld [vmem:[%s2168_s0 + $0x1a0] ss:$16 sps:$4 sm:$0xff]   ;;  %v1681_v23 = vld [vmem:[%s2168_s0 + $0x1a8] ss:$16 sps:$4 sm:$0xff]   ;;  %v1682_v24 = vld [vmem:[%s2168_s0 + $0x1c4] ss:$16 sps:$4 sm:$0xff]  }
  0x20   :  { %1357 = vmatpush3.bf16.msra.mxu0 %v1596_v30  ;;  %v1684_v25 = vld [vmem:[%s2168_s0 + $0x1cc] ss:$16 sps:$4 sm:$0xff]   ;;  %v1686_v26 = vld [vmem:[%s2168_s0 + $0x1c0] ss:$16 sps:$4 sm:$0xff]   ;;  %v1687_v27 = vld [vmem:[%s2168_s0 + $0x1c8] ss:$16 sps:$4 sm:$0xff]  }
  0x21   :  { %1469 = vmatpush3.bf16.msra.mxu1 %v1597_v31  ;;  %v1688_v28 = vld [vmem:[%s2168_s0 + $0x1e4] ss:$16 sps:$4 sm:$0xff]   ;;  %v1690_v29 = vld [vmem:[%s2168_s0 + $0x1ec] ss:$16 sps:$4 sm:$0xff]   ;;  %v1692_v30 = vld [vmem:[%s2168_s0 + $0x1e0] ss:$16 sps:$4 sm:$0xff]  }
  0x22   :  { %v1693_v31 = vld [vmem:[%s2168_s0 + $0x1e8] ss:$16 sps:$4 sm:$0xff]  }
  0x23   :  { %695 = vmatmul.mubr.bf16.vlgmr.msra.gmra.mxu0 %v1598_v32 }
  0x24   :  { %856 = vmatmul.mubr.bf16.vlgmr.msra.gmra.mxu1 %v1601_v34  ;;  %702 = vmatprep.mubr.bf16.mxu0 %v1604_v36  ;;  %v2005_v34 = vld [vmem:[%s2169_s2] ss:$0 sm:$0xff] }
  0x25   :  { %863 = vmatprep.mubr.bf16.mxu1 %v1606_v37 }
  0x2b   :  { %703 = vmatmul.mubr.bf16.gmra.mxu0 %v1608_v38 }
  0x2c   :  { %864 = vmatmul.mubr.bf16.gmra.mxu1 %v1609_v39  ;;  %710 = vmatprep.mubr.bf16.mxu0 %v1610_v40 }
  0x2d   :  { %871 = vmatprep.mubr.bf16.mxu1 %v1612_v41 }
  0x33   :  { %711 = vmatmul.mubr.bf16.gmra.mxu0 %v1614_v42 }
  0x34   :  { %872 = vmatmul.mubr.bf16.gmra.mxu1 %v1615_v43  ;;  %718 = vmatprep.mubr.bf16.mxu0 %v1616_v44 }
  0x35   :  { %879 = vmatprep.mubr.bf16.mxu1 %v1618_v45 }
  0x3b   :  { %719 = vmatmul.mubr.bf16.gmra.mxu0 %v1620_v46 }
  0x3c   :  { %880 = vmatmul.mubr.bf16.gmra.mxu1 %v1621_v47  ;;  %726 = vmatprep.mubr.bf16.mxu0 %v1622_v48 }
  0x3d   :  { %887 = vmatprep.mubr.bf16.mxu1 %v1624_v49 }
  0x43   :  { %727 = vmatmul.mubr.bf16.gmra.mxu0 %v1626_v50 }
  0x44   :  { %888 = vmatmul.mubr.bf16.gmra.mxu1 %v1627_v51  ;;  %734 = vmatprep.mubr.bf16.mxu0 %v1628_v52 }
  0x45   :  { %895 = vmatprep.mubr.bf16.mxu1 %v1630_v53 }
  0x4b   :  { %735 = vmatmul.mubr.bf16.gmra.mxu0 %v1632_v54 }
  0x4c   :  { %896 = vmatmul.mubr.bf16.gmra.mxu1 %v1633_v55  ;;  %742 = vmatprep.mubr.bf16.mxu0 %v1634_v56 }
  0x4d   :  { %903 = vmatprep.mubr.bf16.mxu1 %v1636_v57 }
  0x53   :  { %743 = vmatmul.mubr.bf16.gmra.mxu0 %v1638_v58 }
  0x54   :  { %904 = vmatmul.mubr.bf16.gmra.mxu1 %v1639_v59  ;;  %750 = vmatprep.mubr.bf16.mxu0 %v1640_v60 }
  0x55   :  { %911 = vmatprep.mubr.bf16.mxu1 %v1642_v61 }
  0x5b   :  { %751 = vmatmul.mubr.bf16.gmra.mxu0 %v1644_v62 }
  0x5c   :  { %912 = vmatmul.mubr.bf16.gmra.mxu1 %v1645_v63  ;;  %758 = vmatprep.mubr.bf16.mxu0 %v1646_v0 }
  0x5d   :  { %919 = vmatprep.mubr.bf16.mxu1 %v1648_v1 }
  0x63   :  { %759 = vmatmul.mubr.bf16.gmra.mxu0 %v1650_v2 }
  0x64   :  { %920 = vmatmul.mubr.bf16.gmra.mxu1 %v1651_v3  ;;  %766 = vmatprep.mubr.bf16.mxu0 %v1652_v4 }
  0x65   :  { %927 = vmatprep.mubr.bf16.mxu1 %v1654_v5 }
  0x6b   :  { %767 = vmatmul.mubr.bf16.gmra.mxu0 %v1656_v6 }
  0x6c   :  { %928 = vmatmul.mubr.bf16.gmra.mxu1 %v1657_v7  ;;  %774 = vmatprep.mubr.bf16.mxu0 %v1658_v8 }
  0x6d   :  { %935 = vmatprep.mubr.bf16.mxu1 %v1660_v9 }
  0x73   :  { %775 = vmatmul.mubr.bf16.gmra.mxu0 %v1662_v10 }
  0x74   :  { %936 = vmatmul.mubr.bf16.gmra.mxu1 %v1663_v11  ;;  %782 = vmatprep.mubr.bf16.mxu0 %v1664_v12 }
  0x75   :  { %943 = vmatprep.mubr.bf16.mxu1 %v1666_v13 }
  0x7b   :  { %783 = vmatmul.mubr.bf16.gmra.mxu0 %v1668_v14 }
  0x7c   :  { %944 = vmatmul.mubr.bf16.gmra.mxu1 %v1669_v15  ;;  %790 = vmatprep.mubr.bf16.mxu0 %v1670_v16 }
  0x7d   :  { %951 = vmatprep.mubr.bf16.mxu1 %v1672_v17 }
  0x83   :  { %791 = vmatmul.mubr.bf16.gmra.mxu0 %v1674_v18 }
  0x84   :  { %952 = vmatmul.mubr.bf16.gmra.mxu1 %v1675_v19  ;;  %798 = vmatprep.mubr.bf16.mxu0 %v1676_v20 }
  0x85   :  { %959 = vmatprep.mubr.bf16.mxu1 %v1678_v21 }
  0x8b   :  { %799 = vmatmul.mubr.bf16.gmra.mxu0 %v1680_v22 }
  0x8c   :  { %960 = vmatmul.mubr.bf16.gmra.mxu1 %v1681_v23  ;;  %806 = vmatprep.mubr.bf16.mxu0 %v1682_v24 }
  0x8d   :  { %967 = vmatprep.mubr.bf16.mxu1 %v1684_v25 }
  0x93   :  { %807 = vmatmul.mubr.bf16.gmra.mxu0 %v1686_v26 }
  0x94   :  { %968 = vmatmul.mubr.bf16.gmra.mxu1 %v1687_v27  ;;  %814 = vmatprep.mubr.bf16.mxu0 %v1688_v28 }
  0x95   :  { %975 = vmatprep.mubr.bf16.mxu1 %v1690_v29 }
  0x9b   :  { %815 = vmatmul.mubr.bf16.gmra.mxu0 %v1692_v30 }
  0x9c   :  { %976 = vmatmul.mubr.bf16.gmra.mxu1 %v1693_v31 }
  0xe3   :  { %v1358_v32 = vpop.f32.mrf.mxu0 }
  0xe4   :  { %v1470_v33 = vpop.f32.mrf.mxu1 }
  0xe5   :  { %v1359_v35 = vpop.f32.mrf.mxu0 }
  0xe6   :  { %v1360_v36 = vadd.f32 %v1359_v35, %v1358_v32  ;;  %v1471_v37 = vpop.f32.mrf.mxu1 }
  0xe7   :  { %v1361_v38 = vpop.f32.mrf.mxu0  ;;  %v1472_v40 = vadd.f32 %v1471_v37, %v1470_v33 }
  0xe8   :  { %v697_v39 = vadd.f32 %v1360_v36, %v2005_v34  ;;  %v1473_v41 = vpop.f32.mrf.mxu1 }
  0xe9   :  { %v1362_v42 = vpop.f32.mrf.mxu0 }
  0xea   :  { %v858_v43 = vadd.f32 %v1472_v40, %v697_v39  ;;  %v1363_v44 = vadd.f32 %v1362_v42, %v1361_v38  ;;  %v1474_v45 = vpop.f32.mrf.mxu1 }
  0xeb   :  { %v1364_v46 = vpop.f32.mrf.mxu0  ;;  %v1475_v49 = vadd.f32 %v1474_v45, %v1473_v41 }
  0xec   :  { %v984_v47 = vmax.f32 %v858_v43, 0.0  ;;  %v700_v48 = vadd.f32 %v1363_v44, %v2005_v34  ;;  %v1476_v50 = vpop.f32.mrf.mxu1 }
  0xed   :  { %v1365_v51 = vpop.f32.mrf.mxu0 }
  0xee   :  { %v1310_v52 = vpack.c.bf16 %v984_v47, %v984_v47  ;;  %v861_v53 = vadd.f32 %v1475_v49, %v700_v48  ;;  %v1366_v54 = vadd.f32 %v1365_v51, %v1364_v46  ;;  %v1477_v55 = vpop.f32.mrf.mxu1 }
  0xef   :  { %v1367_v56 = vpop.f32.mrf.mxu0  ;;  %v1478_v59 = vadd.f32 %v1477_v55, %v1476_v50 }
  0xf0   :  { %1145 = vst.msk [vmem:[%s2170_s3] sm:$0xf] %vm1144_vm0, %v1310_v52  ;;  %v985_v57 = vmax.f32 %v861_v53, 0.0  ;;  %v705_v58 = vadd.f32 %v1366_v54, %v2005_v34  ;;  %v1479_v60 = vpop.f32.mrf.mxu1 }
  0xf1   :  { %v1368_v61 = vpop.f32.mrf.mxu0 }
  0xf2   :  { %v1311_v62 = vpack.c.bf16 %v985_v57, %v985_v57  ;;  %v866_v63 = vadd.f32 %v1478_v59, %v705_v58  ;;  %v1369_v0 = vadd.f32 %v1368_v61, %v1367_v56  ;;  %v1480_v1 = vpop.f32.mrf.mxu1 }
  0xf3   :  { %v1370_v2 = vpop.f32.mrf.mxu0  ;;  %v1481_v5 = vadd.f32 %v1480_v1, %v1479_v60 }
  0xf4   :  { %1146 = vst.msk [vmem:[%s2170_s3 + $0x4] sm:$0xf] %vm1144_vm0, %v1311_v62  ;;  %v986_v3 = vmax.f32 %v866_v63, 0.0  ;;  %v708_v4 = vadd.f32 %v1369_v0, %v2005_v34  ;;  %v1482_v6 = vpop.f32.mrf.mxu1 }
  0xf5   :  { %v1371_v7 = vpop.f32.mrf.mxu0 }
  0xf6   :  { %v1312_v8 = vpack.c.bf16 %v986_v3, %v986_v3  ;;  %v869_v9 = vadd.f32 %v1481_v5, %v708_v4  ;;  %v1372_v10 = vadd.f32 %v1371_v7, %v1370_v2  ;;  %v1483_v11 = vpop.f32.mrf.mxu1 }
  0xf7   :  { %v1373_v12 = vpop.f32.mrf.mxu0  ;;  %v1484_v15 = vadd.f32 %v1483_v11, %v1482_v6 }
  0xf8   :  { %1147 = vst.msk [vmem:[%s2170_s3 + $0x8] sm:$0xf] %vm1144_vm0, %v1312_v8  ;;  %v987_v13 = vmax.f32 %v869_v9, 0.0  ;;  %v713_v14 = vadd.f32 %v1372_v10, %v2005_v34  ;;  %v1485_v16 = vpop.f32.mrf.mxu1 }
  0xf9   :  { %v1374_v17 = vpop.f32.mrf.mxu0 }
  0xfa   :  { %v1313_v18 = vpack.c.bf16 %v987_v13, %v987_v13  ;;  %v874_v19 = vadd.f32 %v1484_v15, %v713_v14  ;;  %v1375_v20 = vadd.f32 %v1374_v17, %v1373_v12  ;;  %v1486_v21 = vpop.f32.mrf.mxu1 }
  0xfb   :  { %v1376_v22 = vpop.f32.mrf.mxu0  ;;  %v1487_v25 = vadd.f32 %v1486_v21, %v1485_v16 }
  0xfc   :  { %1148 = vst.msk [vmem:[%s2170_s3 + $0xc] sm:$0xf] %vm1144_vm0, %v1313_v18  ;;  %v988_v23 = vmax.f32 %v874_v19, 0.0  ;;  %v716_v24 = vadd.f32 %v1375_v20, %v2005_v34  ;;  %v1488_v26 = vpop.f32.mrf.mxu1 }
  0xfd   :  { %v1377_v27 = vpop.f32.mrf.mxu0 }
  0xfe   :  { %v1314_v28 = vpack.c.bf16 %v988_v23, %v988_v23  ;;  %v877_v29 = vadd.f32 %v1487_v25, %v716_v24  ;;  %v1378_v30 = vadd.f32 %v1377_v27, %v1376_v22  ;;  %v1489_v31 = vpop.f32.mrf.mxu1 }
  0xff   :  { %v1379_v32 = vpop.f32.mrf.mxu0  ;;  %v1490_v36 = vadd.f32 %v1489_v31, %v1488_v26 }
 0x100   :  { %1149 = vst.msk [vmem:[%s2170_s3 + $0x10] sm:$0xf] %vm1144_vm0, %v1314_v28  ;;  %v989_v33 = vmax.f32 %v877_v29, 0.0  ;;  %v721_v35 = vadd.f32 %v1378_v30, %v2005_v34  ;;  %v1491_v37 = vpop.f32.mrf.mxu1 }
 0x101   :  { %v1380_v38 = vpop.f32.mrf.mxu0 }
 0x102   :  { %v1315_v39 = vpack.c.bf16 %v989_v33, %v989_v33  ;;  %v882_v40 = vadd.f32 %v1490_v36, %v721_v35  ;;  %v1381_v41 = vadd.f32 %v1380_v38, %v1379_v32  ;;  %v1492_v42 = vpop.f32.mrf.mxu1 }
 0x103   :  { %v1382_v43 = vpop.f32.mrf.mxu0  ;;  %v1493_v46 = vadd.f32 %v1492_v42, %v1491_v37 }
 0x104   :  { %1150 = vst.msk [vmem:[%s2170_s3 + $0x14] sm:$0xf] %vm1144_vm0, %v1315_v39  ;;  %v990_v44 = vmax.f32 %v882_v40, 0.0  ;;  %v724_v45 = vadd.f32 %v1381_v41, %v2005_v34  ;;  %v1494_v47 = vpop.f32.mrf.mxu1 }
 0x105   :  { %v1383_v48 = vpop.f32.mrf.mxu0 }
 0x106   :  { %v1316_v49 = vpack.c.bf16 %v990_v44, %v990_v44  ;;  %v885_v50 = vadd.f32 %v1493_v46, %v724_v45  ;;  %v1384_v51 = vadd.f32 %v1383_v48, %v1382_v43  ;;  %v1495_v52 = vpop.f32.mrf.mxu1 }
 0x107   :  { %v1385_v53 = vpop.f32.mrf.mxu0  ;;  %v1496_v56 = vadd.f32 %v1495_v52, %v1494_v47 }
 0x108   :  { %1151 = vst.msk [vmem:[%s2170_s3 + $0x18] sm:$0xf] %vm1144_vm0, %v1316_v49  ;;  %v991_v54 = vmax.f32 %v885_v50, 0.0  ;;  %v729_v55 = vadd.f32 %v1384_v51, %v2005_v34  ;;  %v1497_v57 = vpop.f32.mrf.mxu1 }
 0x109   :  { %v1386_v58 = vpop.f32.mrf.mxu0 }
 0x10a   :  { %v1317_v59 = vpack.c.bf16 %v991_v54, %v991_v54  ;;  %v890_v60 = vadd.f32 %v1496_v56, %v729_v55  ;;  %v1387_v61 = vadd.f32 %v1386_v58, %v1385_v53  ;;  %v1498_v62 = vpop.f32.mrf.mxu1 }
 0x10b   :  { %v1388_v63 = vpop.f32.mrf.mxu0  ;;  %v1499_v2 = vadd.f32 %v1498_v62, %v1497_v57 }
 0x10c   :  { %1152 = vst.msk [vmem:[%s2170_s3 + $0x1c] sm:$0xf] %vm1144_vm0, %v1317_v59  ;;  %v992_v0 = vmax.f32 %v890_v60, 0.0  ;;  %v732_v1 = vadd.f32 %v1387_v61, %v2005_v34  ;;  %v1500_v3 = vpop.f32.mrf.mxu1 }
 0x10d   :  { %v1389_v4 = vpop.f32.mrf.mxu0 }
 0x10e   :  { %v1318_v5 = vpack.c.bf16 %v992_v0, %v992_v0  ;;  %v893_v6 = vadd.f32 %v1499_v2, %v732_v1  ;;  %v1390_v7 = vadd.f32 %v1389_v4, %v1388_v63  ;;  %v1501_v8 = vpop.f32.mrf.mxu1 }
 0x10f   :  { %v1391_v9 = vpop.f32.mrf.mxu0  ;;  %v1502_v12 = vadd.f32 %v1501_v8, %v1500_v3 }
 0x110   :  { %1153 = vst.msk [vmem:[%s2170_s3 + $0x20] sm:$0xf] %vm1144_vm0, %v1318_v5  ;;  %v993_v10 = vmax.f32 %v893_v6, 0.0  ;;  %v737_v11 = vadd.f32 %v1390_v7, %v2005_v34  ;;  %v1503_v13 = vpop.f32.mrf.mxu1 }
 0x111   :  { %v1392_v14 = vpop.f32.mrf.mxu0 }
 0x112   :  { %v1319_v15 = vpack.c.bf16 %v993_v10, %v993_v10  ;;  %v898_v16 = vadd.f32 %v1502_v12, %v737_v11  ;;  %v1393_v17 = vadd.f32 %v1392_v14, %v1391_v9  ;;  %v1504_v18 = vpop.f32.mrf.mxu1 }
 0x113   :  { %v1394_v19 = vpop.f32.mrf.mxu0  ;;  %v1505_v22 = vadd.f32 %v1504_v18, %v1503_v13 }
 0x114   :  { %1154 = vst.msk [vmem:[%s2170_s3 + $0x24] sm:$0xf] %vm1144_vm0, %v1319_v15  ;;  %v994_v20 = vmax.f32 %v898_v16, 0.0  ;;  %v740_v21 = vadd.f32 %v1393_v17, %v2005_v34  ;;  %v1506_v23 = vpop.f32.mrf.mxu1 }
 0x115   :  { %v1395_v24 = vpop.f32.mrf.mxu0 }
 0x116   :  { %v1320_v25 = vpack.c.bf16 %v994_v20, %v994_v20  ;;  %v901_v26 = vadd.f32 %v1505_v22, %v740_v21  ;;  %v1396_v27 = vadd.f32 %v1395_v24, %v1394_v19  ;;  %v1507_v28 = vpop.f32.mrf.mxu1 }
 0x117   :  { %v1397_v29 = vpop.f32.mrf.mxu0  ;;  %v1508_v32 = vadd.f32 %v1507_v28, %v1506_v23 }
 0x118   :  { %1155 = vst.msk [vmem:[%s2170_s3 + $0x28] sm:$0xf] %vm1144_vm0, %v1320_v25  ;;  %v995_v30 = vmax.f32 %v901_v26, 0.0  ;;  %v745_v31 = vadd.f32 %v1396_v27, %v2005_v34  ;;  %v1509_v33 = vpop.f32.mrf.mxu1 }
 0x119   :  { %v1398_v35 = vpop.f32.mrf.mxu0 }
 0x11a   :  { %v1321_v36 = vpack.c.bf16 %v995_v30, %v995_v30  ;;  %v906_v37 = vadd.f32 %v1508_v32, %v745_v31  ;;  %v1399_v38 = vadd.f32 %v1398_v35, %v1397_v29  ;;  %v1510_v39 = vpop.f32.mrf.mxu1 }
 0x11b   :  { %v1400_v40 = vpop.f32.mrf.mxu0  ;;  %v1511_v43 = vadd.f32 %v1510_v39, %v1509_v33 }
 0x11c   :  { %1156 = vst.msk [vmem:[%s2170_s3 + $0x2c] sm:$0xf] %vm1144_vm0, %v1321_v36  ;;  %v996_v41 = vmax.f32 %v906_v37, 0.0  ;;  %v748_v42 = vadd.f32 %v1399_v38, %v2005_v34  ;;  %v1512_v44 = vpop.f32.mrf.mxu1 }
 0x11d   :  { %v1401_v45 = vpop.f32.mrf.mxu0 }
 0x11e   :  { %v1322_v46 = vpack.c.bf16 %v996_v41, %v996_v41  ;;  %v909_v47 = vadd.f32 %v1511_v43, %v748_v42  ;;  %v1402_v48 = vadd.f32 %v1401_v45, %v1400_v40  ;;  %v1513_v49 = vpop.f32.mrf.mxu1 }
 0x11f   :  { %v1403_v50 = vpop.f32.mrf.mxu0  ;;  %v1514_v53 = vadd.f32 %v1513_v49, %v1512_v44 }
 0x120   :  { %1157 = vst.msk [vmem:[%s2170_s3 + $0x30] sm:$0xf] %vm1144_vm0, %v1322_v46  ;;  %v997_v51 = vmax.f32 %v909_v47, 0.0  ;;  %v753_v52 = vadd.f32 %v1402_v48, %v2005_v34  ;;  %v1515_v54 = vpop.f32.mrf.mxu1 }
 0x121   :  { %v1404_v55 = vpop.f32.mrf.mxu0 }
 0x122   :  { %v1323_v56 = vpack.c.bf16 %v997_v51, %v997_v51  ;;  %v914_v57 = vadd.f32 %v1514_v53, %v753_v52  ;;  %v1405_v58 = vadd.f32 %v1404_v55, %v1403_v50  ;;  %v1516_v59 = vpop.f32.mrf.mxu1 }
 0x123   :  { %v1406_v60 = vpop.f32.mrf.mxu0  ;;  %v1517_v63 = vadd.f32 %v1516_v59, %v1515_v54 }
 0x124   :  { %1158 = vst.msk [vmem:[%s2170_s3 + $0x34] sm:$0xf] %vm1144_vm0, %v1323_v56  ;;  %v998_v61 = vmax.f32 %v914_v57, 0.0  ;;  %v756_v62 = vadd.f32 %v1405_v58, %v2005_v34  ;;  %v1518_v0 = vpop.f32.mrf.mxu1 }
 0x125   :  { %v1407_v1 = vpop.f32.mrf.mxu0 }
 0x126   :  { %v1324_v2 = vpack.c.bf16 %v998_v61, %v998_v61  ;;  %v917_v3 = vadd.f32 %v1517_v63, %v756_v62  ;;  %v1408_v4 = vadd.f32 %v1407_v1, %v1406_v60  ;;  %v1519_v5 = vpop.f32.mrf.mxu1 }
 0x127   :  { %v1409_v6 = vpop.f32.mrf.mxu0  ;;  %v1520_v9 = vadd.f32 %v1519_v5, %v1518_v0 }
 0x128   :  { %1159 = vst.msk [vmem:[%s2170_s3 + $0x38] sm:$0xf] %vm1144_vm0, %v1324_v2  ;;  %v999_v7 = vmax.f32 %v917_v3, 0.0  ;;  %v761_v8 = vadd.f32 %v1408_v4, %v2005_v34  ;;  %v1521_v10 = vpop.f32.mrf.mxu1 }
 0x129   :  { %v1410_v11 = vpop.f32.mrf.mxu0 }
 0x12a   :  { %v1325_v12 = vpack.c.bf16 %v999_v7, %v999_v7  ;;  %v922_v13 = vadd.f32 %v1520_v9, %v761_v8  ;;  %v1411_v14 = vadd.f32 %v1410_v11, %v1409_v6  ;;  %v1522_v15 = vpop.f32.mrf.mxu1 }
 0x12b   :  { %v1412_v16 = vpop.f32.mrf.mxu0  ;;  %v1523_v19 = vadd.f32 %v1522_v15, %v1521_v10 }
 0x12c   :  { %1160 = vst.msk [vmem:[%s2170_s3 + $0x3c] sm:$0xf] %vm1144_vm0, %v1325_v12  ;;  %v1000_v17 = vmax.f32 %v922_v13, 0.0  ;;  %v764_v18 = vadd.f32 %v1411_v14, %v2005_v34  ;;  %v1524_v20 = vpop.f32.mrf.mxu1 }
 0x12d   :  { %v1413_v21 = vpop.f32.mrf.mxu0 }
 0x12e   :  { %v1326_v22 = vpack.c.bf16 %v1000_v17, %v1000_v17  ;;  %v925_v23 = vadd.f32 %v1523_v19, %v764_v18  ;;  %v1414_v24 = vadd.f32 %v1413_v21, %v1412_v16  ;;  %v1525_v25 = vpop.f32.mrf.mxu1 }
 0x12f   :  { %v1415_v26 = vpop.f32.mrf.mxu0  ;;  %v1526_v29 = vadd.f32 %v1525_v25, %v1524_v20 }
 0x130   :  { %1161 = vst.msk [vmem:[%s2170_s3 + $0x40] sm:$0xf] %vm1144_vm0, %v1326_v22  ;;  %v1001_v27 = vmax.f32 %v925_v23, 0.0  ;;  %v769_v28 = vadd.f32 %v1414_v24, %v2005_v34  ;;  %v1527_v30 = vpop.f32.mrf.mxu1 }
 0x131   :  { %v1416_v31 = vpop.f32.mrf.mxu0 }
 0x132   :  { %v1327_v32 = vpack.c.bf16 %v1001_v27, %v1001_v27  ;;  %v930_v33 = vadd.f32 %v1526_v29, %v769_v28  ;;  %v1417_v35 = vadd.f32 %v1416_v31, %v1415_v26  ;;  %v1528_v36 = vpop.f32.mrf.mxu1 }
 0x133   :  { %v1418_v37 = vpop.f32.mrf.mxu0  ;;  %v1529_v40 = vadd.f32 %v1528_v36, %v1527_v30 }
 0x134   :  { %1162 = vst.msk [vmem:[%s2170_s3 + $0x44] sm:$0xf] %vm1144_vm0, %v1327_v32  ;;  %v1002_v38 = vmax.f32 %v930_v33, 0.0  ;;  %v772_v39 = vadd.f32 %v1417_v35, %v2005_v34  ;;  %v1530_v41 = vpop.f32.mrf.mxu1 }
 0x135   :  { %v1419_v42 = vpop.f32.mrf.mxu0 }
 0x136   :  { %v1328_v43 = vpack.c.bf16 %v1002_v38, %v1002_v38  ;;  %v933_v44 = vadd.f32 %v1529_v40, %v772_v39  ;;  %v1420_v45 = vadd.f32 %v1419_v42, %v1418_v37  ;;  %v1531_v46 = vpop.f32.mrf.mxu1 }
 0x137   :  { %v1421_v47 = vpop.f32.mrf.mxu0  ;;  %v1532_v50 = vadd.f32 %v1531_v46, %v1530_v41 }
 0x138   :  { %1163 = vst.msk [vmem:[%s2170_s3 + $0x48] sm:$0xf] %vm1144_vm0, %v1328_v43  ;;  %v1003_v48 = vmax.f32 %v933_v44, 0.0  ;;  %v777_v49 = vadd.f32 %v1420_v45, %v2005_v34  ;;  %v1533_v51 = vpop.f32.mrf.mxu1 }
 0x139   :  { %v1422_v52 = vpop.f32.mrf.mxu0 }
 0x13a   :  { %v1329_v53 = vpack.c.bf16 %v1003_v48, %v1003_v48  ;;  %v938_v54 = vadd.f32 %v1532_v50, %v777_v49  ;;  %v1423_v55 = vadd.f32 %v1422_v52, %v1421_v47  ;;  %v1534_v56 = vpop.f32.mrf.mxu1 }
 0x13b   :  { %v1424_v57 = vpop.f32.mrf.mxu0  ;;  %v1535_v60 = vadd.f32 %v1534_v56, %v1533_v51 }
 0x13c   :  { %1164 = vst.msk [vmem:[%s2170_s3 + $0x4c] sm:$0xf] %vm1144_vm0, %v1329_v53  ;;  %v1004_v58 = vmax.f32 %v938_v54, 0.0  ;;  %v780_v59 = vadd.f32 %v1423_v55, %v2005_v34  ;;  %v1536_v61 = vpop.f32.mrf.mxu1 }
 0x13d   :  { %v1425_v62 = vpop.f32.mrf.mxu0 }
 0x13e   :  { %v1330_v63 = vpack.c.bf16 %v1004_v58, %v1004_v58  ;;  %v941_v0 = vadd.f32 %v1535_v60, %v780_v59  ;;  %v1426_v1 = vadd.f32 %v1425_v62, %v1424_v57  ;;  %v1537_v2 = vpop.f32.mrf.mxu1 }
 0x13f   :  { %v1427_v3 = vpop.f32.mrf.mxu0  ;;  %v1538_v6 = vadd.f32 %v1537_v2, %v1536_v61 }
 0x140   :  { %1165 = vst.msk [vmem:[%s2170_s3 + $0x50] sm:$0xf] %vm1144_vm0, %v1330_v63  ;;  %v1005_v4 = vmax.f32 %v941_v0, 0.0  ;;  %v785_v5 = vadd.f32 %v1426_v1, %v2005_v34  ;;  %v1539_v7 = vpop.f32.mrf.mxu1 }
 0x141   :  { %v1428_v8 = vpop.f32.mrf.mxu0 }
 0x142   :  { %v1331_v9 = vpack.c.bf16 %v1005_v4, %v1005_v4  ;;  %v946_v10 = vadd.f32 %v1538_v6, %v785_v5  ;;  %v1429_v11 = vadd.f32 %v1428_v8, %v1427_v3  ;;  %v1540_v12 = vpop.f32.mrf.mxu1 }
 0x143   :  { %v1430_v13 = vpop.f32.mrf.mxu0  ;;  %v1541_v16 = vadd.f32 %v1540_v12, %v1539_v7 }
 0x144   :  { %1166 = vst.msk [vmem:[%s2170_s3 + $0x54] sm:$0xf] %vm1144_vm0, %v1331_v9  ;;  %v1006_v14 = vmax.f32 %v946_v10, 0.0  ;;  %v788_v15 = vadd.f32 %v1429_v11, %v2005_v34  ;;  %v1542_v17 = vpop.f32.mrf.mxu1 }
 0x145   :  { %v1431_v18 = vpop.f32.mrf.mxu0 }
 0x146   :  { %v1332_v19 = vpack.c.bf16 %v1006_v14, %v1006_v14  ;;  %v949_v20 = vadd.f32 %v1541_v16, %v788_v15  ;;  %v1432_v21 = vadd.f32 %v1431_v18, %v1430_v13  ;;  %v1543_v22 = vpop.f32.mrf.mxu1 }
 0x147   :  { %v1433_v23 = vpop.f32.mrf.mxu0  ;;  %v1544_v26 = vadd.f32 %v1543_v22, %v1542_v17 }
 0x148   :  { %1167 = vst.msk [vmem:[%s2170_s3 + $0x58] sm:$0xf] %vm1144_vm0, %v1332_v19  ;;  %v1007_v24 = vmax.f32 %v949_v20, 0.0  ;;  %v793_v25 = vadd.f32 %v1432_v21, %v2005_v34  ;;  %v1545_v27 = vpop.f32.mrf.mxu1 }
 0x149   :  { %v1434_v28 = vpop.f32.mrf.mxu0 }
 0x14a   :  { %v1333_v29 = vpack.c.bf16 %v1007_v24, %v1007_v24  ;;  %v954_v30 = vadd.f32 %v1544_v26, %v793_v25  ;;  %v1435_v31 = vadd.f32 %v1434_v28, %v1433_v23  ;;  %v1546_v32 = vpop.f32.mrf.mxu1 }
 0x14b   :  { %v1436_v33 = vpop.f32.mrf.mxu0  ;;  %v1547_v37 = vadd.f32 %v1546_v32, %v1545_v27 }
 0x14c   :  { %1168 = vst.msk [vmem:[%s2170_s3 + $0x5c] sm:$0xf] %vm1144_vm0, %v1333_v29  ;;  %v1008_v35 = vmax.f32 %v954_v30, 0.0  ;;  %v796_v36 = vadd.f32 %v1435_v31, %v2005_v34  ;;  %v1548_v38 = vpop.f32.mrf.mxu1 }
 0x14d   :  { %v1437_v39 = vpop.f32.mrf.mxu0 }
 0x14e   :  { %v1334_v40 = vpack.c.bf16 %v1008_v35, %v1008_v35  ;;  %v957_v41 = vadd.f32 %v1547_v37, %v796_v36  ;;  %v1438_v42 = vadd.f32 %v1437_v39, %v1436_v33  ;;  %v1549_v43 = vpop.f32.mrf.mxu1 }
 0x14f   :  { %v1439_v44 = vpop.f32.mrf.mxu0  ;;  %v1550_v47 = vadd.f32 %v1549_v43, %v1548_v38 }
 0x150   :  { %1169 = vst.msk [vmem:[%s2170_s3 + $0x60] sm:$0xf] %vm1144_vm0, %v1334_v40  ;;  %v1009_v45 = vmax.f32 %v957_v41, 0.0  ;;  %v801_v46 = vadd.f32 %v1438_v42, %v2005_v34  ;;  %v1551_v48 = vpop.f32.mrf.mxu1 }
 0x151   :  { %v1440_v49 = vpop.f32.mrf.mxu0 }
 0x152   :  { %v1335_v50 = vpack.c.bf16 %v1009_v45, %v1009_v45  ;;  %v962_v51 = vadd.f32 %v1550_v47, %v801_v46  ;;  %v1441_v52 = vadd.f32 %v1440_v49, %v1439_v44  ;;  %v1552_v53 = vpop.f32.mrf.mxu1 }
 0x153   :  { %v1442_v54 = vpop.f32.mrf.mxu0  ;;  %v1553_v57 = vadd.f32 %v1552_v53, %v1551_v48 }
 0x154   :  { %1170 = vst.msk [vmem:[%s2170_s3 + $0x64] sm:$0xf] %vm1144_vm0, %v1335_v50  ;;  %v1010_v55 = vmax.f32 %v962_v51, 0.0  ;;  %v804_v56 = vadd.f32 %v1441_v52, %v2005_v34  ;;  %v1554_v58 = vpop.f32.mrf.mxu1 }
 0x155   :  { %v1443_v59 = vpop.f32.mrf.mxu0 }
 0x156   :  { %v1336_v60 = vpack.c.bf16 %v1010_v55, %v1010_v55  ;;  %v965_v61 = vadd.f32 %v1553_v57, %v804_v56  ;;  %v1444_v62 = vadd.f32 %v1443_v59, %v1442_v54  ;;  %v1555_v63 = vpop.f32.mrf.mxu1 }
 0x157   :  { %v1445_v0 = vpop.f32.mrf.mxu0  ;;  %v1556_v3 = vadd.f32 %v1555_v63, %v1554_v58 }
 0x158   :  { %1171 = vst.msk [vmem:[%s2170_s3 + $0x68] sm:$0xf] %vm1144_vm0, %v1336_v60  ;;  %v1011_v1 = vmax.f32 %v965_v61, 0.0  ;;  %v809_v2 = vadd.f32 %v1444_v62, %v2005_v34  ;;  %v1557_v4 = vpop.f32.mrf.mxu1 }
 0x159   :  { %v1446_v5 = vpop.f32.mrf.mxu0 }
 0x15a   :  { %v1337_v6 = vpack.c.bf16 %v1011_v1, %v1011_v1  ;;  %v970_v7 = vadd.f32 %v1556_v3, %v809_v2  ;;  %v1447_v8 = vadd.f32 %v1446_v5, %v1445_v0  ;;  %v1558_v9 = vpop.f32.mrf.mxu1 }
 0x15b   :  { %v1448_v10 = vpop.f32.mrf.mxu0  ;;  %v1559_v13 = vadd.f32 %v1558_v9, %v1557_v4 }
 0x15c   :  { %1172 = vst.msk [vmem:[%s2170_s3 + $0x6c] sm:$0xf] %vm1144_vm0, %v1337_v6  ;;  %v1012_v11 = vmax.f32 %v970_v7, 0.0  ;;  %v812_v12 = vadd.f32 %v1447_v8, %v2005_v34  ;;  %v1560_v14 = vpop.f32.mrf.mxu1 }
 0x15d   :  { %v1449_v15 = vpop.f32.mrf.mxu0 }
 0x15e   :  { %v1338_v16 = vpack.c.bf16 %v1012_v11, %v1012_v11  ;;  %v973_v17 = vadd.f32 %v1559_v13, %v812_v12  ;;  %v1450_v18 = vadd.f32 %v1449_v15, %v1448_v10  ;;  %v1561_v19 = vpop.f32.mrf.mxu1 }
 0x15f   :  { %v1451_v20 = vpop.f32.mrf.mxu0  ;;  %v1562_v23 = vadd.f32 %v1561_v19, %v1560_v14 }
 0x160   :  { %1173 = vst.msk [vmem:[%s2170_s3 + $0x70] sm:$0xf] %vm1144_vm0, %v1338_v16  ;;  %v1013_v21 = vmax.f32 %v973_v17, 0.0  ;;  %v817_v22 = vadd.f32 %v1450_v18, %v2005_v34  ;;  %v1563_v24 = vpop.f32.mrf.mxu1 }
 0x161   :  { %v1452_v25 = vpop.f32.mrf.mxu0 }
 0x162   :  { %v1339_v26 = vpack.c.bf16 %v1013_v21, %v1013_v21  ;;  %v978_v27 = vadd.f32 %v1562_v23, %v817_v22  ;;  %v1453_v28 = vadd.f32 %v1452_v25, %v1451_v20  ;;  %v1564_v29 = vpop.f32.mrf.mxu1 }
 0x163   :  { %v1565_v32 = vadd.f32 %v1564_v29, %v1563_v24 }
 0x164   :  { %1174 = vst.msk [vmem:[%s2170_s3 + $0x74] sm:$0xf] %vm1144_vm0, %v1339_v26  ;;  %v1014_v30 = vmax.f32 %v978_v27, 0.0  ;;  %v820_v31 = vadd.f32 %v1453_v28, %v2005_v34 }
 0x166   :  { %v1340_v33 = vpack.c.bf16 %v1014_v30, %v1014_v30  ;;  %v981_v35 = vadd.f32 %v1565_v32, %v820_v31 }
 0x168   :  { %1175 = vst.msk [vmem:[%s2170_s3 + $0x78] sm:$0xf] %vm1144_vm0, %v1340_v33  ;;  %v1015_v36 = vmax.f32 %v981_v35, 0.0 }
 0x16a   :  { %v1341_v37 = vpack.c.bf16 %v1015_v36, %v1015_v36 }
 0x16c   :  { %1176 = vst.msk [vmem:[%s2170_s3 + $0x7c] sm:$0xf] %vm1144_vm0, %v1341_v37 }

// kernel: mnist_forward.7
= control target key start
LH: loop header
LB: loop body
LE: loop exit
PB: predicated region body
PF: predicated region fallthrough
CT: control target
= control target key end

     0   :  { %vm1444_vm0 = vcmask 261120   ;;  %vm2340_vm1 = vcmask 80896   ;;  %s4246_s1 = inlined_call_operand.vmem [shape: bf16[1568,128], index: 1, kind: input, shape index: {}]   ;;  %s4247_s0 = inlined_call_operand.vmem [shape: bf16[128,1568], index: 0, kind: input, shape index: {}]   ;;  %s4248_s2 = inlined_call_operand.vmem [shape: f32[1,128], index: 2, kind: input, shape index: {}]   ;;  %s4249_s3 = inlined_call_operand.vmem [shape: bf16[128,10], index: 3, kind: input, shape index: {}]   ;;  %s4250_s4 = inlined_call_operand.vmem [shape: f32[1,10], index: 4, kind: input, shape index: {}]   ;;  %s4251_s5 = inlined_call_operand.vmem [shape: f32[128,10], index: 5, kind: output, shape index: {}]  }
   0x1   :  { %v3043_v0 = vld [vmem:[%s4246_s1 + $0x78] sm:$0xff]   ;;  %v3047_v4 = vld [vmem:[%s4246_s1 + $0x70] sm:$0xff]   ;;  %v3051_v8 = vld [vmem:[%s4246_s1 + $0x68] sm:$0xff]  }
   0x2   :  { %v3044_v1 = vld [vmem:[%s4246_s1 + $0x38] sm:$0xff]   ;;  %2581 = vmatprep.subr.bf16.mxu0 %v3043_v0  ;;  %v3048_v5 = vld [vmem:[%s4246_s1 + $0x30] sm:$0xff]   ;;  %v3052_v9 = vld [vmem:[%s4246_s1 + $0x28] sm:$0xff]  }
   0x3   :  { %v3045_v2 = vld [vmem:[%s4246_s1 + $0xf8] sm:$0xff]   ;;  %2582 = vmatpush3.bf16.msra.mxu0 %v3044_v1  ;;  %v3049_v6 = vld [vmem:[%s4246_s1 + $0xf0] sm:$0xff]   ;;  %v3053_v10 = vld [vmem:[%s4246_s1 + $0xe8] sm:$0xff]  }
   0x4   :  { %v3046_v3 = vld [vmem:[%s4246_s1 + $0xb8] sm:$0xff]   ;;  %2645 = vmatprep.subr.bf16.mxu1 %v3045_v2  ;;  %2583 = vmatprep.subr.bf16.mxu0 %v3047_v4  ;;  %v3050_v7 = vld [vmem:[%s4246_s1 + $0xb0] sm:$0xff]   ;;  %v3054_v11 = vld [vmem:[%s4246_s1 + $0xa8] sm:$0xff]  }
   0x5   :  { %2646 = vmatpush3.bf16.msra.mxu1 %v3046_v3  ;;  %v3055_v12 = vld [vmem:[%s4246_s1 + $0x60] sm:$0xff]   ;;  %v3059_v16 = vld [vmem:[%s4246_s1 + $0x58] sm:$0xff]   ;;  %v3063_v20 = vld [vmem:[%s4246_s1 + $0x50] sm:$0xff]  }
   0x6   :  { %2647 = vmatprep.subr.bf16.mxu1 %v3049_v6  ;;  %v3056_v13 = vld [vmem:[%s4246_s1 + $0x20] sm:$0xff]   ;;  %v3060_v17 = vld [vmem:[%s4246_s1 + $0x18] sm:$0xff]   ;;  %v3064_v21 = vld [vmem:[%s4246_s1 + $0x10] sm:$0xff]  }
   0x7   :  { %2584 = vmatpush3.bf16.msra.mxu0 %v3048_v5  ;;  %v3057_v14 = vld [vmem:[%s4246_s1 + $0xe0] sm:$0xff]   ;;  %v3061_v18 = vld [vmem:[%s4246_s1 + $0xd8] sm:$0xff]   ;;  %v3065_v22 = vld [vmem:[%s4246_s1 + $0xd0] sm:$0xff]  }
   0x8   :  { %2585 = vmatprep.subr.bf16.mxu0 %v3051_v8  ;;  %v3058_v15 = vld [vmem:[%s4246_s1 + $0xa0] sm:$0xff]   ;;  %v3062_v19 = vld [vmem:[%s4246_s1 + $0x98] sm:$0xff]   ;;  %v3066_v23 = vld [vmem:[%s4246_s1 + $0x90] sm:$0xff]  }
   0x9   :  { %2648 = vmatpush3.bf16.msra.mxu1 %v3050_v7  ;;  %v3067_v24 = vld [vmem:[%s4246_s1 + $0x48] sm:$0xff]   ;;  %v3071_v28 = vld [vmem:[%s4246_s1 + $0x40] sm:$0xff]   ;;  %v3078_v34 = vld [vmem:[%s4246_s1 + $0x178] sm:$0xff]  }
   0xa   :  { %2649 = vmatprep.subr.bf16.mxu1 %v3053_v10  ;;  %v3068_v25 = vld [vmem:[%s4246_s1 + $0x8] sm:$0xff]   ;;  %v3072_v29 = vld [vmem:[%s4246_s1] sm:$0xff]   ;;  %v3082_v37 = vld [vmem:[%s4246_s1 + $0x138] sm:$0xff]  }
   0xb   :  { %2586 = vmatpush3.bf16.msra.mxu0 %v3052_v9  ;;  %v3069_v26 = vld [vmem:[%s4246_s1 + $0xc8] sm:$0xff]   ;;  %v3073_v30 = vld [vmem:[%s4246_s1 + $0xc0] sm:$0xff]   ;;  %v3086_v40 = vld [vmem:[%s4246_s1 + $0x170] sm:$0xff]  }
   0xc   :  { %2587 = vmatprep.subr.bf16.mxu0 %v3055_v12  ;;  %v3070_v27 = vld [vmem:[%s4246_s1 + $0x88] sm:$0xff]   ;;  %v3074_v31 = vld [vmem:[%s4247_s0] ss:$52 sps:$4 sm:$0xff]   ;;  %v3076_v32 = vld [vmem:[%s4247_s0 + $0x4] ss:$52 sps:$4 sm:$0xff]  }
   0xd   :  { %2650 = vmatpush3.bf16.msra.mxu1 %v3054_v11  ;;  %v3077_v33 = vld [vmem:[%s4246_s1 + $0x80] sm:$0xff]   ;;  %1501 = vmatprep.mubr.bf16.mxu0 %v3076_v32  ;;  %v3079_v35 = vld [vmem:[%s4247_s0 + $0x8] ss:$52 sps:$4 sm:$0xff]   ;;  %v3089_v42 = vld [vmem:[%s4246_s1 + $0x130] sm:$0xff]  }
   0xe   :  { %2651 = vmatprep.subr.bf16.mxu1 %v3057_v14  ;;  %v3081_v36 = vld [vmem:[%s4247_s0 + $0xc] ss:$52 sps:$4 sm:$0xff]   ;;  %v3085_v39 = vld [vmem:[%s4247_s0 + $0x68] ss:$52 sps:$4 sm:$0xff]   ;;  %v3090_v43 = vld [vmem:[%s4247_s0 + $0x70] ss:$52 sps:$4 sm:$0xff]  }
   0xf   :  { %2588 = vmatpush3.bf16.msra.mxu0 %v3056_v13  ;;  %1598 = vmatprep.mubr.bf16.mxu1 %v3081_v36  ;;  %v3083_v38 = vld [vmem:[%s4247_s0 + $0x6c] ss:$52 sps:$4 sm:$0xff]   ;;  %v3087_v41 = vld [vmem:[%s4247_s0 + $0x74] ss:$52 sps:$4 sm:$0xff]   ;;  %v3095_v46 = vld [vmem:[%s4247_s0 + $0xdc] ss:$52 sps:$4 sm:$0xff]  }
  0x10   :  { %2589 = vmatprep.subr.bf16.mxu0 %v3059_v16  ;;  %v3091_v44 = vld [vmem:[%s4247_s0 + $0xd4] ss:$52 sps:$4 sm:$0xff]   ;;  %v3093_v48 = vld [vmem:[%s4247_s0 + $0xd0] ss:$52 sps:$4 sm:$0xff]   ;;  %v3098_v51 = vld [vmem:[%s4247_s0 + $0xd8] ss:$52 sps:$4 sm:$0xff]  }
  0x11   :  { %2652 = vmatpush3.bf16.msra.mxu1 %v3058_v15  ;;  %v3094_v45 = vld [vmem:[%s4246_s1 + $0x168] sm:$0xff]   ;;  %v3099_v49 = vld [vmem:[%s4247_s0 + $0x13c] ss:$52 sps:$4 sm:$0xff]   ;;  %v3102_v50 = vld [vmem:[%s4246_s1 + $0x160] sm:$0xff]  }
  0x12   :  { %2653 = vmatprep.subr.bf16.mxu1 %v3061_v18  ;;  %v3097_v47 = vld [vmem:[%s4246_s1 + $0x128] sm:$0xff]   ;;  %v3103_v52 = vld [vmem:[%s4247_s0 + $0x144] ss:$52 sps:$4 sm:$0xff]   ;;  %v3106_v59 = vld [vmem:[%s4247_s0 + $0x140] ss:$52 sps:$4 sm:$0xff]  }
  0x13   :  { %2590 = vmatpush3.bf16.msra.mxu0 %v3060_v17  ;;  %v3105_v53 = vld [vmem:[%s4246_s1 + $0x120] sm:$0xff]   ;;  %v3107_v54 = vld [vmem:[%s4246_s1 + $0x1f8] sm:$0xff]   ;;  %v3117_v62 = vld [vmem:[%s4246_s1 + $0x1f0] sm:$0xff]  }
  0x14   :  { %2591 = vmatprep.subr.bf16.mxu0 %v3063_v20  ;;  %v3108_v55 = vld [vmem:[%s4246_s1 + $0x1b8] sm:$0xff]   ;;  %v3113_v61 = vld [vmem:[%s4247_s0 + $0x1ac] ss:$52 sps:$4 sm:$0xff]   ;;  %v3118_v63 = vld [vmem:[%s4246_s1 + $0x1b0] sm:$0xff]  }
  0x15   :  { %2654 = vmatpush3.bf16.msra.mxu1 %v3062_v19  ;;  %v3101_v56 = vld [vmem:[%s4247_s0 + $0x138] ss:$52 sps:$4 sm:$0xff]   ;;  %v3122_v0 = vld [vmem:[%s4246_s1 + $0x150] sm:$0xff]   ;;  %v3116_v4 = vld [vmem:[%s4247_s0 + $0x1a8] ss:$52 sps:$4 sm:$0xff]  }
  0x16   :  { %2655 = vmatprep.subr.bf16.mxu1 %v3065_v22  ;;  %v3112_v57 = vld [vmem:[%s4246_s1 + $0x158] sm:$0xff]   ;;  %v3111_v1 = vld [vmem:[%s4247_s0 + $0x1a0] ss:$52 sps:$4 sm:$0xff]   ;;  %v3127_v5 = vld [vmem:[%s4246_s1 + $0x1e8] sm:$0xff]  }
  0x17   :  { %2592 = vmatpush3.bf16.msra.mxu0 %v3064_v21  ;;  %v3109_v58 = vld [vmem:[%s4247_s0 + $0x1a4] ss:$52 sps:$4 sm:$0xff]   ;;  %v3119_v2 = vld [vmem:[%s4247_s0 + $0x20c] ss:$52 sps:$4 sm:$0xff]   ;;  %v3125_v3 = vld [vmem:[%s4246_s1 + $0x110] sm:$0xff]  }
  0x18   :  { %2593 = vmatprep.subr.bf16.mxu0 %v3067_v24  ;;  %v3115_v60 = vld [vmem:[%s4246_s1 + $0x118] sm:$0xff]   ;;  %v3128_v6 = vld [vmem:[%s4246_s1 + $0x1a8] sm:$0xff]   ;;  %v3129_v7 = vld [vmem:[%s4246_s1 + $0x1e0] sm:$0xff]  }
  0x19   :  { %2656 = vmatpush3.bf16.msra.mxu1 %v3066_v23  ;;  %v3123_v8 = vld [vmem:[%s4247_s0 + $0x214] ss:$52 sps:$4 sm:$0xff]   ;;  %v3132_v9 = vld [vmem:[%s4246_s1 + $0x1a0] sm:$0xff]   ;;  %v3135_v15 = vld [vmem:[%s4247_s0 + $0x27c] ss:$52 sps:$4 sm:$0xff]  }
  0x1a   :  { %2657 = vmatprep.subr.bf16.mxu1 %v3069_v26  ;;  %v3134_v10 = vld [vmem:[%s4246_s1 + $0x148] sm:$0xff]   ;;  %v3126_v12 = vld [vmem:[%s4247_s0 + $0x210] ss:$52 sps:$4 sm:$0xff]   ;;  %v3139_v16 = vld [vmem:[%s4246_s1 + $0x1d8] sm:$0xff]  }
  0x1b   :  { %2594 = vmatpush3.bf16.msra.mxu0 %v3068_v25  ;;  %v3121_v11 = vld [vmem:[%s4247_s0 + $0x208] ss:$52 sps:$4 sm:$0xff]   ;;  %v3141_v18 = vld [vmem:[%s4246_s1 + $0x1d0] sm:$0xff]   ;;  %v3146_v21 = vld [vmem:[%s4246_s1 + $0x140] sm:$0xff]  }
  0x1c   :  { %2595 = vmatprep.subr.bf16.mxu0 %v3071_v28  ;;  %v3130_v13 = vld [vmem:[%s4247_s0 + $0x274] ss:$52 sps:$4 sm:$0xff]   ;;  %v3140_v17 = vld [vmem:[%s4246_s1 + $0x198] sm:$0xff]   ;;  %v3133_v19 = vld [vmem:[%s4247_s0 + $0x270] ss:$52 sps:$4 sm:$0xff]  }
  0x1d   :  { %2658 = vmatpush3.bf16.msra.mxu1 %v3070_v27  ;;  %v3137_v14 = vld [vmem:[%s4246_s1 + $0x108] sm:$0xff]   ;;  %v3144_v20 = vld [vmem:[%s4246_s1 + $0x190] sm:$0xff]   ;;  %v3149_v24 = vld [vmem:[%s4246_s1 + $0x100] sm:$0xff]  }
  0x1e   :  { %2659 = vmatprep.subr.bf16.mxu1 %v3073_v30  ;;  %v3142_v22 = vld [vmem:[%s4247_s0 + $0x2dc] ss:$52 sps:$4 sm:$0xff]   ;;  %v3138_v23 = vld [vmem:[%s4247_s0 + $0x278] ss:$52 sps:$4 sm:$0xff]   ;;  %v3153_v28 = vld [vmem:[%s4246_s1 + $0x1c0] sm:$0xff]  }
  0x1f   :  { %2596 = vmatpush3.bf16.msra.mxu0 %v3072_v29  ;;  %v3147_v25 = vld [vmem:[%s4247_s0 + $0x2e4] ss:$52 sps:$4 sm:$0xff]   ;;  %v3151_v26 = vld [vmem:[%s4246_s1 + $0x1c8] sm:$0xff]  }
  0x20   :  { %2709 = vmatprep.subr.bf16.mxu0 %v3078_v34  ;;  %v3152_v27 = vld [vmem:[%s4246_s1 + $0x188] sm:$0xff]   ;;  %v3157_v30 = vld [vmem:[%s4246_s1 + $0x180] sm:$0xff]   ;;  %v3161_v34 = vld [vmem:[%s4247_s0 + $0x1c] ss:$52 sps:$4 sm:$0xff]  }
  0x21   :  { %2660 = vmatpush3.bf16.msra.mxu1 %v3077_v33  ;;  %v3145_v29 = vld [vmem:[%s4247_s0 + $0x2d8] ss:$52 sps:$4 sm:$0xff]   ;;  %v3156_v32 = vld [vmem:[%s4247_s0 + $0x14] ss:$52 sps:$4 sm:$0xff]  }
  0x22   :  { %1502 = vmatmul.mubr.bf16.vlgmr.msra.gmra.mxu0 %v3074_v31  ;;  %2773 = vmatprep.subr.bf16.mxu1 %v3107_v54  ;;  %v3158_v31 = vld [vmem:[%s4246_s1 + $0x278] sm:$0xff]   ;;  %v3150_v33 = vld [vmem:[%s4247_s0 + $0x2e0] ss:$52 sps:$4 sm:$0xff]  }
  0x23   :  { %2710 = vmatpush3.bf16.msra.mxu0 %v3082_v37  ;;  %1509 = vmatprep.mubr.bf16.mxu0 %v3083_v38  ;;  %v3162_v36 = vld [vmem:[%s4246_s1 + $0x238] sm:$0xff]   ;;  %v3166_v38 = vld [vmem:[%s4246_s1 + $0x270] sm:$0xff]   ;;  %v3179_v54 = vld [vmem:[%s4247_s0 + $0x14c] ss:$52 sps:$4 sm:$0xff]  }
  0x24   :  { %1599 = vmatmul.mubr.bf16.vlgmr.msra.gmra.mxu1 %v3079_v35  ;;  %2711 = vmatprep.subr.bf16.mxu0 %v3086_v40  ;;  %v3154_v35 = vld [vmem:[%s4247_s0 + $0x10] ss:$52 sps:$4 sm:$0xff]  }
  0x25   :  { %1606 = vmatprep.mubr.bf16.mxu1 %v3087_v41  ;;  %2774 = vmatpush3.bf16.msra.mxu1 %v3108_v55  ;;  %v3163_v37 = vld [vmem:[%s4247_s0 + $0x7c] ss:$52 sps:$4 sm:$0xff]   ;;  %v3167_v40 = vld [vmem:[%s4247_s0 + $0x84] ss:$52 sps:$4 sm:$0xff]  }
  0x26   :  { %2775 = vmatprep.subr.bf16.mxu1 %v3117_v62  ;;  %v3169_v41 = vld [vmem:[%s4246_s1 + $0x230] sm:$0xff]   ;;  %v3195_v55 = vld [vmem:[%s4246_s1 + $0x218] sm:$0xff]  }
  0x27   :  { %2712 = vmatpush3.bf16.msra.mxu0 %v3089_v42  ;;  %v3165_v42 = vld [vmem:[%s4247_s0 + $0x78] ss:$52 sps:$4 sm:$0xff]   ;;  %v3181_v62 = vld [vmem:[%s4247_s0 + $0x148] ss:$52 sps:$4 sm:$0xff]  }
  0x28   :  { %2713 = vmatprep.subr.bf16.mxu0 %v3094_v45  ;;  %v3177_v45 = vld [vmem:[%s4246_s1 + $0x228] sm:$0xff]  }
  0x29   :  { %2776 = vmatpush3.bf16.msra.mxu1 %v3118_v63  ;;  %v3189_v63 = vld [vmem:[%s4247_s0 + $0x1b4] ss:$52 sps:$4 sm:$0xff]  }
  0x2a   :  { %1510 = vmatmul.mubr.bf16.gmra.mxu0 %v3085_v39  ;;  %2777 = vmatprep.subr.bf16.mxu1 %v3127_v5  ;;  %v3159_v39 = vld [vmem:[%s4247_s0 + $0x18] ss:$52 sps:$4 sm:$0xff]   ;;  %v3212_v5 = vld [vmem:[%s4246_s1 + $0x2a0] sm:$0xff]  }
  0x2b   :  { %1517 = vmatprep.mubr.bf16.mxu0 %v3091_v44  ;;  %2714 = vmatpush3.bf16.msra.mxu0 %v3097_v47  ;;  %v3171_v44 = vld [vmem:[%s4247_s0 + $0xe4] ss:$52 sps:$4 sm:$0xff]  }
  0x2c   :  { %1607 = vmatmul.mubr.bf16.gmra.mxu1 %v3090_v43  ;;  %2715 = vmatprep.subr.bf16.mxu0 %v3102_v50  ;;  %v3174_v43 = vld [vmem:[%s4246_s1 + $0x268] sm:$0xff]   ;;  %v3187_v47 = vld [vmem:[%s4246_s1 + $0x2f8] sm:$0xff]  }
  0x2d   :  { %1614 = vmatprep.mubr.bf16.mxu1 %v3095_v46  ;;  %2778 = vmatpush3.bf16.msra.mxu1 %v3128_v6  ;;  %v3182_v46 = vld [vmem:[%s4246_s1 + $0x260] sm:$0xff]   ;;  %v3214_v6 = vld [vmem:[%s4246_s1 + $0x248] sm:$0xff]  }
  0x2e   :  { %2779 = vmatprep.subr.bf16.mxu1 %v3129_v7  ;;  %v3175_v50 = vld [vmem:[%s4247_s0 + $0xec] ss:$52 sps:$4 sm:$0xff]   ;;  %v3191_v7 = vld [vmem:[%s4247_s0 + $0x1b0] ss:$52 sps:$4 sm:$0xff]  }
  0x2f   :  { %2716 = vmatpush3.bf16.msra.mxu0 %v3105_v53  ;;  %v3192_v53 = vld [vmem:[%s4246_s1 + $0x258] sm:$0xff]  }
  0x30   :  { %2717 = vmatprep.subr.bf16.mxu0 %v3112_v57  ;;  %v3198_v57 = vld [vmem:[%s4246_s1 + $0x2b0] sm:$0xff]  }
  0x31   :  { %2780 = vmatpush3.bf16.msra.mxu1 %v3132_v9  ;;  %v3199_v9 = vld [vmem:[%s4247_s0 + $0x21c] ss:$52 sps:$4 sm:$0xff]  }
  0x32   :  { %1518 = vmatmul.mubr.bf16.gmra.mxu0 %v3093_v48  ;;  %2781 = vmatprep.subr.bf16.mxu1 %v3139_v16  ;;  %v3188_v48 = vld [vmem:[%s4246_s1 + $0x2b8] sm:$0xff]   ;;  %v3226_v16 = vld [vmem:[%s4246_s1 + $0x240] sm:$0xff]  }
  0x33   :  { %1525 = vmatprep.mubr.bf16.mxu0 %v3099_v49  ;;  %2718 = vmatpush3.bf16.msra.mxu0 %v3115_v60  ;;  %v3170_v49 = vld [vmem:[%s4247_s0 + $0x80] ss:$52 sps:$4 sm:$0xff]  }
  0x34   :  { %1615 = vmatmul.mubr.bf16.gmra.mxu1 %v3098_v51  ;;  %2719 = vmatprep.subr.bf16.mxu0 %v3122_v0  ;;  %v3185_v51 = vld [vmem:[%s4246_s1 + $0x220] sm:$0xff]   ;;  %v3183_v60 = vld [vmem:[%s4247_s0 + $0x154] ss:$52 sps:$4 sm:$0xff]  }
  0x35   :  { %1622 = vmatprep.mubr.bf16.mxu1 %v3103_v52  ;;  %2782 = vmatpush3.bf16.msra.mxu1 %v3140_v17  ;;  %v3173_v52 = vld [vmem:[%s4247_s0 + $0xe0] ss:$52 sps:$4 sm:$0xff]   ;;  %v3207_v0 = vld [vmem:[%s4246_s1 + $0x2e8] sm:$0xff]  }
  0x36   :  { %2783 = vmatprep.subr.bf16.mxu1 %v3141_v18  ;;  %v3201_v17 = vld [vmem:[%s4247_s0 + $0x218] ss:$52 sps:$4 sm:$0xff]  }
  0x37   :  { %2720 = vmatpush3.bf16.msra.mxu0 %v3125_v3  ;;  %v3186_v3 = vld [vmem:[%s4247_s0 + $0x150] ss:$52 sps:$4 sm:$0xff]  }
  0x38   :  { %2721 = vmatprep.subr.bf16.mxu0 %v3134_v10  ;;  %v3219_v10 = vld [vmem:[%s4246_s1 + $0x2d8] sm:$0xff]  }
  0x39   :  { %2784 = vmatpush3.bf16.msra.mxu1 %v3144_v20  ;;  %v3210_v18 = vld [vmem:[%s4247_s0 + $0x284] ss:$52 sps:$4 sm:$0xff]   ;;  %v3231_v20 = vld [vmem:[%s4246_s1 + $0x2c8] sm:$0xff]  }
  0x3a   :  { %1526 = vmatmul.mubr.bf16.gmra.mxu0 %v3101_v56  ;;  %2785 = vmatprep.subr.bf16.mxu1 %v3151_v26  ;;  %v3197_v56 = vld [vmem:[%s4246_s1 + $0x2f0] sm:$0xff]   ;;  %v3238_v26 = vld [vmem:[%s4246_s1 + $0x308] sm:$0xff]  }
  0x3b   :  { %1533 = vmatprep.mubr.bf16.mxu0 %v3109_v58  ;;  %2722 = vmatpush3.bf16.msra.mxu0 %v3137_v14  ;;  %v3178_v58 = vld [vmem:[%s4247_s0 + $0xe8] ss:$52 sps:$4 sm:$0xff]   ;;  %v3224_v14 = vld [vmem:[%s4246_s1 + $0x290] sm:$0xff]  }
  0x3c   :  { %1623 = vmatmul.mubr.bf16.gmra.mxu1 %v3106_v59  ;;  %2723 = vmatprep.subr.bf16.mxu0 %v3146_v21  ;;  %v3202_v59 = vld [vmem:[%s4246_s1 + $0x250] sm:$0xff]   ;;  %v3232_v21 = vld [vmem:[%s4246_s1 + $0x288] sm:$0xff]  }
  0x3d   :  { %1630 = vmatprep.mubr.bf16.mxu1 %v3113_v61  ;;  %2786 = vmatpush3.bf16.msra.mxu1 %v3152_v27  ;;  %v3205_v61 = vld [vmem:[%s4246_s1 + $0x210] sm:$0xff]  }
  0x3e   :  { %2787 = vmatprep.subr.bf16.mxu1 %v3153_v28  ;;  %v3213_v27 = vld [vmem:[%s4247_s0 + $0x280] ss:$52 sps:$4 sm:$0xff]  }
  0x3f   :  { %2724 = vmatpush3.bf16.msra.mxu0 %v3149_v24  ;;  %v3215_v24 = vld [vmem:[%s4247_s0 + $0x28c] ss:$52 sps:$4 sm:$0xff]  }
  0x40   :  { %2837 = vmatprep.subr.bf16.mxu0 %v3158_v31  ;;  %v3222_v28 = vld [vmem:[%s4247_s0 + $0x2ec] ss:$52 sps:$4 sm:$0xff]   ;;  %v3225_v31 = vld [vmem:[%s4247_s0 + $0x2e8] ss:$52 sps:$4 sm:$0xff]  }
  0x41   :  { %2788 = vmatpush3.bf16.msra.mxu1 %v3157_v30  ;;  %v3227_v30 = vld [vmem:[%s4247_s0 + $0x2f4] ss:$52 sps:$4 sm:$0xff]  }
  0x42   :  { %1534 = vmatmul.mubr.bf16.gmra.mxu0 %v3111_v1  ;;  %2901 = vmatprep.subr.bf16.mxu1 %v3187_v47  ;;  %v3208_v1 = vld [vmem:[%s4246_s1 + $0x2a8] sm:$0xff]   ;;  %v3257_v47 = vld [vmem:[%s4247_s0 + $0x164] ss:$52 sps:$4 sm:$0xff]  }
  0x43   :  { %1541 = vmatprep.mubr.bf16.mxu0 %v3119_v2  ;;  %v3209_v2 = vld [vmem:[%s4246_s1 + $0x2e0] sm:$0xff]  }
  0x44   :  { %1631 = vmatmul.mubr.bf16.gmra.mxu1 %v3116_v4  ;;  %v3193_v4 = vld [vmem:[%s4247_s0 + $0x1bc] ss:$52 sps:$4 sm:$0xff]  }
  0x45   :  { %1638 = vmatprep.mubr.bf16.mxu1 %v3123_v8  ;;  %v3217_v8 = vld [vmem:[%s4246_s1 + $0x208] sm:$0xff]  }
  0x4a   :  { %1542 = vmatmul.mubr.bf16.gmra.mxu0 %v3121_v11  ;;  %v3220_v11 = vld [vmem:[%s4246_s1 + $0x298] sm:$0xff]  }
  0x4b   :  { %1549 = vmatprep.mubr.bf16.mxu0 %v3130_v13  ;;  %v3196_v13 = vld [vmem:[%s4247_s0 + $0x1b8] ss:$52 sps:$4 sm:$0xff]  }
  0x4c   :  { %1639 = vmatmul.mubr.bf16.gmra.mxu1 %v3126_v12  ;;  %v3221_v12 = vld [vmem:[%s4246_s1 + $0x2d0] sm:$0xff]  }
  0x4d   :  { %1646 = vmatprep.mubr.bf16.mxu1 %v3135_v15  ;;  %v3203_v15 = vld [vmem:[%s4247_s0 + $0x224] ss:$52 sps:$4 sm:$0xff]  }
  0x52   :  { %1550 = vmatmul.mubr.bf16.gmra.mxu0 %v3133_v19  ;;  %v3229_v19 = vld [vmem:[%s4246_s1 + $0x200] sm:$0xff]  }
  0x53   :  { %1557 = vmatprep.mubr.bf16.mxu0 %v3142_v22  ;;  %v3233_v22 = vld [vmem:[%s4246_s1 + $0x2c0] sm:$0xff]  }
  0x54   :  { %1647 = vmatmul.mubr.bf16.gmra.mxu1 %v3138_v23  ;;  %v3206_v23 = vld [vmem:[%s4247_s0 + $0x220] ss:$52 sps:$4 sm:$0xff]  }
  0x55   :  { %1654 = vmatprep.mubr.bf16.mxu1 %v3147_v25  ;;  %v3237_v25 = vld [vmem:[%s4246_s1 + $0x280] sm:$0xff]  }
  0x5a   :  { %1558 = vmatmul.mubr.bf16.gmra.mxu0 %v3145_v29  ;;  %v3218_v29 = vld [vmem:[%s4247_s0 + $0x288] ss:$52 sps:$4 sm:$0xff]  }
  0x5b   :  { %1695 = vmatprep.mubr.bf16.mxu0 %v3156_v32  ;;  %v3236_v32 = vld [vmem:[%s4247_s0 + $0x24] ss:$52 sps:$4 sm:$0xff]  }
  0x5c   :  { %1655 = vmatmul.mubr.bf16.gmra.mxu1 %v3150_v33  ;;  %v3230_v33 = vld [vmem:[%s4247_s0 + $0x2f0] ss:$52 sps:$4 sm:$0xff]  }
  0x5d   :  { %1792 = vmatprep.mubr.bf16.mxu1 %v3161_v34  ;;  %v3241_v34 = vld [vmem:[%s4247_s0 + $0x2c] ss:$52 sps:$4 sm:$0xff]  }
  0x62   :  { %1696 = vmatmul.mubr.bf16.vlgmr.msra.gmra.mxu0 %v3154_v35  ;;  %v3234_v35 = vld [vmem:[%s4247_s0 + $0x20] ss:$52 sps:$4 sm:$0xff]  }
  0x63   :  { %2838 = vmatpush3.bf16.msra.mxu0 %v3162_v36  ;;  %1703 = vmatprep.mubr.bf16.mxu0 %v3163_v37  ;;  %v3242_v36 = vld [vmem:[%s4247_s0 + $0x8c] ss:$52 sps:$4 sm:$0xff]  }
  0x64   :  { %2839 = vmatprep.subr.bf16.mxu0 %v3166_v38  ;;  %1793 = vmatmul.mubr.bf16.vlgmr.msra.gmra.mxu1 %v3159_v39  ;;  %v3263_v37 = vld [vmem:[%s4246_s1 + $0x300] sm:$0xff]   ;;  %v3239_v38 = vld [vmem:[%s4247_s0 + $0x28] ss:$52 sps:$4 sm:$0xff]  }
  0x65   :  { %1800 = vmatprep.mubr.bf16.mxu1 %v3167_v40  ;;  %2902 = vmatpush3.bf16.msra.mxu1 %v3188_v48  ;;  %v3245_v39 = vld [vmem:[%s4247_s0 + $0x94] ss:$52 sps:$4 sm:$0xff]   ;;  %v3256_v48 = vld [vmem:[%s4247_s0 + $0x158] ss:$52 sps:$4 sm:$0xff]  }
  0x66   :  { %2903 = vmatprep.subr.bf16.mxu1 %v3197_v56  ;;  %v3244_v40 = vld [vmem:[%s4247_s0 + $0x88] ss:$52 sps:$4 sm:$0xff]  }
  0x67   :  { %2840 = vmatpush3.bf16.msra.mxu0 %v3169_v41  ;;  %v3248_v41 = vld [vmem:[%s4247_s0 + $0xf4] ss:$52 sps:$4 sm:$0xff]  }
  0x68   :  { %2841 = vmatprep.subr.bf16.mxu0 %v3174_v43  ;;  %v3251_v43 = vld [vmem:[%s4247_s0 + $0xfc] ss:$52 sps:$4 sm:$0xff]  }
  0x69   :  { %2904 = vmatpush3.bf16.msra.mxu1 %v3198_v57  ;;  %v3269_v56 = vld [vmem:[%s4247_s0 + $0x228] ss:$52 sps:$4 sm:$0xff]  }
  0x6a   :  { %1704 = vmatmul.mubr.bf16.gmra.mxu0 %v3165_v42  ;;  %2905 = vmatprep.subr.bf16.mxu1 %v3207_v0  ;;  %v3247_v42 = vld [vmem:[%s4247_s0 + $0x90] ss:$52 sps:$4 sm:$0xff]   ;;  %v3273_v57 = vld [vmem:[%s4247_s0 + $0x294] ss:$52 sps:$4 sm:$0xff]   ;;  %v3281_v0 = vld [vmem:[%s4247_s0 + $0x2f8] ss:$52 sps:$4 sm:$0xff]  }
  0x6b   :  { %1711 = vmatprep.mubr.bf16.mxu0 %v3171_v44  ;;  %2842 = vmatpush3.bf16.msra.mxu0 %v3177_v45  ;;  %v3250_v44 = vld [vmem:[%s4247_s0 + $0xf0] ss:$52 sps:$4 sm:$0xff]  }
  0x6c   :  { %2843 = vmatprep.subr.bf16.mxu0 %v3182_v46  ;;  %1801 = vmatmul.mubr.bf16.gmra.mxu1 %v3170_v49  ;;  %v3254_v45 = vld [vmem:[%s4247_s0 + $0x15c] ss:$52 sps:$4 sm:$0xff]   ;;  %v3253_v46 = vld [vmem:[%s4247_s0 + $0xf8] ss:$52 sps:$4 sm:$0xff]  }
  0x6d   :  { %1808 = vmatprep.mubr.bf16.mxu1 %v3175_v50  ;;  %2906 = vmatpush3.bf16.msra.mxu1 %v3208_v1  ;;  %v3260_v49 = vld [vmem:[%s4247_s0 + $0x1c4] ss:$52 sps:$4 sm:$0xff]   ;;  %v3259_v50 = vld [vmem:[%s4247_s0 + $0x160] ss:$52 sps:$4 sm:$0xff]  }
  0x6e   :  { %2907 = vmatprep.subr.bf16.mxu1 %v3209_v2  ;;  %v3285_v1 = vld [vmem:[%s4247_s0 + $0x30] ss:$52 sps:$4 sm:$0xff]   ;;  %v3284_v2 = vld [vmem:[%s4247_s0 + $0x300] ss:$52 sps:$4 sm:$0xff]  }
  0x6f   :  { %2844 = vmatpush3.bf16.msra.mxu0 %v3185_v51  ;;  %v3264_v51 = vld [vmem:[%s4247_s0 + $0x1cc] ss:$52 sps:$4 sm:$0xff]  }
  0x70   :  { %2845 = vmatprep.subr.bf16.mxu0 %v3192_v53  ;;  %v3267_v53 = vld [vmem:[%s4247_s0 + $0x22c] ss:$52 sps:$4 sm:$0xff]  }
  0x71   :  { %2908 = vmatpush3.bf16.msra.mxu1 %v3212_v5 }
  0x72   :  { %1712 = vmatmul.mubr.bf16.gmra.mxu0 %v3173_v52  ;;  %2909 = vmatprep.subr.bf16.mxu1 %v3219_v10  ;;  %v3262_v52 = vld [vmem:[%s4247_s0 + $0x1c0] ss:$52 sps:$4 sm:$0xff]  }
  0x73   :  { %1719 = vmatprep.mubr.bf16.mxu0 %v3179_v54  ;;  %2846 = vmatpush3.bf16.msra.mxu0 %v3195_v55  ;;  %v3266_v54 = vld [vmem:[%s4247_s0 + $0x1c8] ss:$52 sps:$4 sm:$0xff]  }
  0x74   :  { %2847 = vmatprep.subr.bf16.mxu0 %v3202_v59  ;;  %1809 = vmatmul.mubr.bf16.gmra.mxu1 %v3178_v58  ;;  %v3270_v55 = vld [vmem:[%s4247_s0 + $0x234] ss:$52 sps:$4 sm:$0xff]   ;;  %v3272_v58 = vld [vmem:[%s4247_s0 + $0x230] ss:$52 sps:$4 sm:$0xff]  }
  0x75   :  { %1816 = vmatprep.mubr.bf16.mxu1 %v3183_v60  ;;  %2910 = vmatpush3.bf16.msra.mxu1 %v3220_v11  ;;  %v3276_v59 = vld [vmem:[%s4247_s0 + $0x29c] ss:$52 sps:$4 sm:$0xff]  }
  0x76   :  { %2911 = vmatprep.subr.bf16.mxu1 %v3221_v12  ;;  %v3275_v60 = vld [vmem:[%s4247_s0 + $0x290] ss:$52 sps:$4 sm:$0xff]   ;;  %v3288_v11 = vld [vmem:[%s4247_s0 + $0x168] ss:$52 sps:$4 sm:$0xff]  }
  0x77   :  { %2848 = vmatpush3.bf16.msra.mxu0 %v3205_v61  ;;  %v3279_v61 = vld [vmem:[%s4247_s0 + $0x2fc] ss:$52 sps:$4 sm:$0xff]  }
  0x78   :  { %2849 = vmatprep.subr.bf16.mxu0 %v3214_v6  ;;  %v3928_v6 = vld [vmem:[%s4248_s2] ss:$0 sm:$0xff] }
  0x79   :  { %2912 = vmatpush3.bf16.msra.mxu1 %v3224_v14  ;;  %v3289_v14 = vld [vmem:[%s4247_s0 + $0x1d0] ss:$52 sps:$4 sm:$0xff]  }
  0x7a   :  { %1720 = vmatmul.mubr.bf16.gmra.mxu0 %v3181_v62  ;;  %2913 = vmatprep.subr.bf16.mxu1 %v3231_v20  ;;  %v3278_v62 = vld [vmem:[%s4247_s0 + $0x298] ss:$52 sps:$4 sm:$0xff]  }
  0x7b   :  { %1727 = vmatprep.mubr.bf16.mxu0 %v3189_v63  ;;  %2850 = vmatpush3.bf16.msra.mxu0 %v3217_v8  ;;  %v3282_v63 = vld [vmem:[%s4247_s0 + $0x304] ss:$52 sps:$4 sm:$0xff]  }
  0x7c   :  { %1817 = vmatmul.mubr.bf16.gmra.mxu1 %v3186_v3  ;;  %2851 = vmatprep.subr.bf16.mxu0 %v3226_v16  ;;  %v3286_v3 = vld [vmem:[%s4247_s0 + $0x98] ss:$52 sps:$4 sm:$0xff]  }
  0x7d   :  { %1824 = vmatprep.mubr.bf16.mxu1 %v3193_v4  ;;  %2914 = vmatpush3.bf16.msra.mxu1 %v3232_v21  ;;  %v3287_v4 = vld [vmem:[%s4247_s0 + $0x100] ss:$52 sps:$4 sm:$0xff]  }
  0x7e   :  { %2915 = vmatprep.subr.bf16.mxu1 %v3233_v22 }
  0x7f   :  { %2852 = vmatpush3.bf16.msra.mxu0 %v3229_v19 }
  0x80   :  { %2991 = vmatprep.subr.bf16.mxu0 %v3238_v26 }
  0x81   :  { %2916 = vmatpush3.bf16.msra.mxu1 %v3237_v25 }
  0x82   :  { %1728 = vmatmul.mubr.bf16.gmra.mxu0 %v3191_v7 }
  0x83   :  { %1735 = vmatprep.mubr.bf16.mxu0 %v3199_v9 }
  0x84   :  { %1825 = vmatmul.mubr.bf16.gmra.mxu1 %v3196_v13 }
  0x85   :  { %1832 = vmatprep.mubr.bf16.mxu1 %v3203_v15 }
  0x8a   :  { %1736 = vmatmul.mubr.bf16.gmra.mxu0 %v3201_v17 }
  0x8b   :  { %1743 = vmatprep.mubr.bf16.mxu0 %v3210_v18 }
  0x8c   :  { %1833 = vmatmul.mubr.bf16.gmra.mxu1 %v3206_v23 }
  0x8d   :  { %1840 = vmatprep.mubr.bf16.mxu1 %v3215_v24 }
  0x92   :  { %1744 = vmatmul.mubr.bf16.gmra.mxu0 %v3213_v27 }
  0x93   :  { %1751 = vmatprep.mubr.bf16.mxu0 %v3222_v28 }
  0x94   :  { %1841 = vmatmul.mubr.bf16.gmra.mxu1 %v3218_v29  ;;  %v3290_v29 = vld [vmem:[%s4247_s0 + $0x238] ss:$52 sps:$4 sm:$0xff]  }
  0x95   :  { %1848 = vmatprep.mubr.bf16.mxu1 %v3227_v30 }
  0x9a   :  { %1752 = vmatmul.mubr.bf16.gmra.mxu0 %v3225_v31 }
  0x9b   :  { %1889 = vmatprep.mubr.bf16.mxu0 %v3236_v32  ;;  %v3291_v32 = vld [vmem:[%s4247_s0 + $0x2a0] ss:$52 sps:$4 sm:$0xff]  }
  0x9c   :  { %1849 = vmatmul.mubr.bf16.gmra.mxu1 %v3230_v33 }
  0x9d   :  { %1986 = vmatprep.mubr.bf16.mxu1 %v3241_v34 }
  0xa2   :  { %1890 = vmatmul.mubr.bf16.vlgmr.msra.gmra.mxu0 %v3234_v35 }
  0xa3   :  { %2992 = vmatpush3.bf16.msra.mxu0 %v3238_v26  ;;  %1897 = vmatprep.mubr.bf16.mxu0 %v3242_v36 }
  0xa4   :  { %2993 = vmatprep.subr.bf16.mxu0 %v3263_v37  ;;  %1987 = vmatmul.mubr.bf16.vlgmr.msra.gmra.mxu1 %v3239_v38 }
  0xa5   :  { %1994 = vmatprep.mubr.bf16.mxu1 %v3245_v39 }
  0xa7   :  { %2994 = vmatpush3.bf16.msra.mxu0 %v3263_v37 }
  0xaa   :  { %1898 = vmatmul.mubr.bf16.gmra.mxu0 %v3244_v40 }
  0xab   :  { %1905 = vmatprep.mubr.bf16.mxu0 %v3248_v41 }
  0xac   :  { %1995 = vmatmul.mubr.bf16.gmra.mxu1 %v3247_v42 }
  0xad   :  { %2002 = vmatprep.mubr.bf16.mxu1 %v3251_v43  ;;  %v3292_v43 = vld [vmem:[%s4247_s0 + $0x308] ss:$52 sps:$4 sm:$0xff]  }
  0xb2   :  { %1906 = vmatmul.mubr.bf16.gmra.mxu0 %v3250_v44  ;;  %v3293_v44 = vld [vmem:[%s4249_s3 + $0x38] sm:$0xff]  }
  0xb3   :  { %1913 = vmatprep.mubr.bf16.mxu0 %v3254_v45  ;;  %3011 = vmatprep.subr.bf16.mxu1 %v3293_v44 }
  0xb4   :  { %2003 = vmatmul.mubr.bf16.gmra.mxu1 %v3253_v46 }
  0xb5   :  { %2010 = vmatprep.mubr.bf16.mxu1 %v3257_v47  ;;  %3012 = vmatpush3.bf16.msra.mxu1 %v3293_v44 }
  0xba   :  { %1914 = vmatmul.mubr.bf16.gmra.mxu0 %v3256_v48 }
  0xbb   :  { %1921 = vmatprep.mubr.bf16.mxu0 %v3260_v49 }
  0xbc   :  { %2011 = vmatmul.mubr.bf16.gmra.mxu1 %v3259_v50 }
  0xbd   :  { %2018 = vmatprep.mubr.bf16.mxu1 %v3264_v51 }
  0xc2   :  { %1922 = vmatmul.mubr.bf16.gmra.mxu0 %v3262_v52 }
  0xc3   :  { %1929 = vmatprep.mubr.bf16.mxu0 %v3267_v53 }
  0xc4   :  { %2019 = vmatmul.mubr.bf16.gmra.mxu1 %v3266_v54 }
  0xc5   :  { %2026 = vmatprep.mubr.bf16.mxu1 %v3270_v55 }
  0xca   :  { %1930 = vmatmul.mubr.bf16.gmra.mxu0 %v3269_v56 }
  0xcb   :  { %1937 = vmatprep.mubr.bf16.mxu0 %v3273_v57 }
  0xcc   :  { %2027 = vmatmul.mubr.bf16.gmra.mxu1 %v3272_v58 }
  0xcd   :  { %2034 = vmatprep.mubr.bf16.mxu1 %v3276_v59  ;;  %v3294_v59 = vld [vmem:[%s4249_s3 + $0x30] sm:$0xff]  }
  0xce   :  { %3013 = vmatprep.subr.bf16.mxu1 %v3294_v59 }
  0xcf   :  { %3014 = vmatpush3.bf16.msra.mxu1 %v3294_v59 }
  0xd2   :  { %1938 = vmatmul.mubr.bf16.gmra.mxu0 %v3275_v60 }
  0xd3   :  { %1945 = vmatprep.mubr.bf16.mxu0 %v3279_v61 }
  0xd4   :  { %2035 = vmatmul.mubr.bf16.gmra.mxu1 %v3278_v62 }
  0xd5   :  { %2042 = vmatprep.mubr.bf16.mxu1 %v3282_v63 }
  0xda   :  { %1946 = vmatmul.mubr.bf16.gmra.mxu0 %v3281_v0 }
  0xdb   :  { %2995 = vmatprep.mubr.msk.bf16.mxu0 %vm1444_vm0, %v3285_v1 }
  0xdc   :  { %2043 = vmatmul.mubr.bf16.gmra.mxu1 %v3284_v2 }
  0xe2   :  { %v2597_v5 = vpop.f32.mrf.mxu0  ;;  %2996 = vmatmul.mubr.msk.bf16.vlgmr.msra.gmra.mxu0 %vm1444_vm0, %v3286_v3 }
  0xe3   :  { %2999 = vmatprep.mubr.msk.bf16.mxu0 %vm1444_vm0, %v3287_v4 }
  0xe4   :  { %v2598_v7 = vpop.f32.mrf.mxu0  ;;  %v2661_v9 = vpop.f32.mrf.mxu1 }
  0xe5   :  { %v2599_v8 = vadd.f32 %v2598_v7, %v2597_v5 }
  0xe6   :  { %v2600_v10 = vpop.f32.mrf.mxu0  ;;  %v2662_v13 = vpop.f32.mrf.mxu1 }
  0xe7   :  { %v1504_v12 = vadd.f32 %v2599_v8, %v3928_v6  ;;  %v2663_v15 = vadd.f32 %v2662_v13, %v2661_v9  ;;  %v3295_v13 = vld [vmem:[%s4249_s3 + $0x28] sm:$0xff]  }
  0xe8   :  { %v2601_v16 = vpop.f32.mrf.mxu0  ;;  %v2664_v18 = vpop.f32.mrf.mxu1  ;;  %3015 = vmatprep.subr.bf16.mxu1 %v3295_v13 }
  0xe9   :  { %v2602_v17 = vadd.f32 %v2601_v16, %v2600_v10  ;;  %v3937_v19 = vadd.f32 %v2663_v15, %v1504_v12  ;;  %3016 = vmatpush3.bf16.msra.mxu1 %v3295_v13 }
  0xea   :  { %v2603_v20 = vpop.f32.mrf.mxu0  ;;  %3000 = vmatmul.mubr.msk.bf16.gmra.mxu0 %vm1444_vm0, %v3288_v11  ;;  %v2665_v22 = vpop.f32.mrf.mxu1 }
  0xeb   :  { %v1507_v21 = vadd.f32 %v2602_v17, %v3928_v6  ;;  %3003 = vmatprep.mubr.msk.bf16.mxu0 %vm1444_vm0, %v3289_v14  ;;  %v2666_v23 = vadd.f32 %v2665_v22, %v2664_v18 }
  0xec   :  { %v2604_v24 = vpop.f32.mrf.mxu0  ;;  %v2667_v26 = vpop.f32.mrf.mxu1 }
  0xed   :  { %v2605_v25 = vadd.f32 %v2604_v24, %v2603_v20  ;;  %v3942_v27 = vadd.f32 %v2666_v23, %v1507_v21 }
  0xee   :  { %v2606_v28 = vpop.f32.mrf.mxu0  ;;  %v2668_v31 = vpop.f32.mrf.mxu1 }
  0xef   :  { %v1512_v30 = vadd.f32 %v2605_v25, %v3928_v6  ;;  %v2669_v33 = vadd.f32 %v2668_v31, %v2667_v26 }
  0xf0   :  { %v2607_v34 = vpop.f32.mrf.mxu0  ;;  %v2670_v36 = vpop.f32.mrf.mxu1 }
  0xf1   :  { %v2608_v35 = vadd.f32 %v2607_v34, %v2606_v28  ;;  %v3951_v37 = vadd.f32 %v2669_v33, %v1512_v30 }
  0xf2   :  { %v2609_v38 = vpop.f32.mrf.mxu0  ;;  %3004 = vmatmul.mubr.msk.bf16.gmra.mxu0 %vm1444_vm0, %v3290_v29  ;;  %v2671_v40 = vpop.f32.mrf.mxu1 }
  0xf3   :  { %v1515_v39 = vadd.f32 %v2608_v35, %v3928_v6  ;;  %3007 = vmatprep.mubr.msk.bf16.mxu0 %vm1444_vm0, %v3291_v32  ;;  %v2672_v41 = vadd.f32 %v2671_v40, %v2670_v36  ;;  %v3296_v32 = vld [vmem:[%s4249_s3 + $0x20] sm:$0xff]  }
  0xf4   :  { %v2610_v42 = vpop.f32.mrf.mxu0  ;;  %v2673_v46 = vpop.f32.mrf.mxu1  ;;  %3017 = vmatprep.subr.bf16.mxu1 %v3296_v32 }
  0xf5   :  { %v2611_v45 = vadd.f32 %v2610_v42, %v2609_v38  ;;  %v3962_v47 = vadd.f32 %v2672_v41, %v1515_v39  ;;  %3018 = vmatpush3.bf16.msra.mxu1 %v3296_v32 }
  0xf6   :  { %v2612_v48 = vpop.f32.mrf.mxu0  ;;  %v2674_v50 = vpop.f32.mrf.mxu1 }
  0xf7   :  { %v1520_v49 = vadd.f32 %v2611_v45, %v3928_v6  ;;  %v2675_v51 = vadd.f32 %v2674_v50, %v2673_v46 }
  0xf8   :  { %v2613_v52 = vpop.f32.mrf.mxu0  ;;  %v2676_v54 = vpop.f32.mrf.mxu1 }
  0xf9   :  { %v2614_v53 = vadd.f32 %v2613_v52, %v2612_v48  ;;  %v3965_v55 = vadd.f32 %v2675_v51, %v1520_v49  ;;  %v3297_v51 = vld [vmem:[%s4249_s3 + $0x18] sm:$0xff]  }
  0xfa   :  { %v2615_v56 = vpop.f32.mrf.mxu0  ;;  %3008 = vmatmul.mubr.msk.bf16.gmra.mxu0 %vm1444_vm0, %v3292_v43  ;;  %v2677_v58 = vpop.f32.mrf.mxu1  ;;  %3019 = vmatprep.subr.bf16.mxu1 %v3297_v51 }
  0xfb   :  { %v1523_v57 = vadd.f32 %v2614_v53, %v3928_v6  ;;  %v2678_v60 = vadd.f32 %v2677_v58, %v2676_v54  ;;  %3020 = vmatpush3.bf16.msra.mxu1 %v3297_v51 }
  0xfc   :  { %v2616_v61 = vpop.f32.mrf.mxu0  ;;  %v2679_v63 = vpop.f32.mrf.mxu1 }
  0xfd   :  { %v2617_v62 = vadd.f32 %v2616_v61, %v2615_v56  ;;  %v3972_v0 = vadd.f32 %v2678_v60, %v1523_v57 }
  0xfe   :  { %v2618_v1 = vpop.f32.mrf.mxu0  ;;  %v2680_v3 = vpop.f32.mrf.mxu1 }
  0xff   :  { %v1528_v2 = vadd.f32 %v2617_v62, %v3928_v6  ;;  %v2681_v4 = vadd.f32 %v2680_v3, %v2679_v63 }
 0x100   :  { %v2619_v5 = vpop.f32.mrf.mxu0  ;;  %v2682_v8 = vpop.f32.mrf.mxu1 }
 0x101   :  { %v2620_v7 = vadd.f32 %v2619_v5, %v2618_v1  ;;  %v3975_v9 = vadd.f32 %v2681_v4, %v1528_v2 }
 0x102   :  { %v2621_v10 = vpop.f32.mrf.mxu0  ;;  %v2683_v12 = vpop.f32.mrf.mxu1 }
 0x103   :  { %v1531_v11 = vadd.f32 %v2620_v7, %v3928_v6  ;;  %v2684_v14 = vadd.f32 %v2683_v12, %v2682_v8  ;;  %v3298_v7 = vld [vmem:[%s4249_s3 + $0x10] sm:$0xff]  }
 0x104   :  { %v2622_v15 = vpop.f32.mrf.mxu0  ;;  %v2685_v17 = vpop.f32.mrf.mxu1  ;;  %3021 = vmatprep.subr.bf16.mxu1 %v3298_v7 }
 0x105   :  { %v2623_v16 = vadd.f32 %v2622_v15, %v2621_v10  ;;  %v3981_v18 = vadd.f32 %v2684_v14, %v1531_v11  ;;  %3022 = vmatpush3.bf16.msra.mxu1 %v3298_v7 }
 0x106   :  { %v2624_v20 = vpop.f32.mrf.mxu0  ;;  %v2686_v22 = vpop.f32.mrf.mxu1 }
 0x107   :  { %v1536_v21 = vadd.f32 %v2623_v16, %v3928_v6  ;;  %v2687_v23 = vadd.f32 %v2686_v22, %v2685_v17 }
 0x108   :  { %v2625_v24 = vpop.f32.mrf.mxu0  ;;  %v2688_v26 = vpop.f32.mrf.mxu1 }
 0x109   :  { %v2626_v25 = vadd.f32 %v2625_v24, %v2624_v20  ;;  %v3984_v28 = vadd.f32 %v2687_v23, %v1536_v21 }
 0x10a   :  { %v2627_v29 = vpop.f32.mrf.mxu0  ;;  %v2689_v31 = vpop.f32.mrf.mxu1 }
 0x10b   :  { %v1539_v30 = vadd.f32 %v2626_v25, %v3928_v6  ;;  %v2690_v33 = vadd.f32 %v2689_v31, %v2688_v26 }
 0x10c   :  { %v2628_v34 = vpop.f32.mrf.mxu0  ;;  %v2691_v36 = vpop.f32.mrf.mxu1 }
 0x10d   :  { %v2629_v35 = vadd.f32 %v2628_v34, %v2627_v29  ;;  %v3990_v38 = vadd.f32 %v2690_v33, %v1539_v30  ;;  %v3299_v29 = vld [vmem:[%s4249_s3 + $0x8] sm:$0xff]  }
 0x10e   :  { %v2630_v39 = vpop.f32.mrf.mxu0  ;;  %v2692_v41 = vpop.f32.mrf.mxu1  ;;  %3023 = vmatprep.subr.bf16.mxu1 %v3299_v29 }
 0x10f   :  { %v1544_v40 = vadd.f32 %v2629_v35, %v3928_v6  ;;  %v2693_v42 = vadd.f32 %v2692_v41, %v2691_v36  ;;  %3024 = vmatpush3.bf16.msra.mxu1 %v3299_v29 }
 0x110   :  { %v2631_v43 = vpop.f32.mrf.mxu0  ;;  %v2694_v45 = vpop.f32.mrf.mxu1 }
 0x111   :  { %v2632_v44 = vadd.f32 %v2631_v43, %v2630_v39  ;;  %v3993_v46 = vadd.f32 %v2693_v42, %v1544_v40 }
 0x112   :  { %v2633_v48 = vpop.f32.mrf.mxu0  ;;  %v2695_v50 = vpop.f32.mrf.mxu1 }
 0x113   :  { %v1547_v49 = vadd.f32 %v2632_v44, %v3928_v6  ;;  %v2696_v52 = vadd.f32 %v2695_v50, %v2694_v45 }
 0x114   :  { %v2634_v53 = vpop.f32.mrf.mxu0  ;;  %v2697_v56 = vpop.f32.mrf.mxu1 }
 0x115   :  { %v2635_v54 = vadd.f32 %v2634_v53, %v2633_v48  ;;  %v3999_v57 = vadd.f32 %v2696_v52, %v1547_v49  ;;  %v3300_v49 = vld [vmem:[%s4249_s3] sm:$0xff]  }
 0x116   :  { %v2636_v58 = vpop.f32.mrf.mxu0  ;;  %v2698_v60 = vpop.f32.mrf.mxu1  ;;  %3025 = vmatprep.subr.bf16.mxu1 %v3300_v49 }
 0x117   :  { %v1552_v59 = vadd.f32 %v2635_v54, %v3928_v6  ;;  %v2699_v61 = vadd.f32 %v2698_v60, %v2697_v56  ;;  %3026 = vmatpush3.bf16.msra.mxu1 %v3300_v49 }
 0x118   :  { %v2637_v62 = vpop.f32.mrf.mxu0  ;;  %v2700_v1 = vpop.f32.mrf.mxu1 }
 0x119   :  { %v2638_v63 = vadd.f32 %v2637_v62, %v2636_v58  ;;  %v4002_v2 = vadd.f32 %v2699_v61, %v1552_v59 }
 0x11a   :  { %v2639_v3 = vpop.f32.mrf.mxu0  ;;  %v2701_v5 = vpop.f32.mrf.mxu1 }
 0x11b   :  { %v1555_v4 = vadd.f32 %v2638_v63, %v3928_v6  ;;  %v2702_v8 = vadd.f32 %v2701_v5, %v2700_v1 }
 0x11c   :  { %v2640_v10 = vpop.f32.mrf.mxu0  ;;  %v2703_v12 = vpop.f32.mrf.mxu1 }
 0x11d   :  { %v2641_v11 = vadd.f32 %v2640_v10, %v2639_v3  ;;  %v4008_v13 = vadd.f32 %v2702_v8, %v1555_v4 }
 0x11e   :  { %v2642_v14 = vpop.f32.mrf.mxu0  ;;  %v2704_v16 = vpop.f32.mrf.mxu1 }
 0x11f   :  { %v1560_v15 = vadd.f32 %v2641_v11, %v3928_v6  ;;  %v2705_v17 = vadd.f32 %v2704_v16, %v2703_v12 }
 0x120   :  { %v2643_v20 = vpop.f32.mrf.mxu0  ;;  %v2706_v22 = vpop.f32.mrf.mxu1 }
 0x121   :  { %v2644_v21 = vadd.f32 %v2643_v20, %v2642_v14  ;;  %v4011_v23 = vadd.f32 %v2705_v17, %v1560_v15 }
 0x122   :  { %v2725_v24 = vpop.f32.mrf.mxu0  ;;  %v2707_v26 = vpop.f32.mrf.mxu1 }
 0x123   :  { %v1563_v25 = vadd.f32 %v2644_v21, %v3928_v6  ;;  %v2708_v30 = vadd.f32 %v2707_v26, %v2706_v22 }
 0x124   :  { %v2726_v31 = vpop.f32.mrf.mxu0  ;;  %v2789_v33 = vpop.f32.mrf.mxu1 }
 0x125   :  { %v2727_v32 = vadd.f32 %v2726_v31, %v2725_v24  ;;  %v4017_v34 = vadd.f32 %v2708_v30, %v1563_v25 }
 0x126   :  { %v2728_v35 = vpop.f32.mrf.mxu0  ;;  %v2790_v39 = vpop.f32.mrf.mxu1 }
 0x127   :  { %v1698_v36 = vadd.f32 %v2727_v32, %v3937_v19  ;;  %v2791_v40 = vadd.f32 %v2790_v39, %v2789_v33 }
 0x128   :  { %v2729_v41 = vpop.f32.mrf.mxu0  ;;  %v2792_v42 = vpop.f32.mrf.mxu1 }
 0x129   :  { %v2730_v6 = vadd.f32 %v2729_v41, %v2728_v35  ;;  %v4020_v43 = vadd.f32 %v2791_v40, %v1698_v36 }
 0x12a   :  { %v2731_v44 = vpop.f32.mrf.mxu0  ;;  %v2793_v48 = vpop.f32.mrf.mxu1 }
 0x12b   :  { %v1701_v45 = vadd.f32 %v2730_v6, %v3942_v27  ;;  %v2794_v50 = vadd.f32 %v2793_v48, %v2792_v42 }
 0x12c   :  { %v2732_v51 = vpop.f32.mrf.mxu0  ;;  %v2795_v53 = vpop.f32.mrf.mxu1 }
 0x12d   :  { %v2733_v52 = vadd.f32 %v2732_v51, %v2731_v44  ;;  %v4026_v19 = vadd.f32 %v2794_v50, %v1701_v45 }
 0x12e   :  { %v2734_v54 = vpop.f32.mrf.mxu0  ;;  %v2796_v58 = vpop.f32.mrf.mxu1 }
 0x12f   :  { %v1706_v56 = vadd.f32 %v2733_v52, %v3951_v37  ;;  %v2797_v59 = vadd.f32 %v2796_v58, %v2795_v53 }
 0x130   :  { %v2735_v60 = vpop.f32.mrf.mxu0  ;;  %v2798_v61 = vpop.f32.mrf.mxu1 }
 0x131   :  { %v2736_v27 = vadd.f32 %v2735_v60, %v2734_v54  ;;  %v4029_v62 = vadd.f32 %v2797_v59, %v1706_v56 }
 0x132   :  { %v2737_v63 = vpop.f32.mrf.mxu0  ;;  %v2799_v3 = vpop.f32.mrf.mxu1 }
 0x133   :  { %v1709_v1 = vadd.f32 %v2736_v27, %v3962_v47  ;;  %v2800_v4 = vadd.f32 %v2799_v3, %v2798_v61 }
 0x134   :  { %v2738_v5 = vpop.f32.mrf.mxu0  ;;  %v2801_v8 = vpop.f32.mrf.mxu1 }
 0x135   :  { %v2739_v7 = vadd.f32 %v2738_v5, %v2737_v63  ;;  %v4032_v10 = vadd.f32 %v2800_v4, %v1709_v1 }
 0x136   :  { %v2740_v11 = vpop.f32.mrf.mxu0  ;;  %v2802_v12 = vpop.f32.mrf.mxu1 }
 0x137   :  { %v1714_v37 = vadd.f32 %v2739_v7, %v3965_v55  ;;  %v2803_v14 = vadd.f32 %v2802_v12, %v2801_v8 }
 0x138   :  { %v2741_v15 = vpop.f32.mrf.mxu0  ;;  %v2804_v17 = vpop.f32.mrf.mxu1 }
 0x139   :  { %v2742_v16 = vadd.f32 %v2741_v15, %v2740_v11  ;;  %v4035_v20 = vadd.f32 %v2803_v14, %v1714_v37 }
 0x13a   :  { %v2743_v21 = vpop.f32.mrf.mxu0  ;;  %v2805_v22 = vpop.f32.mrf.mxu1 }
 0x13b   :  { %v1717_v47 = vadd.f32 %v2742_v16, %v3972_v0  ;;  %v2806_v24 = vadd.f32 %v2805_v22, %v2804_v17 }
 0x13c   :  { %v2744_v25 = vpop.f32.mrf.mxu0  ;;  %v2807_v29 = vpop.f32.mrf.mxu1 }
 0x13d   :  { %v2745_v26 = vadd.f32 %v2744_v25, %v2743_v21  ;;  %v4038_v30 = vadd.f32 %v2806_v24, %v1717_v47 }
 0x13e   :  { %v2746_v31 = vpop.f32.mrf.mxu0  ;;  %v2808_v32 = vpop.f32.mrf.mxu1 }
 0x13f   :  { %v1722_v55 = vadd.f32 %v2745_v26, %v3975_v9  ;;  %v2809_v33 = vadd.f32 %v2808_v32, %v2807_v29 }
 0x140   :  { %v2747_v35 = vpop.f32.mrf.mxu0  ;;  %v2810_v39 = vpop.f32.mrf.mxu1 }
 0x141   :  { %v2748_v36 = vadd.f32 %v2747_v35, %v2746_v31  ;;  %v4041_v40 = vadd.f32 %v2809_v33, %v1722_v55 }
 0x142   :  { %v2749_v41 = vpop.f32.mrf.mxu0  ;;  %v2811_v6 = vpop.f32.mrf.mxu1 }
 0x143   :  { %v1725_v0 = vadd.f32 %v2748_v36, %v3981_v18  ;;  %v2812_v42 = vadd.f32 %v2811_v6, %v2810_v39 }
 0x144   :  { %v2750_v44 = vpop.f32.mrf.mxu0  ;;  %v2813_v48 = vpop.f32.mrf.mxu1 }
 0x145   :  { %v2751_v45 = vadd.f32 %v2750_v44, %v2749_v41  ;;  %v4044_v49 = vadd.f32 %v2812_v42, %v1725_v0 }
 0x146   :  { %v2752_v50 = vpop.f32.mrf.mxu0  ;;  %v2814_v51 = vpop.f32.mrf.mxu1 }
 0x147   :  { %v1730_v9 = vadd.f32 %v2751_v45, %v3984_v28  ;;  %v2815_v52 = vadd.f32 %v2814_v51, %v2813_v48 }
 0x148   :  { %v2753_v53 = vpop.f32.mrf.mxu0  ;;  %v2816_v56 = vpop.f32.mrf.mxu1 }
 0x149   :  { %v2754_v54 = vadd.f32 %v2753_v53, %v2752_v50  ;;  %v4047_v58 = vadd.f32 %v2815_v52, %v1730_v9 }
 0x14a   :  { %v2755_v59 = vpop.f32.mrf.mxu0  ;;  %v2817_v60 = vpop.f32.mrf.mxu1 }
 0x14b   :  { %v1733_v18 = vadd.f32 %v2754_v54, %v3990_v38  ;;  %v2818_v27 = vadd.f32 %v2817_v60, %v2816_v56 }
 0x14c   :  { %v2756_v61 = vpop.f32.mrf.mxu0  ;;  %v2819_v1 = vpop.f32.mrf.mxu1 }
 0x14d   :  { %v2757_v63 = vadd.f32 %v2756_v61, %v2755_v59  ;;  %v4050_v3 = vadd.f32 %v2818_v27, %v1733_v18 }
 0x14e   :  { %v2758_v4 = vpop.f32.mrf.mxu0  ;;  %v2820_v5 = vpop.f32.mrf.mxu1 }
 0x14f   :  { %4252 = vst [vmem:[#allocation2_spill] sm:$0xff] %v4050_v3  ;;  %v1738_v28 = vadd.f32 %v2757_v63, %v3993_v46  ;;  %v2821_v7 = vadd.f32 %v2820_v5, %v2819_v1 }
 0x150   :  { %v2759_v8 = vpop.f32.mrf.mxu0  ;;  %v2822_v37 = vpop.f32.mrf.mxu1 }
 0x151   :  { %v2760_v11 = vadd.f32 %v2759_v8, %v2758_v4  ;;  %v4053_v12 = vadd.f32 %v2821_v7, %v1738_v28 }
 0x152   :  { %v2761_v14 = vpop.f32.mrf.mxu0  ;;  %v2823_v15 = vpop.f32.mrf.mxu1 }
 0x153   :  { %v1741_v38 = vadd.f32 %v2760_v11, %v3999_v57  ;;  %v2824_v16 = vadd.f32 %v2823_v15, %v2822_v37 }
 0x154   :  { %v2762_v17 = vpop.f32.mrf.mxu0  ;;  %v2825_v47 = vpop.f32.mrf.mxu1 }
 0x155   :  { %v2763_v21 = vadd.f32 %v2762_v17, %v2761_v14  ;;  %v4056_v22 = vadd.f32 %v2824_v16, %v1741_v38 }
 0x156   :  { %v2764_v24 = vpop.f32.mrf.mxu0  ;;  %v2826_v25 = vpop.f32.mrf.mxu1 }
 0x157   :  { %4253 = vst [vmem:[#allocation3_spill] sm:$0xff] %v4056_v22  ;;  %v1746_v46 = vadd.f32 %v2763_v21, %v4002_v2  ;;  %v2827_v26 = vadd.f32 %v2826_v25, %v2825_v47 }
 0x158   :  { %v2765_v29 = vpop.f32.mrf.mxu0  ;;  %v2828_v55 = vpop.f32.mrf.mxu1 }
 0x159   :  { %v2766_v31 = vadd.f32 %v2765_v29, %v2764_v24  ;;  %v4059_v32 = vadd.f32 %v2827_v26, %v1746_v46 }
 0x15a   :  { %v2767_v33 = vpop.f32.mrf.mxu0  ;;  %v2829_v35 = vpop.f32.mrf.mxu1 }
 0x15b   :  { %4254 = vst [vmem:[#allocation4_spill] sm:$0xff] %v4059_v32  ;;  %v1749_v57 = vadd.f32 %v2766_v31, %v4008_v13  ;;  %v2830_v36 = vadd.f32 %v2829_v35, %v2828_v55 }
 0x15c   :  { %v2768_v39 = vpop.f32.mrf.mxu0  ;;  %v2831_v0 = vpop.f32.mrf.mxu1 }
 0x15d   :  { %v2769_v41 = vadd.f32 %v2768_v39, %v2767_v33  ;;  %v4062_v6 = vadd.f32 %v2830_v36, %v1749_v57 }
 0x15e   :  { %v2770_v42 = vpop.f32.mrf.mxu0  ;;  %v2832_v44 = vpop.f32.mrf.mxu1 }
 0x15f   :  { %4255 = vst [vmem:[#allocation5_spill] sm:$0xff] %v4062_v6  ;;  %v1754_v2 = vadd.f32 %v2769_v41, %v4011_v23  ;;  %v2833_v45 = vadd.f32 %v2832_v44, %v2831_v0 }
 0x160   :  { %v2771_v48 = vpop.f32.mrf.mxu0  ;;  %v4065_v9 = vpop.f32.mrf.mxu1 }
 0x161   :  { %v2772_v50 = vadd.f32 %v2771_v48, %v2770_v42  ;;  %4256 = vst [vmem:[#allocation6_spill] sm:$0xff] %v4065_v9  ;;  %v4067_v51 = vadd.f32 %v2833_v45, %v1754_v2 }
 0x162   :  { %v2853_v52 = vpop.f32.mrf.mxu0  ;;  %v4072_v53 = vpop.f32.mrf.mxu1 }
 0x163   :  { %4257 = vst [vmem:[#allocation7_spill] sm:$0xff] %v4067_v51  ;;  %v4070_v13 = vadd.f32 %v2772_v50, %v4017_v34  ;;  %4259 = vst [vmem:[#allocation9_spill] sm:$0xff] %v4072_v53 }
 0x164   :  { %v2854_v54 = vpop.f32.mrf.mxu0  ;;  %v2917_v59 = vpop.f32.mrf.mxu1 }
 0x165   :  { %4258 = vst [vmem:[#allocation8_spill] sm:$0xff] %v4070_v13  ;;  %v2855_v56 = vadd.f32 %v2854_v54, %v2853_v52 }
 0x166   :  { %v2856_v18 = vpop.f32.mrf.mxu0  ;;  %v2918_v60 = vpop.f32.mrf.mxu1 }
 0x167   :  { %v4075_v23 = vadd.f32 %v2855_v56, %v4020_v43 }
 0x168   :  { %v2857_v27 = vpop.f32.mrf.mxu0  ;;  %v2920_v61 = vpop.f32.mrf.mxu1 }
 0x169   :  { %v2858_v22 = vadd.f32 %v2857_v27, %v2856_v18 }
 0x16a   :  { %v2859_v63 = vpop.f32.mrf.mxu0  ;;  %v2921_v1 = vpop.f32.mrf.mxu1 }
 0x16c   :  { %v2860_v4 = vpop.f32.mrf.mxu0  ;;  %v2923_v28 = vpop.f32.mrf.mxu1 }
 0x16d   :  { %v2861_v3 = vadd.f32 %v2860_v4, %v2859_v63  ;;  %v2922_v63 = vadd.f32 %v2921_v1, %v2920_v61 }
 0x16e   :  { %v2862_v5 = vpop.f32.mrf.mxu0  ;;  %v2924_v7 = vpop.f32.mrf.mxu1 }
 0x170   :  { %v2863_v34 = vpop.f32.mrf.mxu0  ;;  %v2926_v8 = vpop.f32.mrf.mxu1 }
 0x171   :  { %v2864_v9 = vadd.f32 %v2863_v34, %v2862_v5 }
 0x172   :  { %v2865_v11 = vpop.f32.mrf.mxu0  ;;  %v2927_v37 = vpop.f32.mrf.mxu1 }
 0x174   :  { %v2866_v14 = vpop.f32.mrf.mxu0  ;;  %v4077_v38 = vpop.f32.mrf.mxu1 }
 0x175   :  { %v2867_v34 = vadd.f32 %v2866_v14, %v2865_v11 }
 0x176   :  { %v2868_v15 = vpop.f32.mrf.mxu0  ;;  %v4079_v16 = vpop.f32.mrf.mxu1 }
 0x177   :  { %v1908_v1 = vadd.f32 %v2867_v34, %v4035_v20 }
 0x178   :  { %v2869_v43 = vpop.f32.mrf.mxu0  ;;  %v4081_v17 = vpop.f32.mrf.mxu1 }
 0x17a   :  { %v2871_v21 = vpop.f32.mrf.mxu0  ;;  %v4083_v47 = vpop.f32.mrf.mxu1 }
 0x17c   :  { %v2872_v24 = vpop.f32.mrf.mxu0  ;;  %v2935_v46 = vpop.f32.mrf.mxu1 }
 0x17d   :  { %v2873_v18 = vadd.f32 %v2872_v24, %v2871_v21 }
 0x17e   :  { %v2874_v25 = vpop.f32.mrf.mxu0  ;;  %v2936_v26 = vpop.f32.mrf.mxu1 }
 0x180   :  { %v2875_v29 = vpop.f32.mrf.mxu0  ;;  %v2938_v31 = vpop.f32.mrf.mxu1 }
 0x182   :  { %v4085_v55 = vpop.f32.mrf.mxu0  ;;  %v2939_v33 = vpop.f32.mrf.mxu1 }
 0x184   :  { %v4087_v57 = vpop.f32.mrf.mxu0  ;;  %v4089_v35 = vpop.f32.mrf.mxu1 }
 0x186   :  { %v4091_v36 = vpop.f32.mrf.mxu0  ;;  %v4093_v39 = vpop.f32.mrf.mxu1 }
 0x187   :  { %4260 = vst [vmem:[#allocation10_spill] sm:$0xff] %v4093_v39 }
 0x188   :  { %v4095_v41 = vpop.f32.mrf.mxu0  ;;  %v4097_v0 = vpop.f32.mrf.mxu1 }
 0x189   :  { %4261 = vst [vmem:[#allocation11_spill] sm:$0xff] %v4097_v0 }
 0x18a   :  { %v2883_v42 = vpop.f32.mrf.mxu0  ;;  %v4099_v2 = vpop.f32.mrf.mxu1 }
 0x18b   :  { %4262 = vst [vmem:[#allocation12_spill] sm:$0xff] %v4099_v2 }
 0x18c   :  { %v2884_v44 = vpop.f32.mrf.mxu0  ;;  %v4101_v45 = vpop.f32.mrf.mxu1 }
 0x18e   :  { %v2886_v48 = vpop.f32.mrf.mxu0  ;;  %v4103_v50 = vpop.f32.mrf.mxu1 }
 0x190   :  { %v2887_v52 = vpop.f32.mrf.mxu0  ;;  %v4105_v54 = vpop.f32.mrf.mxu1  ;;  %v4281_v34 = vld [vmem:[#allocation11_spill] sm:$0xff] }
 0x191   :  { %4263 = vst [vmem:[#allocation13_spill] sm:$0xff] %v4105_v54 }
 0x192   :  { %v4107_v56 = vpop.f32.mrf.mxu0  ;;  %v4111_v32 = vpop.f32.mrf.mxu1 }
 0x193   :  { %4264 = vst [vmem:[#allocation14_spill] sm:$0xff] %v4107_v56  ;;  %4266 = vst [vmem:[#allocation16_spill] sm:$0xff] %v4111_v32  ;;  %v2925_v32 = vadd.f32 %v2924_v7, %v2923_v28  ;;  %v2870_v28 = vadd.f32 %v2869_v43, %v2868_v15 }
 0x194   :  { %v4109_v6 = vpop.f32.mrf.mxu0  ;;  %v4117_v2 = vpop.f32.mrf.mxu1 }
 0x195   :  { %4265 = vst [vmem:[#allocation15_spill] sm:$0xff] %v4109_v6  ;;  %4269 = vst [vmem:[#allocation19_spill] sm:$0xff] %v4117_v2  ;;  %v1900_v6 = vadd.f32 %v2861_v3, %v4029_v62  ;;  %v2928_v2 = vadd.f32 %v2927_v37, %v2926_v8  ;;  %v1911_v11 = vadd.f32 %v2870_v28, %v4038_v30 }
 0x196   :  { %v4113_v51 = vpop.f32.mrf.mxu0  ;;  %v4123_v54 = vpop.f32.mrf.mxu1  ;;  %v2885_v37 = vadd.f32 %v2884_v44, %v2883_v42  ;;  %v2882_v30 = vadd.f32 %v4095_v41, %v4091_v36  ;;  %v4274_v42 = vld [vmem:[#allocation10_spill] sm:$0xff]  ;;  %v4275_v44 = vld [vmem:[#allocation3_spill] sm:$0xff] }
 0x197   :  { %4267 = vst [vmem:[#allocation17_spill] sm:$0xff] %v4113_v51  ;;  %4272 = vst [vmem:[#allocation22_spill] sm:$0xff] %v4123_v54  ;;  %v2919_v51 = vadd.f32 %v2918_v60, %v2917_v59  ;;  %v1997_v27 = vadd.f32 %v2925_v32, %v1900_v6  ;;  %v2876_v54 = vadd.f32 %v2875_v29, %v2874_v25 }
 0x198   :  { %v4115_v13 = vpop.f32.mrf.mxu0  ;;  %v4132_v4 = vpop.f32.mrf.mxu1  ;;  %v2931_v32 = vadd.f32 %v4079_v16, %v4077_v38  ;;  %v2888_v38 = vadd.f32 %v2887_v52, %v2886_v48  ;;  %v4276_v36 = vld [vmem:[#allocation13_spill] sm:$0xff] }
 0x199   :  { %4268 = vst [vmem:[#allocation18_spill] sm:$0xff] %v4115_v13  ;;  %v1903_v13 = vadd.f32 %v2864_v9, %v4032_v10  ;;  %v1989_v62 = vadd.f32 %v2919_v51, %v4075_v23  ;;  %v1919_v6 = vadd.f32 %v2876_v54, %v4044_v49  ;;  %v2940_v51 = vadd.f32 %v2939_v33, %v2938_v31 }
 0x19a   :  { %v4119_v0 = vpop.f32.mrf.mxu0  ;;  %v4135_v59 = vpop.f32.mrf.mxu1  ;;  %v2879_v49 = vadd.f32 %v4087_v57, %v4085_v55  ;;  %v2005_v25 = vadd.f32 %v2931_v32, %v1908_v1  ;;  %v1935_v48 = vadd.f32 %v2888_v38, %v4275_v44  ;;  %v4285_v1 = vld [vmem:[#allocation14_spill] sm:$0xff]  ;;  %v4295_v44 = vld [vmem:[#allocation5_spill] sm:$0xff] }
 0x19b   :  { %4270 = vst [vmem:[#allocation20_spill] sm:$0xff] %v4119_v0  ;;  %v1895_v0 = vadd.f32 %v2858_v22, %v4026_v19  ;;  %v2000_v3 = vadd.f32 %v2928_v2, %v1903_v13  ;;  %v1916_v19 = vadd.f32 %v2873_v18, %v4041_v40  ;;  %v2937_v22 = vadd.f32 %v2936_v26, %v2935_v46  ;;  %v4280_v18 = vld [vmem:[#allocation2_spill] sm:$0xff] }
 0x19c   :  { %v4121_v53 = vpop.f32.mrf.mxu0  ;;  %v2934_v40 = vadd.f32 %v4083_v47, %v4081_v17  ;;  %v2959_v14 = vpop.f32.mrf.mxu1  ;;  %v2016_v26 = vadd.f32 %v2940_v51, %v1919_v6  ;;  %v1932_v17 = vadd.f32 %v2885_v37, %v4053_v12  ;;  %v2949_v47 = vadd.f32 %v4103_v50, %v4101_v45  ;;  %v4277_v12 = vld [vmem:[#allocation16_spill] sm:$0xff]  ;;  %v4286_v32 = vld [vmem:[#allocation15_spill] sm:$0xff] }
 0x19d   :  { %4271 = vst [vmem:[#allocation21_spill] sm:$0xff] %v4121_v53  ;;  %v1992_v9 = vadd.f32 %v2922_v63, %v1895_v0  ;;  %v2013_v24 = vadd.f32 %v2937_v22, %v1916_v19  ;;  %v1924_v57 = vadd.f32 %v2879_v49, %v4047_v58  ;;  %v2943_v2 = vadd.f32 %v4274_v42, %v4089_v35  ;;  %v4279_v63 = vld [vmem:[#allocation9_spill] sm:$0xff]  ;;  %v4282_v58 = vld [vmem:[#allocation12_spill] sm:$0xff] }
 0x19e   :  { %v4125_v56 = vpop.f32.mrf.mxu0  ;;  %v2960_v29 = vpop.f32.mrf.mxu1  ;;  %v2008_v55 = vadd.f32 %v2934_v40, %v1911_v11  ;;  %v2952_v41 = vadd.f32 %v4277_v12, %v4276_v36  ;;  %v2029_v35 = vadd.f32 %v2949_v47, %v1932_v17  ;;  %v2891_v6 = vadd.f32 %v4286_v32, %v4285_v1  ;;  %v4288_v37 = vld [vmem:[#allocation8_spill] sm:$0xff]  ;;  %v4293_v17 = vld [vmem:[#allocation19_spill] sm:$0xff]  ;;  %v4294_v47 = vld [vmem:[#allocation22_spill] sm:$0xff] }
 0x19f   :  { %4273 = vst [vmem:[#allocation23_spill] sm:$0xff] %v4125_v56  ;;  %v2021_v11 = vadd.f32 %v2943_v2, %v1924_v57 }
 0x1a0   :  { %v4128_v39 = vpop.f32.mrf.mxu0  ;;  %v2032_v40 = vadd.f32 %v2952_v41, %v1935_v48 }
 0x1a2   :  { %v2997_v5 = vpop.f32.mrf.mxu0 }
 0x1a3   :  { %v2094_v53 = vadd.f32 %v2997_v5, %v1997_v27  ;;  %v1927_v27 = vadd.f32 %v2882_v30, %v4280_v18 }
 0x1a4   :  { %v2085_v56 = vpop.f32.mrf.mxu0 }
 0x1a5   :  { %v2086_v60 = vadd.f32 %v2085_v56, %v1989_v62  ;;  %v2150_v13 = vmax.f32 %v2094_v53, 0.0  ;;  %v4278_v56 = vld [vmem:[#allocation6_spill] sm:$0xff]  ;;  %v2946_v62 = vadd.f32 %v4282_v58, %v4281_v34 }
 0x1a6   :  { %v2998_v10 = vpop.f32.mrf.mxu0  ;;  %v2836_v5 = vadd.f32 %v4279_v63, %v4278_v56 }
 0x1a7   :  { %v2097_v61 = vadd.f32 %v2998_v10, %v2000_v3  ;;  %v2148_v43 = vmax.f32 %v2086_v60, 0.0  ;;  %v2962_v3 = vpop.f32.mrf.mxu1  ;;  %v4283_v10 = vld [vmem:[#allocation20_spill] sm:$0xff]  ;;  %v2024_v38 = vadd.f32 %v2946_v62, %v1927_v27 }
 0x1a8   :  { %v2088_v7 = vpop.f32.mrf.mxu0 }
 0x1a9   :  { %v2151_v23 = vmax.f32 %v2097_v61, 0.0  ;;  %v2089_v8 = vadd.f32 %v2088_v7, %v1992_v9  ;;  %v4284_v9 = vld [vmem:[#allocation21_spill] sm:$0xff]  ;;  %v4287_v7 = vld [vmem:[#allocation23_spill] sm:$0xff] }
 0x1aa   :  { %v3001_v15 = vpop.f32.mrf.mxu0  ;;  %v2897_v19 = vadd.f32 %v4284_v9, %v4283_v10  ;;  %v2900_v51 = vadd.f32 %v4128_v39, %v4287_v7  ;;  %v4292_v39 = vld [vmem:[#allocation4_spill] sm:$0xff]  ;;  %v2572_v9 = vld [vmem:[%s4250_s4] ss:$0 sm:$0xff] }
 0x1ab   :  { %v2165_v20 = vpack.c.bf16 %v2151_v23, %v2150_v13  ;;  %v2149_v21 = vmax.f32 %v2089_v8, 0.0  ;;  %v2110_v46 = vadd.f32 %v3001_v15, %v2013_v24  ;;  %v1854_v15 = vadd.f32 %v2836_v5, %v4288_v37  ;;  %v2963_v24 = vpop.f32.mrf.mxu1 }
 0x1ac   :  { %v2101_v16 = vpop.f32.mrf.mxu0  ;;  %v1940_v30 = vadd.f32 %v2891_v6, %v4292_v39 }
 0x1ad   :  { %v2164_v53 = vpack.c.bf16 %v2149_v21, %v2148_v43  ;;  %v2102_v33 = vadd.f32 %v2101_v16, %v2005_v25  ;;  %v2154_v54 = vmax.f32 %v2110_v46, 0.0  ;;  %v4289_v43 = vld [vmem:[#allocation17_spill] sm:$0xff]  ;;  %v4291_v16 = vld [vmem:[#allocation7_spill] sm:$0xff]  ;;  %v2961_v46 = vadd.f32 %v2960_v29, %v2959_v14 }
 0x1ae   :  { %v3002_v31 = vpop.f32.mrf.mxu0  ;;  %v2958_v14 = vadd.f32 %v4135_v59, %v4132_v4 }
 0x1af   :  { %v2113_v0 = vadd.f32 %v3002_v31, %v2016_v26  ;;  %3027 = vmatprep.mubr.bf16.mxu1 %v2164_v53  ;;  %v2152_v22 = vmax.f32 %v2102_v33, 0.0  ;;  %v1948_v53 = vadd.f32 %v2897_v19, %v4291_v16  ;;  %v2955_v31 = vadd.f32 %v4294_v47, %v4293_v17 }
 0x1b0   :  { %v2104_v52 = vpop.f32.mrf.mxu0  ;;  %3028 = vmatmul.mubr.bf16.vlgmr.msra.gmra.mxu1 %v2165_v20  ;;  %v4290_v20 = vld [vmem:[#allocation18_spill] sm:$0xff]  ;;  %v1951_v33 = vadd.f32 %v2900_v51, %v1854_v15 }
 0x1b1   :  { %v2155_v45 = vmax.f32 %v2113_v0, 0.0  ;;  %v2105_v50 = vadd.f32 %v2104_v52, %v2008_v55  ;;  %v2894_v21 = vadd.f32 %v4290_v20, %v4289_v43  ;;  %v2964_v55 = vadd.f32 %v2963_v24, %v2962_v3 }
 0x1b2   :  { %v3005_v28 = vpop.f32.mrf.mxu0  ;;  %v2045_v41 = vadd.f32 %v2961_v46, %v1948_v53  ;;  %v2037_v56 = vadd.f32 %v2955_v31, %v1940_v30 }
 0x1b3   :  { %v2167_v60 = vpack.c.bf16 %v2155_v45, %v2154_v54  ;;  %v2153_v61 = vmax.f32 %v2105_v50, 0.0  ;;  %v2126_v8 = vadd.f32 %v3005_v28, %v2029_v35  ;;  %v1943_v48 = vadd.f32 %v2894_v21, %v4295_v44 }
 0x1b4   :  { %v2117_v13 = vpop.f32.mrf.mxu0  ;;  %v2048_v63 = vadd.f32 %v2964_v55, %v1951_v33 }
 0x1b5   :  { %v2166_v23 = vpack.c.bf16 %v2153_v61, %v2152_v22  ;;  %v2118_v25 = vadd.f32 %v2117_v13, %v2021_v11  ;;  %v2158_v57 = vmax.f32 %v2126_v8, 0.0  ;;  %v2040_v34 = vadd.f32 %v2958_v14, %v1943_v48 }
 0x1b6   :  { %v3006_v49 = vpop.f32.mrf.mxu0 }
 0x1b7   :  { %v2129_v26 = vadd.f32 %v3006_v49, %v2032_v40  ;;  %3031 = vmatprep.mubr.bf16.mxu1 %v2166_v23  ;;  %v2156_v52 = vmax.f32 %v2118_v25, 0.0 }
 0x1b8   :  { %v2120_v0 = vpop.f32.mrf.mxu0  ;;  %3032 = vmatmul.mubr.bf16.gmra.mxu1 %v2167_v60 }
 0x1b9   :  { %v2159_v42 = vmax.f32 %v2129_v26, 0.0  ;;  %v2121_v2 = vadd.f32 %v2120_v0, %v2024_v38 }
 0x1ba   :  { %v3009_v29 = vpop.f32.mrf.mxu0 }
 0x1bb   :  { %v2169_v36 = vpack.c.bf16 %v2159_v42, %v2158_v57  ;;  %v2157_v12 = vmax.f32 %v2121_v2, 0.0  ;;  %v2142_v50 = vadd.f32 %v3009_v29, %v2045_v41 }
 0x1bc   :  { %v2133_v54 = vpop.f32.mrf.mxu0 }
 0x1bd   :  { %v2168_v45 = vpack.c.bf16 %v2157_v12, %v2156_v52  ;;  %v2134_v18 = vadd.f32 %v2133_v54, %v2037_v56  ;;  %v2162_v62 = vmax.f32 %v2142_v50, 0.0 }
 0x1be   :  { %v3010_v5 = vpop.f32.mrf.mxu0 }
 0x1bf   :  { %v2145_v27 = vadd.f32 %v3010_v5, %v2048_v63  ;;  %3035 = vmatprep.mubr.bf16.mxu1 %v2168_v45  ;;  %v2160_v59 = vmax.f32 %v2134_v18, 0.0 }
 0x1c0   :  { %v2136_v58 = vpop.f32.mrf.mxu0  ;;  %3036 = vmatmul.mubr.bf16.gmra.mxu1 %v2169_v36 }
 0x1c1   :  { %v2163_v3 = vmax.f32 %v2145_v27, 0.0  ;;  %v2137_v4 = vadd.f32 %v2136_v58, %v2040_v34 }
 0x1c3   :  { %v2171_v35 = vpack.c.bf16 %v2163_v3, %v2162_v62  ;;  %v2161_v28 = vmax.f32 %v2137_v4, 0.0 }
 0x1c5   :  { %v2170_v10 = vpack.c.bf16 %v2161_v28, %v2160_v59 }
 0x1c7   :  { %3039 = vmatprep.mubr.bf16.mxu1 %v2170_v10 }
 0x1c8   :  { %3040 = vmatmul.mubr.bf16.gmra.mxu1 %v2171_v35 }
 0x270   :  { %v3029_v19 = vpop.f32.mrf.mxu1 }
 0x271   :  { %v2286_v22 = vadd.f32 %v3029_v19, %v2572_v9 }
 0x272   :  { %v2277_v60 = vpop.f32.mrf.mxu1 }
 0x273   :  { %2343 = vst.msk [vmem:[%s4251_s5 + $0x10] sm:$0xff] %vm2340_vm1, %v2286_v22  ;;  %v2278_v61 = vadd.f32 %v2572_v9, %v2277_v60 }
 0x274   :  { %v3030_v1 = vpop.f32.mrf.mxu1 }
 0x275   :  { %2341 = vst.msk [vmem:[%s4251_s5] sm:$0xff] %vm2340_vm1, %v2278_v61  ;;  %v2289_v32 = vadd.f32 %v3030_v1, %v2572_v9 }
 0x276   :  { %v2280_v6 = vpop.f32.mrf.mxu1 }
 0x277   :  { %2344 = vst.msk [vmem:[%s4251_s5 + $0x18] sm:$0xff] %vm2340_vm1, %v2289_v32  ;;  %v2281_v7 = vadd.f32 %v2572_v9, %v2280_v6 }
 0x278   :  { %v3033_v51 = vpop.f32.mrf.mxu1 }
 0x279   :  { %2342 = vst.msk [vmem:[%s4251_s5 + $0x8] sm:$0xff] %vm2340_vm1, %v2281_v7  ;;  %v2302_v13 = vadd.f32 %v3033_v51, %v2572_v9 }
 0x27a   :  { %v2293_v23 = vpop.f32.mrf.mxu1 }
 0x27b   :  { %2347 = vst.msk [vmem:[%s4251_s5 + $0x30] sm:$0xff] %vm2340_vm1, %v2302_v13  ;;  %v2294_v8 = vadd.f32 %v2572_v9, %v2293_v23 }
 0x27c   :  { %v3034_v11 = vpop.f32.mrf.mxu1 }
 0x27d   :  { %2345 = vst.msk [vmem:[%s4251_s5 + $0x20] sm:$0xff] %vm2340_vm1, %v2294_v8  ;;  %v2305_v40 = vadd.f32 %v3034_v11, %v2572_v9 }
 0x27e   :  { %v2296_v37 = vpop.f32.mrf.mxu1 }
 0x27f   :  { %2348 = vst.msk [vmem:[%s4251_s5 + $0x38] sm:$0xff] %vm2340_vm1, %v2305_v40  ;;  %v2297_v15 = vadd.f32 %v2572_v9, %v2296_v37 }
 0x280   :  { %v3037_v43 = vpop.f32.mrf.mxu1 }
 0x281   :  { %2346 = vst.msk [vmem:[%s4251_s5 + $0x28] sm:$0xff] %vm2340_vm1, %v2297_v15  ;;  %v2318_v20 = vadd.f32 %v3037_v43, %v2572_v9 }
 0x282   :  { %v2309_v21 = vpop.f32.mrf.mxu1 }
 0x283   :  { %2351 = vst.msk [vmem:[%s4251_s5 + $0x50] sm:$0xff] %vm2340_vm1, %v2318_v20  ;;  %v2310_v24 = vadd.f32 %v2572_v9, %v2309_v21 }
 0x284   :  { %v3038_v49 = vpop.f32.mrf.mxu1 }
 0x285   :  { %2349 = vst.msk [vmem:[%s4251_s5 + $0x40] sm:$0xff] %vm2340_vm1, %v2310_v24  ;;  %v2321_v38 = vadd.f32 %v3038_v49, %v2572_v9 }
 0x286   :  { %v2312_v16 = vpop.f32.mrf.mxu1 }
 0x287   :  { %2352 = vst.msk [vmem:[%s4251_s5 + $0x58] sm:$0xff] %vm2340_vm1, %v2321_v38  ;;  %v2313_v53 = vadd.f32 %v2572_v9, %v2312_v16 }
 0x288   :  { %v3041_v46 = vpop.f32.mrf.mxu1 }
 0x289   :  { %2350 = vst.msk [vmem:[%s4251_s5 + $0x48] sm:$0xff] %vm2340_vm1, %v2313_v53  ;;  %v2334_v25 = vadd.f32 %v3041_v46, %v2572_v9 }
 0x28a   :  { %v2325_v26 = vpop.f32.mrf.mxu1 }
 0x28b   :  { %2355 = vst.msk [vmem:[%s4251_s5 + $0x70] sm:$0xff] %vm2340_vm1, %v2334_v25  ;;  %v2326_v39 = vadd.f32 %v2572_v9, %v2325_v26 }
 0x28c   :  { %v3042_v30 = vpop.f32.mrf.mxu1 }
 0x28d   :  { %2353 = vst.msk [vmem:[%s4251_s5 + $0x60] sm:$0xff] %vm2340_vm1, %v2326_v39  ;;  %v2337_v17 = vadd.f32 %v3042_v30, %v2572_v9 }
 0x28e   :  { %v2328_v47 = vpop.f32.mrf.mxu1 }
 0x28f   :  { %2356 = vst.msk [vmem:[%s4251_s5 + $0x78] sm:$0xff] %vm2340_vm1, %v2337_v17  ;;  %v2329_v31 = vadd.f32 %v2572_v9, %v2328_v47 }
 0x291   :  { %2354 = vst.msk [vmem:[%s4251_s5 + $0x68] sm:$0xff] %vm2340_vm1, %v2329_v31 }

</bundles_post_ra>
